<compile_context>
chip_gen: v7x
topology: tpu7x:2x2x1
jax: 0.10.0
libtpu: 0.0.40
codegen_flags: <defaults>
</compile_context>

<pallas_src>
import functools

import numpy as np
import jax
import jax.numpy as jnp
from jax import lax
from jax.experimental import pallas as pl
from jax.experimental.pallas import tpu as pltpu

# VICRegLoss.__init__ defaults (module has no learnable parameters).
LAMBDA_PARAM = 25.0
MU_PARAM = 25.0
NU_PARAM = 1.0
EPS = 1e-4
MAX_STD = 1.0

LANE = 128
MXU_DEPTH = 256          # full systolic-array contraction depth (v6e/v7x; >= v5e's 128)
MAX_B_TILE = 2048


def _round_up(x, m):
    return ((x + m - 1) // m) * m


def _cdiv(a, b):
    return -(-a // b)


def _vmem_capacity_bytes():
    """Physical per-TensorCore VMEM; conservative fallback if the query fails."""
    try:
        return int(pltpu.get_tpu_info().vmem_capacity_bytes)
    except Exception:
        return 64 * 1024 * 1024   # v7x per-TC capacity: safe on every generation


def _vicreg_kernel(za_ref, zb_ref, out_ref,
                   sum_a, sum_b, inv_vec, gram_a, gram_b,
                   *, batch, true_d, mxu_dtype):
    """Accumulate uncentered moments per B-tile; finalize on the last tile."""
    step = pl.program_id(0)
    nsteps = pl.num_programs(0)
    G, _, Dp = za_ref.shape  # (G, b_tile, Dp) block

    @pl.when(step == 0)
    def _init():
        sum_a[...] = jnp.zeros_like(sum_a)
        sum_b[...] = jnp.zeros_like(sum_b)
        inv_vec[...] = jnp.zeros_like(inv_vec)
        gram_a[...] = jnp.zeros_like(gram_a)
        gram_b[...] = jnp.zeros_like(gram_b)

    xa = za_ref[...]                      # native dtype (bf16 stays bf16 for MXU)
    xb = zb_ref[...]
    xa_f = xa.astype(jnp.float32)         # f32 for the VPU accumulations
    xb_f = xb.astype(jnp.float32)

    # ---- invariance: per-feature lane-vector partial sum (cross-lane reduce
    #      happens once at finalize instead of an XLU scalar reduce per tile) ----
    diff = xa_f - xb_f
    inv_vec[...] += jnp.sum(diff * diff, axis=1)

    # ---- per-feature first moment (second moment == diag(Gram), no extra pass) ----
    sum_a[...] += jnp.sum(xa_f, axis=1)
    sum_b[...] += jnp.sum(xb_f, axis=1)

    # ---- uncentered Gram: batched over G, contraction over the B tile (MXU).
    #      dot_general with contraction on the sublane dim (transposed-LHS form),
    #      no per-tile transpose. ----
    if mxu_dtype is not None and xa.dtype != mxu_dtype:
        xma = xa.astype(mxu_dtype)
        xmb = xb.astype(mxu_dtype)
    else:
        xma, xmb = xa, xb
    dn = (((1,), (1,)), ((0,), (0,)))     # contract b (axis 1), batch g (axis 0)
    gram_a[...] += lax.dot_general(xma, xma, dn, preferred_element_type=jnp.float32)
    gram_b[...] += lax.dot_general(xmb, xmb, dn, preferred_element_type=jnp.float32)

    @pl.when(step == nsteps - 1)
    def _finalize():
        bsz = jnp.float32(batch)
        denom = jnp.float32(batch - 1)
        # mask for zero-padded feature columns (only the variance relu needs it)
        lane_mask = lax.broadcasted_iota(jnp.int32, (G, Dp), 1) < true_d
        eye = (lax.broadcasted_iota(jnp.int32, (Dp, Dp), 0)
               == lax.broadcasted_iota(jnp.int32, (Dp, Dp), 1)).astype(jnp.float32)

        def per_input(e_ref, gram_ref):
            e = e_ref[...]                               # (G, Dp)     sum_b x
            gram = gram_ref[...]                         # (G, Dp, Dp) sum_b x x^T
            # diag(Gram) == per-feature uncentered sum of squares
            diag = jnp.sum(gram * eye[None], axis=-1)    # (G, Dp)
            var_raw = (diag - e * e / bsz) / denom       # == diag(cov)
            var = jnp.maximum(var_raw, 0.0)              # guard f32 cancellation
            std = jnp.sqrt(var + EPS)
            relu = jnp.maximum(MAX_STD - std, 0.0)
            relu = jnp.where(lane_mask, relu, 0.0)
            var_l = jnp.sum(relu) / jnp.float32(G * true_d)

            # sum(cov^2) via the expanded form -- no (G, Dp, Dp) cov / outer-
            # product temporaries, just streaming passes over Gram:
            #   sum((Gram - e e^T / B)^2)
            #     = sum(Gram^2) - (2/B) e^T Gram e + (e.e)^2 / B^2
            g2 = jnp.sum(gram * gram)
            ge = jnp.sum(gram * e[:, None, :], axis=-1)            # (G, Dp) Gram @ e
            ege = jnp.sum(ge * e)                                  # sum_g e^T Gram e
            ee = jnp.sum(e * e, axis=-1, keepdims=True)            # (G, 1)
            tot_sq = g2 - (2.0 / bsz) * ege + jnp.sum(ee * ee) / (bsz * bsz)
            cov_sq = tot_sq / (denom * denom)
            off_sq = cov_sq - jnp.sum(var_raw * var_raw)           # drop diagonal
            cov_l = off_sq / jnp.float32(true_d * G)
            return var_l, cov_l

        var_a, cov_a = per_input(sum_a, gram_a)
        var_b, cov_b = per_input(sum_b, gram_b)

        inv_loss = jnp.sum(inv_vec[...]) / jnp.float32(batch * G * true_d)
        var_loss = 0.5 * (var_a + var_b)
        cov_loss = cov_a + cov_b
        total = (LAMBDA_PARAM * inv_loss + MU_PARAM * var_loss
                 + NU_PARAM * cov_loss)

        out_ref[0] = total
        out_ref[1] = inv_loss
        out_ref[2] = var_loss
        out_ref[3] = cov_loss


def vicreg_loss(z_a, z_b, *, b_tile=None, mxu_dtype=None, vmem_budget_bytes=None):
    """Pallas implementation of VICRegLoss.forward -> (loss, (inv, var, cov)).

    mxu_dtype: optionally cast only the Gram matmul operands (e.g. jnp.bfloat16
    when inputs are f32) -- ~3x faster MXU at slightly looser cov precision.
    """
    assert z_a.shape == z_b.shape, "z_a and z_b must have the same shape"
    B = int(z_a.shape[0])
    D = int(z_a.shape[-1])
    G = int(np.prod(z_a.shape[1:-1], dtype=np.int64)) if z_a.ndim > 2 else 1
    if B < 2:
        raise ValueError("VICReg variance/covariance require batch_size >= 2")

    # Keep bf16 inputs in bf16 (half the HBM traffic, native MXU path); anything
    # else goes to f32. All in-kernel accumulation is f32 regardless.
    in_dt = jnp.bfloat16 if np.dtype(z_a.dtype) == np.dtype(jnp.bfloat16) else jnp.float32
    itemsize = 2 if in_dt == jnp.bfloat16 else 4

    za = jnp.asarray(z_a, in_dt).reshape(B, G, D)
    zb = jnp.asarray(z_b, in_dt).reshape(B, G, D)

    # Batch-major layout for the Gram matmul: (G, B, D), B on sublanes, D on
    # lanes.  For the common G == 1 case this is layout-equivalent (no copy).
    # TODO(synk): for G > 1 this transpose materializes an HBM copy; a
    # native-(B, G, D)-layout kernel variant would avoid it.
    za = jnp.transpose(za, (1, 0, 2))
    zb = jnp.transpose(zb, (1, 0, 2))

    # Lane-align D (zero padding is exact; only the variance relu is masked).
    Dp = _round_up(D, LANE)
    if Dp != D:
        pad = [(0, 0), (0, 0), (0, Dp - D)]
        za = jnp.pad(za, pad)
        zb = jnp.pad(zb, pad)

    # ---- generation-aware VMEM sizing -------------------------------------
    vmem_cap = _vmem_capacity_bytes()
    if vmem_budget_bytes is None:
        vmem_budget_bytes = int(vmem_cap * 0.80)   # ~102 MiB on 128 MiB parts, ~51 MiB on v7x

    granule = 16 if in_dt == jnp.bfloat16 else 8   # bf16 min tile is (16, 128)
    Bg = _round_up(B, granule)

    row_in = G * Dp * itemsize                     # one batch row, one input
    row_f32 = G * Dp * 4
    acc_bytes = 2 * G * Dp * Dp * 4 + 3 * G * Dp * 4       # Grams + E_a/E_b/inv
    fin_bytes = G * Dp * Dp * 4                    # finalize streaming-temp headroom
    per_row = 4 * row_in + 3 * row_f32             # 2 inputs x 2 buffers + f32 temps

    avail = vmem_budget_bytes - acc_bytes - fin_bytes
    bt_cap = (avail // per_row) if avail > 0 else 0
    bt_cap = (bt_cap // granule) * granule
    # Never starve the MXU contraction depth; never exceed what B needs.
    bt_cap = max(bt_cap, min(MXU_DEPTH, Bg))
    bt_cap = min(bt_cap, MAX_B_TILE, Bg)

    if b_tile is None:
        num_tiles = _cdiv(Bg, bt_cap)
        # Derive b_tile from num_tiles so B-padding waste stays O(num_tiles*granule)
        b_tile = _round_up(_cdiv(Bg, num_tiles), granule)
    else:
        b_tile = max(granule, _round_up(int(b_tile), granule))
        num_tiles = _cdiv(Bg, b_tile)
    Bp = num_tiles * b_tile

    if Bp != B:
        pad = [(0, 0), (0, Bp - B), (0, 0)]        # zero rows contribute nothing
        za = jnp.pad(za, pad)
        zb = jnp.pad(zb, pad)

    working = acc_bytes + fin_bytes + per_row * b_tile
    vmem_limit = max(32 * 1024 * 1024, working + (8 << 20))
    vmem_limit = int(min(vmem_limit, vmem_cap - (1 << 20)))   # never above physical VMEM

    kernel = functools.partial(_vicreg_kernel, batch=B, true_d=D, mxu_dtype=mxu_dtype)

    out = pl.pallas_call(
        kernel,
        out_shape=jax.ShapeDtypeStruct((4,), jnp.float32),
        grid_spec=pltpu.PrefetchScalarGridSpec(
            num_scalar_prefetch=0,
            grid=(num_tiles,),
            in_specs=[
                pl.BlockSpec((G, b_tile, Dp), lambda i: (0, i, 0)),
                pl.BlockSpec((G, b_tile, Dp), lambda i: (0, i, 0)),
            ],
            out_specs=pl.BlockSpec((4,), lambda i: (0,),
                                   memory_space=pltpu.MemorySpace.SMEM),
            scratch_shapes=[
                pltpu.VMEM((G, Dp), jnp.float32),       # sum_a
                pltpu.VMEM((G, Dp), jnp.float32),       # sum_b
                pltpu.VMEM((G, Dp), jnp.float32),       # invariance partial (per-feature)
                pltpu.VMEM((G, Dp, Dp), jnp.float32),   # gram_a
                pltpu.VMEM((G, Dp, Dp), jnp.float32),   # gram_b
            ],
        ),
        compiler_params=pltpu.CompilerParams(
            dimension_semantics=("arbitrary",),          # B is a reduction axis
            vmem_limit_bytes=vmem_limit,
        ),
    )(za, zb)

    return out[0], (out[1], out[2], out[3])


# ------------- float64 numpy reference (for correctness check) -------------
def _vicreg_ref(z_a, z_b):
    x_a = np.asarray(z_a, np.float64)
    x_b = np.asarray(z_b, np.float64)
    B = x_a.shape[0]
    D = x_a.shape[-1]

    def cov_loss(x):
        x = x - x.mean(axis=0)
        cov = np.einsum("b...c,b...d->...cd", x, x) / (B - 1)
        mask = ~np.eye(D, dtype=bool)
        loss = np.sum((cov * mask) ** 2, axis=(-2, -1)) / D
        return float(np.mean(loss))

    def var_loss(x):
        std = np.sqrt(x.var(axis=0, ddof=1) + EPS)
        return float(np.mean(np.maximum(MAX_STD - std, 0.0)))

    inv = float(np.mean((x_a - x_b) ** 2))
    var = 0.5 * (var_loss(x_a) + var_loss(x_b))
    cov = cov_loss(x_a) + cov_loss(x_b)
    total = LAMBDA_PARAM * inv + MU_PARAM * var + NU_PARAM * cov
    return total, (inv, var, cov)


def _check(z_a, z_b, **kw):
    total, (inv_l, var_l, cov_l) = vicreg_loss(z_a, z_b, **kw)
    jax.block_until_ready(total)
    rt, (ri, rv, rc) = _vicreg_ref(z_a, z_b)
    np.testing.assert_allclose(np.asarray(total), rt, rtol=1e-4, atol=1e-5)
    np.testing.assert_allclose(np.asarray(inv_l), ri, rtol=1e-4, atol=1e-5)
    np.testing.assert_allclose(np.asarray(var_l), rv, rtol=1e-4, atol=1e-5)
    np.testing.assert_allclose(np.asarray(cov_l), rc, rtol=1e-4, atol=1e-5)


if __name__ == "__main__":
    key = jax.random.PRNGKey(0)
    k1, k2, k3, k4, k5, k6 = jax.random.split(key, 6)

    # 1) plain (batch, dim) -- the common VICReg case (single tile, no B copy)
    z_a = jax.random.normal(k1, (8, 32), dtype=jnp.float32)
    z_b = z_a + 0.1 * jax.random.normal(k2, (8, 32), dtype=jnp.float32)
    _check(z_a, z_b)

    # 2) extra middle dims (batch, g, dim) -- exercises G > 1 + B/D zero padding
    y_a = jax.random.normal(k3, (6, 3, 40), dtype=jnp.float32)
    y_b = y_a + 0.1 * jax.random.normal(k4, (6, 3, 40), dtype=jnp.float32)
    _check(y_a, y_b)

    # 3) multi-tile grid over B -- exercises init/accumulate/finalize pipeline
    w_a = jax.random.normal(k5, (24, 64), dtype=jnp.float32)
    w_b = w_a + 0.1 * jax.random.normal(k6, (24, 64), dtype=jnp.float32)
    _check(w_a, w_b, b_tile=8)

    print("KERNEL_OK")
</pallas_src>

<mosaic_0001>
module attributes {stable_mosaic.version = 11 : i64} {
  func.func @_vicreg_kernel(%arg0: i32, %arg1: memref<1x8x128xf32, #tpu.memory_space<vmem>>, %arg2: memref<1x8x128xf32, #tpu.memory_space<vmem>>, %arg3: memref<4xf32, #tpu.memory_space<smem>>, %arg4: memref<1x128xf32, #tpu.memory_space<vmem>>, %arg5: memref<1x128xf32, #tpu.memory_space<vmem>>, %arg6: memref<1x128xf32, #tpu.memory_space<vmem>>, %arg7: memref<1x128x128xf32, #tpu.memory_space<vmem>>, %arg8: memref<1x128x128xf32, #tpu.memory_space<vmem>>) attributes {dimension_semantics = [#tpu.dimension_semantics<arbitrary>], iteration_bounds = array<i64: 1>, scalar_prefetch = 0 : i64, scratch_operands = 5 : i64, tpu.core_type = #tpu.core_type<tc>, window_params = [{transform_indices = @transform_0, window_bounds = array<i64: 1, 8, 128>}, {transform_indices = @transform_1, window_bounds = array<i64: 1, 8, 128>}, {transform_indices = @transform_2, window_bounds = array<i64: 4>}]} {
    %c0_i32 = arith.constant 0 : i32
    %0 = arith.cmpi eq, %arg0, %c0_i32 : i32
    %1 = arith.extui %0 : i1 to i32
    %c0_i32_0 = arith.constant 0 : i32
    %2 = arith.cmpi ne, %1, %c0_i32_0 : i32
    scf.if %2 {
      %cst_36 = arith.constant 0.000000e+00 : f32
      %30 = vector.broadcast %cst_36 : f32 to vector<1x128xf32>
      %c0_37 = arith.constant 0 : index
      %c0_38 = arith.constant 0 : index
      %31 = vector.load %arg4[%c0_37, %c0_38] : memref<1x128xf32, #tpu.memory_space<vmem>>, vector<1x128xf32>
      tpu.vector_store %arg4[%c0_37, %c0_38], %30 {strides = array<i32>} : memref<1x128xf32, #tpu.memory_space<vmem>>, vector<1x128xf32>,
      %cst_39 = arith.constant 0.000000e+00 : f32
      %32 = vector.broadcast %cst_39 : f32 to vector<1x128xf32>
      %c0_40 = arith.constant 0 : index
      %c0_41 = arith.constant 0 : index
      %33 = vector.load %arg5[%c0_40, %c0_41] : memref<1x128xf32, #tpu.memory_space<vmem>>, vector<1x128xf32>
      tpu.vector_store %arg5[%c0_40, %c0_41], %32 {strides = array<i32>} : memref<1x128xf32, #tpu.memory_space<vmem>>, vector<1x128xf32>,
      %cst_42 = arith.constant 0.000000e+00 : f32
      %34 = vector.broadcast %cst_42 : f32 to vector<1x128xf32>
      %c0_43 = arith.constant 0 : index
      %c0_44 = arith.constant 0 : index
      %35 = vector.load %arg6[%c0_43, %c0_44] : memref<1x128xf32, #tpu.memory_space<vmem>>, vector<1x128xf32>
      tpu.vector_store %arg6[%c0_43, %c0_44], %34 {strides = array<i32>} : memref<1x128xf32, #tpu.memory_space<vmem>>, vector<1x128xf32>,
      %cst_45 = arith.constant 0.000000e+00 : f32
      %36 = vector.broadcast %cst_45 : f32 to vector<1x128x128xf32>
      %c0_46 = arith.constant 0 : index
      %c0_47 = arith.constant 0 : index
      %c0_48 = arith.constant 0 : index
      %37 = vector.load %arg7[%c0_46, %c0_47, %c0_48] : memref<1x128x128xf32, #tpu.memory_space<vmem>>, vector<1x128x128xf32>
      tpu.vector_store %arg7[%c0_46, %c0_47, %c0_48], %36 {strides = array<i32>} : memref<1x128x128xf32, #tpu.memory_space<vmem>>, vector<1x128x128xf32>,
      %cst_49 = arith.constant 0.000000e+00 : f32
      %38 = vector.broadcast %cst_49 : f32 to vector<1x128x128xf32>
      %c0_50 = arith.constant 0 : index
      %c0_51 = arith.constant 0 : index
      %c0_52 = arith.constant 0 : index
      %39 = vector.load %arg8[%c0_50, %c0_51, %c0_52] : memref<1x128x128xf32, #tpu.memory_space<vmem>>, vector<1x128x128xf32>
      tpu.vector_store %arg8[%c0_50, %c0_51, %c0_52], %38 {strides = array<i32>} : memref<1x128x128xf32, #tpu.memory_space<vmem>>, vector<1x128x128xf32>,
    } else {
    }
    %c0 = arith.constant 0 : index
    %c0_1 = arith.constant 0 : index
    %c0_2 = arith.constant 0 : index
    %3 = vector.load %arg1[%c0, %c0_1, %c0_2] : memref<1x8x128xf32, #tpu.memory_space<vmem>>, vector<1x8x128xf32>
    %c0_3 = arith.constant 0 : index
    %c0_4 = arith.constant 0 : index
    %c0_5 = arith.constant 0 : index
    %4 = vector.load %arg2[%c0_3, %c0_4, %c0_5] : memref<1x8x128xf32, #tpu.memory_space<vmem>>, vector<1x8x128xf32>
    %5 = arith.subf %3, %4 : vector<1x8x128xf32>
    %c0_6 = arith.constant 0 : index
    %c0_7 = arith.constant 0 : index
    %6 = vector.load %arg6[%c0_6, %c0_7] : memref<1x128xf32, #tpu.memory_space<vmem>>, vector<1x128xf32>
    %7 = arith.mulf %5, %5 : vector<1x8x128xf32>
    %cst = arith.constant dense<0.000000e+00> : vector<1x128xf32>
    %8 = vector.multi_reduction <add>, %7, %cst [1] : vector<1x8x128xf32> to vector<1x128xf32>
    %9 = arith.addf %6, %8 : vector<1x128xf32>
    %c0_8 = arith.constant 0 : index
    %c0_9 = arith.constant 0 : index
    %10 = vector.load %arg6[%c0_8, %c0_9] : memref<1x128xf32, #tpu.memory_space<vmem>>, vector<1x128xf32>
    tpu.vector_store %arg6[%c0_8, %c0_9], %9 {strides = array<i32>} : memref<1x128xf32, #tpu.memory_space<vmem>>, vector<1x128xf32>,
    %c0_10 = arith.constant 0 : index
    %c0_11 = arith.constant 0 : index
    %11 = vector.load %arg4[%c0_10, %c0_11] : memref<1x128xf32, #tpu.memory_space<vmem>>, vector<1x128xf32>
    %cst_12 = arith.constant dense<0.000000e+00> : vector<1x128xf32>
    %12 = vector.multi_reduction <add>, %3, %cst_12 [1] : vector<1x8x128xf32> to vector<1x128xf32>
    %13 = arith.addf %11, %12 : vector<1x128xf32>
    %c0_13 = arith.constant 0 : index
    %c0_14 = arith.constant 0 : index
    %14 = vector.load %arg4[%c0_13, %c0_14] : memref<1x128xf32, #tpu.memory_space<vmem>>, vector<1x128xf32>
    tpu.vector_store %arg4[%c0_13, %c0_14], %13 {strides = array<i32>} : memref<1x128xf32, #tpu.memory_space<vmem>>, vector<1x128xf32>,
    %c0_15 = arith.constant 0 : index
    %c0_16 = arith.constant 0 : index
    %15 = vector.load %arg5[%c0_15, %c0_16] : memref<1x128xf32, #tpu.memory_space<vmem>>, vector<1x128xf32>
    %cst_17 = arith.constant dense<0.000000e+00> : vector<1x128xf32>
    %16 = vector.multi_reduction <add>, %4, %cst_17 [1] : vector<1x8x128xf32> to vector<1x128xf32>
    %17 = arith.addf %15, %16 : vector<1x128xf32>
    %c0_18 = arith.constant 0 : index
    %c0_19 = arith.constant 0 : index
    %18 = vector.load %arg5[%c0_18, %c0_19] : memref<1x128xf32, #tpu.memory_space<vmem>>, vector<1x128xf32>
    tpu.vector_store %arg5[%c0_18, %c0_19], %17 {strides = array<i32>} : memref<1x128xf32, #tpu.memory_space<vmem>>, vector<1x128xf32>,
    %c0_20 = arith.constant 0 : index
    %c0_21 = arith.constant 0 : index
    %c0_22 = arith.constant 0 : index
    %19 = vector.load %arg7[%c0_20, %c0_21, %c0_22] : memref<1x128x128xf32, #tpu.memory_space<vmem>>, vector<1x128x128xf32>
    %cst_23 = arith.constant dense<0.000000e+00> : vector<1x128x128xf32>
    %20 = tpu.matmul %3, %3, %cst_23 {dimension_numbers = #tpu.dot_dimension_numbers<[1], [1], [2], [2], [0, 0, 0, 2, 1, 2], [0], [0]>} : vector<1x8x128xf32>, vector<1x8x128xf32>, vector<1x128x128xf32> -> vector<1x128x128xf32>
    %21 = arith.addf %19, %20 : vector<1x128x128xf32>
    %c0_24 = arith.constant 0 : index
    %c0_25 = arith.constant 0 : index
    %c0_26 = arith.constant 0 : index
    %22 = vector.load %arg7[%c0_24, %c0_25, %c0_26] : memref<1x128x128xf32, #tpu.memory_space<vmem>>, vector<1x128x128xf32>
    tpu.vector_store %arg7[%c0_24, %c0_25, %c0_26], %21 {strides = array<i32>} : memref<1x128x128xf32, #tpu.memory_space<vmem>>, vector<1x128x128xf32>,
    %c0_27 = arith.constant 0 : index
    %c0_28 = arith.constant 0 : index
    %c0_29 = arith.constant 0 : index
    %23 = vector.load %arg8[%c0_27, %c0_28, %c0_29] : memref<1x128x128xf32, #tpu.memory_space<vmem>>, vector<1x128x128xf32>
    %cst_30 = arith.constant dense<0.000000e+00> : vector<1x128x128xf32>
    %24 = tpu.matmul %4, %4, %cst_30 {dimension_numbers = #tpu.dot_dimension_numbers<[1], [1], [2], [2], [0, 0, 0, 2, 1, 2], [0], [0]>} : vector<1x8x128xf32>, vector<1x8x128xf32>, vector<1x128x128xf32> -> vector<1x128x128xf32>
    %25 = arith.addf %23, %24 : vector<1x128x128xf32>
    %c0_31 = arith.constant 0 : index
    %c0_32 = arith.constant 0 : index
    %c0_33 = arith.constant 0 : index
    %26 = vector.load %arg8[%c0_31, %c0_32, %c0_33] : memref<1x128x128xf32, #tpu.memory_space<vmem>>, vector<1x128x128xf32>
    tpu.vector_store %arg8[%c0_31, %c0_32, %c0_33], %25 {strides = array<i32>} : memref<1x128x128xf32, #tpu.memory_space<vmem>>, vector<1x128x128xf32>,
    %c0_i32_34 = arith.constant 0 : i32
    %27 = arith.cmpi eq, %arg0, %c0_i32_34 : i32
    %28 = arith.extui %27 : i1 to i32
    %c0_i32_35 = arith.constant 0 : i32
    %29 = arith.cmpi ne, %28, %c0_i32_35 : i32
    scf.if %29 {
      %30 = tpu.iota {dimensions = array<i32: 1>} : vector<1x128xi32>
      %c32_i32 = arith.constant 32 : i32
      %31 = vector.broadcast %c32_i32 : i32 to vector<1x128xi32>
      %32 = arith.cmpi slt, %30, %31 : vector<1x128xi32>
      %33 = tpu.iota {dimensions = array<i32: 0>} : vector<128x128xi32>
      %34 = tpu.iota {dimensions = array<i32: 1>} : vector<128x128xi32>
      %35 = arith.cmpi eq, %33, %34 : vector<128x128xi32>
      %36 = arith.extui %35 : vector<128x128xi1> to vector<128x128xi32>
      %37 = arith.sitofp %36 : vector<128x128xi32> to vector<128x128xf32>
      %c0_36 = arith.constant 0 : index
      %c0_37 = arith.constant 0 : index
      %38 = vector.load %arg4[%c0_36, %c0_37] : memref<1x128xf32, #tpu.memory_space<vmem>>, vector<1x128xf32>
      %c0_38 = arith.constant 0 : index
      %c0_39 = arith.constant 0 : index
      %c0_40 = arith.constant 0 : index
      %39 = vector.load %arg7[%c0_38, %c0_39, %c0_40] : memref<1x128x128xf32, #tpu.memory_space<vmem>>, vector<1x128x128xf32>
      %40 = vector.shape_cast %37 : vector<128x128xf32> to vector<1x128x128xf32>
      %41 = arith.mulf %39, %40 : vector<1x128x128xf32>
      %cst_41 = arith.constant dense<0.000000e+00> : vector<1x128xf32>
      %42 = vector.multi_reduction <add>, %41, %cst_41 [2] : vector<1x128x128xf32> to vector<1x128xf32>
      %43 = arith.mulf %38, %38 : vector<1x128xf32>
      %cst_42 = arith.constant 8.000000e+00 : f32
      %44 = vector.broadcast %cst_42 : f32 to vector<1x128xf32>
      %45 = arith.divf %43, %44 : vector<1x128xf32>
      %46 = arith.subf %42, %45 : vector<1x128xf32>
      %cst_43 = arith.constant 7.000000e+00 : f32
      %47 = vector.broadcast %cst_43 : f32 to vector<1x128xf32>
      %48 = arith.divf %46, %47 : vector<1x128xf32>
      %cst_44 = arith.constant 0.000000e+00 : f32
      %49 = vector.broadcast %cst_44 : f32 to vector<1x128xf32>
      %50 = arith.maximumf %48, %49 : vector<1x128xf32>
      %cst_45 = arith.constant 9.99999974E-5 : f32
      %51 = vector.broadcast %cst_45 : f32 to vector<1x128xf32>
      %52 = arith.addf %50, %51 : vector<1x128xf32>
      %53 = math.sqrt %52 : vector<1x128xf32>
      %cst_46 = arith.constant 1.000000e+00 : f32
      %54 = vector.broadcast %cst_46 : f32 to vector<1x128xf32>
      %55 = arith.subf %54, %53 : vector<1x128xf32>
      %cst_47 = arith.constant 0.000000e+00 : f32
      %56 = vector.broadcast %cst_47 : f32 to vector<1x128xf32>
      %57 = arith.maximumf %55, %56 : vector<1x128xf32>
      %cst_48 = arith.constant 0.000000e+00 : f32
      %58 = vector.broadcast %cst_48 : f32 to vector<1x128xf32>
      %59 = arith.select %32, %57, %58 : vector<1x128xi1>, vector<1x128xf32>
      %60 = vector.shape_cast %59 : vector<1x128xf32> to vector<1x1x128xf32>
      %cst_49 = arith.constant dense<0.000000e+00> : vector<1xf32>
      %61 = vector.multi_reduction <add>, %60, %cst_49 [1, 2] : vector<1x1x128xf32> to vector<1xf32>
      %62 = vector.shape_cast %61 : vector<1xf32> to vector<1x1x1xf32>
      %63 = vector.extract %62[0, 0, 0] : f32 from vector<1x1x1xf32>
      %cst_50 = arith.constant 3.200000e+01 : f32
      %64 = arith.divf %63, %cst_50 : f32
      %65 = arith.mulf %39, %39 : vector<1x128x128xf32>
      %66 = vector.shape_cast %65 : vector<1x128x128xf32> to vector<1x1x128x128xf32>
      %cst_51 = arith.constant dense<0.000000e+00> : vector<1xf32>
      %67 = vector.multi_reduction <add>, %66, %cst_51 [1, 2, 3] : vector<1x1x128x128xf32> to vector<1xf32>
      %68 = vector.shape_cast %67 : vector<1xf32> to vector<1x1x1x1xf32>
      %69 = vector.extract %68[0, 0, 0, 0] : f32 from vector<1x1x1x1xf32>
      %70 = vector.shape_cast %38 : vector<1x128xf32> to vector<1x1x128xf32>
      %71 = vector.broadcast %70 : vector<1x1x128xf32> to vector<1x128x128xf32>
      %72 = arith.mulf %39, %71 : vector<1x128x128xf32>
      %cst_52 = arith.constant dense<0.000000e+00> : vector<1x128xf32>
      %73 = vector.multi_reduction <add>, %72, %cst_52 [2] : vector<1x128x128xf32> to vector<1x128xf32>
      %74 = arith.mulf %73, %38 : vector<1x128xf32>
      %75 = vector.shape_cast %74 : vector<1x128xf32> to vector<1x1x128xf32>
      %cst_53 = arith.constant dense<0.000000e+00> : vector<1xf32>
      %76 = vector.multi_reduction <add>, %75, %cst_53 [1, 2] : vector<1x1x128xf32> to vector<1xf32>
      %77 = vector.shape_cast %76 : vector<1xf32> to vector<1x1x1xf32>
      %78 = vector.extract %77[0, 0, 0] : f32 from vector<1x1x1xf32>
      %79 = arith.mulf %38, %38 : vector<1x128xf32>
      %cst_54 = arith.constant dense<0.000000e+00> : vector<1xf32>
      %80 = vector.multi_reduction <add>, %79, %cst_54 [1] : vector<1x128xf32> to vector<1xf32>
      %81 = vector.shape_cast %80 : vector<1xf32> to vector<1x1xf32>
      %cst_55 = arith.constant 2.000000e+00 : f32
      %cst_56 = arith.constant 8.000000e+00 : f32
      %82 = arith.divf %cst_55, %cst_56 : f32
      %83 = arith.mulf %82, %78 : f32
      %84 = arith.subf %69, %83 : f32
      %85 = arith.mulf %81, %81 : vector<1x1xf32>
      %86 = vector.shape_cast %85 : vector<1x1xf32> to vector<1x1x1xf32>
      %cst_57 = arith.constant dense<0.000000e+00> : vector<1xf32>
      %87 = vector.multi_reduction <add>, %86, %cst_57 [1, 2] : vector<1x1x1xf32> to vector<1xf32>
      %88 = vector.shape_cast %87 : vector<1xf32> to vector<1x1x1xf32>
      %89 = vector.extract %88[0, 0, 0] : f32 from vector<1x1x1xf32>
      %cst_58 = arith.constant 8.000000e+00 : f32
      %cst_59 = arith.constant 8.000000e+00 : f32
      %90 = arith.mulf %cst_58, %cst_59 : f32
      %91 = arith.divf %89, %90 : f32
      %92 = arith.addf %84, %91 : f32
      %cst_60 = arith.constant 7.000000e+00 : f32
      %cst_61 = arith.constant 7.000000e+00 : f32
      %93 = arith.mulf %cst_60, %cst_61 : f32
      %94 = arith.divf %92, %93 : f32
      %95 = arith.mulf %48, %48 : vector<1x128xf32>
      %96 = vector.shape_cast %95 : vector<1x128xf32> to vector<1x1x128xf32>
      %cst_62 = arith.constant dense<0.000000e+00> : vector<1xf32>
      %97 = vector.multi_reduction <add>, %96, %cst_62 [1, 2] : vector<1x1x128xf32> to vector<1xf32>
      %98 = vector.shape_cast %97 : vector<1xf32> to vector<1x1x1xf32>
      %99 = vector.extract %98[0, 0, 0] : f32 from vector<1x1x1xf32>
      %100 = arith.subf %94, %99 : f32
      %cst_63 = arith.constant 3.200000e+01 : f32
      %101 = arith.divf %100, %cst_63 : f32
      %c0_64 = arith.constant 0 : index
      %c0_65 = arith.constant 0 : index
      %102 = vector.load %arg5[%c0_64, %c0_65] : memref<1x128xf32, #tpu.memory_space<vmem>>, vector<1x128xf32>
      %c0_66 = arith.constant 0 : index
      %c0_67 = arith.constant 0 : index
      %c0_68 = arith.constant 0 : index
      %103 = vector.load %arg8[%c0_66, %c0_67, %c0_68] : memref<1x128x128xf32, #tpu.memory_space<vmem>>, vector<1x128x128xf32>
      %104 = vector.shape_cast %37 : vector<128x128xf32> to vector<1x128x128xf32>
      %105 = arith.mulf %103, %104 : vector<1x128x128xf32>
      %cst_69 = arith.constant dense<0.000000e+00> : vector<1x128xf32>
      %106 = vector.multi_reduction <add>, %105, %cst_69 [2] : vector<1x128x128xf32> to vector<1x128xf32>
      %107 = arith.mulf %102, %102 : vector<1x128xf32>
      %cst_70 = arith.constant 8.000000e+00 : f32
      %108 = vector.broadcast %cst_70 : f32 to vector<1x128xf32>
      %109 = arith.divf %107, %108 : vector<1x128xf32>
      %110 = arith.subf %106, %109 : vector<1x128xf32>
      %cst_71 = arith.constant 7.000000e+00 : f32
      %111 = vector.broadcast %cst_71 : f32 to vector<1x128xf32>
      %112 = arith.divf %110, %111 : vector<1x128xf32>
      %cst_72 = arith.constant 0.000000e+00 : f32
      %113 = vector.broadcast %cst_72 : f32 to vector<1x128xf32>
      %114 = arith.maximumf %112, %113 : vector<1x128xf32>
      %cst_73 = arith.constant 9.99999974E-5 : f32
      %115 = vector.broadcast %cst_73 : f32 to vector<1x128xf32>
      %116 = arith.addf %114, %115 : vector<1x128xf32>
      %117 = math.sqrt %116 : vector<1x128xf32>
      %cst_74 = arith.constant 1.000000e+00 : f32
      %118 = vector.broadcast %cst_74 : f32 to vector<1x128xf32>
      %119 = arith.subf %118, %117 : vector<1x128xf32>
      %cst_75 = arith.constant 0.000000e+00 : f32
      %120 = vector.broadcast %cst_75 : f32 to vector<1x128xf32>
      %121 = arith.maximumf %119, %120 : vector<1x128xf32>
      %cst_76 = arith.constant 0.000000e+00 : f32
      %122 = vector.broadcast %cst_76 : f32 to vector<1x128xf32>
      %123 = arith.select %32, %121, %122 : vector<1x128xi1>, vector<1x128xf32>
      %124 = vector.shape_cast %123 : vector<1x128xf32> to vector<1x1x128xf32>
      %cst_77 = arith.constant dense<0.000000e+00> : vector<1xf32>
      %125 = vector.multi_reduction <add>, %124, %cst_77 [1, 2] : vector<1x1x128xf32> to vector<1xf32>
      %126 = vector.shape_cast %125 : vector<1xf32> to vector<1x1x1xf32>
      %127 = vector.extract %126[0, 0, 0] : f32 from vector<1x1x1xf32>
      %cst_78 = arith.constant 3.200000e+01 : f32
      %128 = arith.divf %127, %cst_78 : f32
      %129 = arith.mulf %103, %103 : vector<1x128x128xf32>
      %130 = vector.shape_cast %129 : vector<1x128x128xf32> to vector<1x1x128x128xf32>
      %cst_79 = arith.constant dense<0.000000e+00> : vector<1xf32>
      %131 = vector.multi_reduction <add>, %130, %cst_79 [1, 2, 3] : vector<1x1x128x128xf32> to vector<1xf32>
      %132 = vector.shape_cast %131 : vector<1xf32> to vector<1x1x1x1xf32>
      %133 = vector.extract %132[0, 0, 0, 0] : f32 from vector<1x1x1x1xf32>
      %134 = vector.shape_cast %102 : vector<1x128xf32> to vector<1x1x128xf32>
      %135 = vector.broadcast %134 : vector<1x1x128xf32> to vector<1x128x128xf32>
      %136 = arith.mulf %103, %135 : vector<1x128x128xf32>
      %cst_80 = arith.constant dense<0.000000e+00> : vector<1x128xf32>
      %137 = vector.multi_reduction <add>, %136, %cst_80 [2] : vector<1x128x128xf32> to vector<1x128xf32>
      %138 = arith.mulf %137, %102 : vector<1x128xf32>
      %139 = vector.shape_cast %138 : vector<1x128xf32> to vector<1x1x128xf32>
      %cst_81 = arith.constant dense<0.000000e+00> : vector<1xf32>
      %140 = vector.multi_reduction <add>, %139, %cst_81 [1, 2] : vector<1x1x128xf32> to vector<1xf32>
      %141 = vector.shape_cast %140 : vector<1xf32> to vector<1x1x1xf32>
      %142 = vector.extract %141[0, 0, 0] : f32 from vector<1x1x1xf32>
      %143 = arith.mulf %102, %102 : vector<1x128xf32>
      %cst_82 = arith.constant dense<0.000000e+00> : vector<1xf32>
      %144 = vector.multi_reduction <add>, %143, %cst_82 [1] : vector<1x128xf32> to vector<1xf32>
      %145 = vector.shape_cast %144 : vector<1xf32> to vector<1x1xf32>
      %cst_83 = arith.constant 2.000000e+00 : f32
      %cst_84 = arith.constant 8.000000e+00 : f32
      %146 = arith.divf %cst_83, %cst_84 : f32
      %147 = arith.mulf %146, %142 : f32
      %148 = arith.subf %133, %147 : f32
      %149 = arith.mulf %145, %145 : vector<1x1xf32>
      %150 = vector.shape_cast %149 : vector<1x1xf32> to vector<1x1x1xf32>
      %cst_85 = arith.constant dense<0.000000e+00> : vector<1xf32>
      %151 = vector.multi_reduction <add>, %150, %cst_85 [1, 2] : vector<1x1x1xf32> to vector<1xf32>
      %152 = vector.shape_cast %151 : vector<1xf32> to vector<1x1x1xf32>
      %153 = vector.extract %152[0, 0, 0] : f32 from vector<1x1x1xf32>
      %cst_86 = arith.constant 8.000000e+00 : f32
      %cst_87 = arith.constant 8.000000e+00 : f32
      %154 = arith.mulf %cst_86, %cst_87 : f32
      %155 = arith.divf %153, %154 : f32
      %156 = arith.addf %148, %155 : f32
      %cst_88 = arith.constant 7.000000e+00 : f32
      %cst_89 = arith.constant 7.000000e+00 : f32
      %157 = arith.mulf %cst_88, %cst_89 : f32
      %158 = arith.divf %156, %157 : f32
      %159 = arith.mulf %112, %112 : vector<1x128xf32>
      %160 = vector.shape_cast %159 : vector<1x128xf32> to vector<1x1x128xf32>
      %cst_90 = arith.constant dense<0.000000e+00> : vector<1xf32>
      %161 = vector.multi_reduction <add>, %160, %cst_90 [1, 2] : vector<1x1x128xf32> to vector<1xf32>
      %162 = vector.shape_cast %161 : vector<1xf32> to vector<1x1x1xf32>
      %163 = vector.extract %162[0, 0, 0] : f32 from vector<1x1x1xf32>
      %164 = arith.subf %158, %163 : f32
      %cst_91 = arith.constant 3.200000e+01 : f32
      %165 = arith.divf %164, %cst_91 : f32
      %c0_92 = arith.constant 0 : index
      %c0_93 = arith.constant 0 : index
      %166 = vector.load %arg6[%c0_92, %c0_93] : memref<1x128xf32, #tpu.memory_space<vmem>>, vector<1x128xf32>
      %167 = vector.shape_cast %166 : vector<1x128xf32> to vector<1x1x128xf32>
      %cst_94 = arith.constant dense<0.000000e+00> : vector<1xf32>
      %168 = vector.multi_reduction <add>, %167, %cst_94 [1, 2] : vector<1x1x128xf32> to vector<1xf32>
      %169 = vector.shape_cast %168 : vector<1xf32> to vector<1x1x1xf32>
      %170 = vector.extract %169[0, 0, 0] : f32 from vector<1x1x1xf32>
      %cst_95 = arith.constant 2.560000e+02 : f32
      %171 = arith.divf %170, %cst_95 : f32
      %172 = arith.addf %64, %128 : f32
      %cst_96 = arith.constant 5.000000e-01 : f32
      %173 = arith.mulf %cst_96, %172 : f32
      %174 = arith.addf %101, %165 : f32
      %cst_97 = arith.constant 2.500000e+01 : f32
      %175 = arith.mulf %cst_97, %171 : f32
      %cst_98 = arith.constant 2.500000e+01 : f32
      %176 = arith.mulf %cst_98, %173 : f32
      %177 = arith.addf %175, %176 : f32
      %cst_99 = arith.constant 1.000000e+00 : f32
      %178 = arith.mulf %cst_99, %174 : f32
      %179 = arith.addf %177, %178 : f32
      %c0_100 = arith.constant 0 : index
      %180 = memref.load %arg3[%c0_100] : memref<4xf32, #tpu.memory_space<smem>>
      memref.store %179, %arg3[%c0_100] : memref<4xf32, #tpu.memory_space<smem>>
      %c1 = arith.constant 1 : index
      %181 = memref.load %arg3[%c1] : memref<4xf32, #tpu.memory_space<smem>>
      memref.store %171, %arg3[%c1] : memref<4xf32, #tpu.memory_space<smem>>
      %c2 = arith.constant 2 : index
      %182 = memref.load %arg3[%c2] : memref<4xf32, #tpu.memory_space<smem>>
      memref.store %173, %arg3[%c2] : memref<4xf32, #tpu.memory_space<smem>>
      %c3 = arith.constant 3 : index
      %183 = memref.load %arg3[%c3] : memref<4xf32, #tpu.memory_space<smem>>
      memref.store %174, %arg3[%c3] : memref<4xf32, #tpu.memory_space<smem>>
    } else {
    }
    return
  }
  func.func @transform_0(%arg0: i32) -> (i32, i32, i32) {
    %c0_i32 = arith.constant 0 : i32
    %c0_i32_0 = arith.constant 0 : i32
    %c0_i32_1 = arith.constant 0 : i32
    return %c0_i32, %arg0, %c0_i32_0 : i32, i32, i32
  }
  func.func @transform_1(%arg0: i32) -> (i32, i32, i32) {
    %c0_i32 = arith.constant 0 : i32
    %c0_i32_0 = arith.constant 0 : i32
    %c0_i32_1 = arith.constant 0 : i32
    return %c0_i32, %arg0, %c0_i32_0 : i32, i32, i32
  }
  func.func @transform_2(%arg0: i32) -> i32 {
    %c0_i32 = arith.constant 0 : i32
    %c0_i32_0 = arith.constant 0 : i32
    return %c0_i32 : i32
  }
}

</mosaic_0001>

<bundles_post_ra>
// kernel: tpu_custom_call.1
= control target key start
LH: loop header
LB: loop body
LE: loop exit
PB: predicated region body
PF: predicated region fallthrough
CT: control target
= control target key end

     0   :  { %7 = vsyncpa [#allocation8], 0  ;;  %s4615_s0 = inlined_call_operand.hbm [shape: f32[1,8,128], index: 0, kind: input, shape index: {}]   ;;  %s4616_s1 = inlined_call_operand.hbm [shape: f32[1,8,128], index: 1, kind: input, shape index: {}]   ;;  %s4617_s2 = inlined_call_operand.hbm [shape: f32[4], index: 2, kind: output, shape index: {}]  }
   0x1   :  { %8 = vsyncpa [#allocation11], 0 }
   0x2   :  { %9 = vsyncpa [#allocation9], 0  ;;  %s3186_s9 = smov [#allocation7]   ;;  %s3187_s11 = smov [#allocation10]  }
   0x3   :  { %s16_s10 = sshll.u32 %s3186_s9, 4  ;;  %s26_s12 = sshll.u32 %s3187_s11, 4  ;;  %s17_s10 = int_to_ptr.vmem [resolvable:$true] %s16_s10  ;;  %s27_s12 = int_to_ptr.vmem [resolvable:$true] %s26_s12 }
   0x4   :  { %s3126_s15 = scalar_lea.hbm %s4615_s0, 128 }
   0x5   :  { %p3127_p0 = scmp.ne.s32.totalorder %s4615_s0, %s3126_s15  ;;  %p3130_p1 = scmp.lt.u32.totalorder %s3126_s15, %s4615_s0 }
   0x7   :  { %p3132_p2 = pnand %p3130_p1, %p3127_p0 }
   0x9   :  { %3135 = shalt.err (!%p3132_p2)
}
   0xa   :  { %s3136_s20 = scalar_lea.vmem %s17_s10, 128  ;;  %p3141_p4 = scmp.lt.s32.totalorder %s17_s10, %s17_s10 }
   0xb   :  { %p3137_p3 = scmp.ne.s32.totalorder %s17_s10, %s3136_s20  ;;  %p3142_p5 = scmp.lt.s32.totalorder %s3136_s20, %s3136_s20 }
   0xd   :  { %p3143_p6 = por %p3142_p5, %p3141_p4 }
   0xf   :  { %p3144_p7 = pnand %p3143_p6, %p3137_p3 }
  0x11   :  { %3147 = shalt.err (!%p3144_p7)
}
  0x12   :  { %19 = dma.hbm_to_vmem [thread:$0]  %s4615_s0, 128, %s17_s10, [#allocation8]  }
  0x13   :  { %s3148_s25 = scalar_lea.hbm %s4616_s1, 128 }
  0x14   :  { %p3149_p8 = scmp.ne.s32.totalorder %s4616_s1, %s3148_s25  ;;  %p3152_p9 = scmp.lt.u32.totalorder %s3148_s25, %s4616_s1 }
  0x16   :  { %p3154_p10 = pnand %p3152_p9, %p3149_p8 }
  0x18   :  { %3157 = shalt.err (!%p3154_p10)
}
  0x19   :  { %s3158_s30 = scalar_lea.vmem %s27_s12, 128  ;;  %p3163_p12 = scmp.lt.s32.totalorder %s27_s12, %s27_s12 }
  0x1a   :  { %p3159_p11 = scmp.ne.s32.totalorder %s27_s12, %s3158_s30  ;;  %p3164_p13 = scmp.lt.s32.totalorder %s3158_s30, %s3158_s30 }
  0x1c   :  { %p3165_p0 = por %p3164_p13, %p3163_p12 }
  0x1e   :  { %p3166_p1 = pnand %p3165_p0, %p3159_p11 }
  0x20   :  { %3169 = shalt.err (!%p3166_p1)
}
  0x21   :  { %29 = dma.hbm_to_vmem [thread:$0]  %s4616_s1, 128, %s27_s12, [#allocation11]  }
  0x22   :  { %3180 = dma.done.wait [#allocation8], 128  }
  0x23   :  { %3181 = vsyncadd [#allocation8], 4294967168 }
  0x24   :  { %3182 = dma.done.wait [#allocation11], 128  }
  0x25   :  { %3183 = vsyncadd [#allocation11], 4294967168  ;;  %v3188_v0 = vmov 0.0   ;;  %v75_v1 = vld [vmem:[#allocation7] sm:$0xff]  ;;  %v76_v2 = vld [vmem:[#allocation10] sm:$0xff]  ;;  %v656_v27 = vlaneseq  ;;  %vm154_vm0 = vcmask 64512  }
  0x26   :  { %40 = vst [vmem:[#allocation2] sm:$0x1] %v3188_v0  ;;  %41 = vst [vmem:[#allocation3] sm:$0x1] %v3188_v0  ;;  %122 = vxpose.xlu0.b32.start.end [1/1] (short) %v75_v1, 128  ;;  %v89_v3 = vrot.slane %v75_v1, 4  ;;  %v98_v4 = vrot.slane %v76_v2, 4  ;;  %v77_v5 = vsub.f32 %v75_v1, %v76_v2  ;;  %2981 = vmatprep.subr.mxu0 %v75_v1 }
  0x27   :  { %42 = vst [vmem:[#allocation4] sm:$0x1] %v3188_v0  ;;  %2982 = vmatpush3.msra.mxu0 %v75_v1  ;;  %3007 = vmatprep.subr.mxu1 %v76_v2  ;;  %v3234_v30 = vshrl.u32 %v656_v27, 7  ;;  %vm1260_vm1 = vcmask 1040384  }
  0x28   :  { %v90_v6 = vadd.f32 %v89_v3, %v75_v1  ;;  %v99_v7 = vadd.f32 %v98_v4, %v76_v2  ;;  %v79_v8 = vmul.f32 %v77_v5, %v77_v5  ;;  %3008 = vmatpush3.msra.mxu1 %v76_v2 }
  0x29   :  { %4644 = vst [vmem:[#allocation16_spill] sm:$0xff] %v3234_v30  ;;  %v3237_v32 = vsub.s32 0, %v3234_v30 }
  0x2a   :  { %v91_v9 = vrot.slane %v90_v6, 2  ;;  %v100_v10 = vrot.slane %v99_v7, 2  ;;  %v80_v11 = vrot.slane %v79_v8, 4 }
  0x2c   :  { %v92_v12 = vadd.f32 %v91_v9, %v90_v6  ;;  %v101_v13 = vadd.f32 %v100_v10, %v99_v7  ;;  %v81_v14 = vadd.f32 %v80_v11, %v79_v8  ;;  %v3297_v7 = vand.u32 127, %v656_v27 }
  0x2d   :  { %v88_v18 = vld [vmem:[#allocation2] sm:$0x1]  ;;  %v97_v19 = vld [vmem:[#allocation3] sm:$0x1]  ;;  %v661_v8 = vadd.s32 8, %v3234_v30  ;;  %v663_v10 = vadd.s32 24, %v3234_v30 }
  0x2e   :  { %v93_v15 = vrot.slane %v92_v12, 1  ;;  %v102_v16 = vrot.slane %v101_v13, 1  ;;  %v82_v17 = vrot.slane %v81_v14, 2  ;;  %v78_v26 = vld [vmem:[#allocation4] sm:$0x1]  ;;  %4645 = vst [vmem:[#allocation17_spill] sm:$0xff] %v3297_v7  ;;  %vm676_vm3 = vcmp.eq.s32.totalorder %v3234_v30, %v3297_v7 }
  0x2f   :  { %vm677_vm2 = vcmp.eq.s32.totalorder %v661_v8, %v3297_v7  ;;  %vm679_vm4 = vcmp.eq.s32.totalorder %v663_v10, %v3297_v7 }
  0x30   :  { %v94_v20 = vadd.f32 %v93_v15, %v92_v12  ;;  %v103_v21 = vadd.f32 %v102_v16, %v101_v13  ;;  %v83_v22 = vadd.f32 %v82_v17, %v81_v14  ;;  %v3302_v9 = vsel %vm677_vm2, 1.0, %v3188_v0 }
  0x31   :  { %v2931_v17 = vsel %vm676_vm3, 1.0, %v3188_v0 }
  0x32   :  { %v95_v23 = vadd.f32 %v94_v20, %v88_v18  ;;  %v84_v24 = vrot.slane %v83_v22, 1  ;;  %v104_v25 = vadd.f32 %v103_v21, %v97_v19  ;;  %v3317_v20 = vsel %vm679_vm4, 1.0, %v3188_v0 }
  0x34   :  { %96 = vst [vmem:[#allocation2] sm:$0x1] %v95_v23  ;;  %v85_v28 = vadd.f32 %v84_v24, %v83_v22  ;;  %105 = vst [vmem:[#allocation3] sm:$0x1] %v104_v25 }
  0x36   :  { %v86_v29 = vadd.f32 %v85_v28, %v78_v26 }
  0x38   :  { %87 = vst [vmem:[#allocation4] sm:$0x1] %v86_v29 }
  0x3b   :  { %v724_v31 = vld [vmem:[#allocation2] sm:$0x1] }
  0x3c   :  { %v3239_v33 = vmul.f32 %v724_v31, %v724_v31  ;;  %v3244_v36 = vrot.slane %v724_v31, %v3237_v32 }
  0x3e   :  { %v791_v34 = vmul.f32 0.125, %v3239_v33  ;;  %v1617_v60 = vsel %vm1260_vm1, %v3239_v33, 0.0 }
  0x40   :  { %v796_v35 = vrot.slane %v791_v34, %v3237_v32 }
  0x42   :  { %798 = vbcast.lane.b32.xlu1 %v796_v35, 256 }
  0x46   :  { %806 = vbcast.lane.b32.xlu1 %v796_v35, 272 }
  0x4a   :  { %810 = vbcast.lane.b32.xlu1 %v796_v35, 280 }
  0x4e   :  { %814 = vbcast.lane.b32.xlu1 %v796_v35, 288 }
  0x52   :  { %818 = vbcast.lane.b32.xlu1 %v796_v35, 296 }
  0x56   :  { %822 = vbcast.lane.b32.xlu1 %v796_v35, 304 }
  0x5a   :  { %826 = vbcast.lane.b32.xlu1 %v796_v35, 312 }
  0x5e   :  { %830 = vbcast.lane.b32.xlu1 %v796_v35, 320 }
  0x62   :  { %834 = vbcast.lane.b32.xlu1 %v796_v35, 328 }
  0x63   :  { %396 = vxpose.xlu0.b32.start.end [1/1] (short) %v76_v2, 128 }
  0x66   :  { %838 = vbcast.lane.b32.xlu1 %v796_v35, 336 }
  0x6a   :  { %842 = vbcast.lane.b32.xlu1 %v796_v35, 344 }
  0x6e   :  { %846 = vbcast.lane.b32.xlu1 %v796_v35, 352 }
  0x72   :  { %850 = vbcast.lane.b32.xlu1 %v796_v35, 360 }
  0x76   :  { %854 = vbcast.lane.b32.xlu1 %v796_v35, 368 }
  0x7a   :  { %858 = vbcast.lane.b32.xlu1 %v796_v35, 376 }
  0x7e   :  { %1369 = vbcast.lane.b32.xlu1 %v3244_v36, 256 }
  0x82   :  { %1377 = vbcast.lane.b32.xlu1 %v3244_v36, 272 }
  0x86   :  { %1381 = vbcast.lane.b32.xlu1 %v3244_v36, 280 }
  0x8a   :  { %1385 = vbcast.lane.b32.xlu1 %v3244_v36, 288 }
  0x8e   :  { %1393 = vbcast.lane.b32.xlu1 %v3244_v36, 304 }
  0x92   :  { %1401 = vbcast.lane.b32.xlu1 %v3244_v36, 320 }
  0x96   :  { %1409 = vbcast.lane.b32.xlu1 %v3244_v36, 336 }
  0x9a   :  { %1417 = vbcast.lane.b32.xlu1 %v3244_v36, 352 }
  0x9e   :  { %1425 = vbcast.lane.b32.xlu1 %v3244_v36, 368 }
  0xa6   :  { %v138_v37 = vpop.trf.xlu0 }
  0xa7   :  { %2983 = vmatprep.mubr.msk.f32.mxu0 %vm154_vm0, %v138_v37 }
  0xaa   :  { %v139_v38 = vpop.trf.xlu0 }
  0xab   :  { %2984 = vmatmul.mubr.msk.f32.vlgmr.msra.gmra.mrb[0].mxu0 %vm154_vm0, %v139_v38 }
  0xae   :  { %v140_v39 = vpop.trf.xlu0 }
  0xaf   :  { %2986 = vmatprep.mubr.msk.f32.mxu0 %vm154_vm0, %v140_v39 }
  0xb2   :  { %v141_v40 = vpop.trf.xlu0 }
  0xb3   :  { %2987 = vmatmul.mubr.msk.f32.gmra.mrb[2].mxu0 %vm154_vm0, %v141_v40 }
  0xb6   :  { %v142_v41 = vpop.trf.xlu0 }
  0xb7   :  { %2989 = vmatprep.mubr.msk.f32.mxu0 %vm154_vm0, %v142_v41 }
  0xba   :  { %v143_v42 = vpop.trf.xlu0 }
  0xbb   :  { %2990 = vmatmul.mubr.msk.f32.gmra.mrb[4].mxu0 %vm154_vm0, %v143_v42 }
  0xbe   :  { %v144_v43 = vpop.trf.xlu0 }
  0xbf   :  { %2992 = vmatprep.mubr.msk.f32.mxu0 %vm154_vm0, %v144_v43 }
  0xc2   :  { %v145_v44 = vpop.trf.xlu0 }
  0xc3   :  { %2993 = vmatmul.mubr.msk.f32.gmra.mrb[6].mxu0 %vm154_vm0, %v145_v44 }
  0xc6   :  { %v146_v45 = vpop.trf.xlu0 }
  0xc7   :  { %2995 = vmatprep.mubr.msk.f32.mxu0 %vm154_vm0, %v146_v45 }
  0xc8   :  { %802 = vbcast.lane.b32.xlu0 %v796_v35, 264 }
  0xca   :  { %v147_v46 = vpop.trf.xlu0 }
  0xcb   :  { %2996 = vmatmul.mubr.msk.f32.gmra.mrb[8].mxu0 %vm154_vm0, %v147_v46 }
  0xcc   :  { %1373 = vbcast.lane.b32.xlu0 %v3244_v36, 264 }
  0xce   :  { %v148_v47 = vpop.trf.xlu0 }
  0xcf   :  { %2998 = vmatprep.mubr.msk.f32.mxu0 %vm154_vm0, %v148_v47 }
  0xd0   :  { %1389 = vbcast.lane.b32.xlu0 %v3244_v36, 296 }
  0xd2   :  { %v149_v48 = vpop.trf.xlu0 }
  0xd3   :  { %2999 = vmatmul.mubr.msk.f32.gmra.mrb[10].mxu0 %vm154_vm0, %v149_v48 }
  0xd4   :  { %1397 = vbcast.lane.b32.xlu0 %v3244_v36, 312 }
  0xd6   :  { %v150_v49 = vpop.trf.xlu0 }
  0xd7   :  { %3001 = vmatprep.mubr.msk.f32.mxu0 %vm154_vm0, %v150_v49 }
  0xd8   :  { %1405 = vbcast.lane.b32.xlu0 %v3244_v36, 328 }
  0xda   :  { %v151_v50 = vpop.trf.xlu0 }
  0xdb   :  { %3002 = vmatmul.mubr.msk.f32.gmra.mrb[12].mxu0 %vm154_vm0, %v151_v50 }
  0xdc   :  { %1413 = vbcast.lane.b32.xlu0 %v3244_v36, 344 }
  0xde   :  { %v152_v51 = vpop.trf.xlu0 }
  0xdf   :  { %3004 = vmatprep.mubr.msk.f32.mxu0 %vm154_vm0, %v152_v51 }
  0xe0   :  { %1421 = vbcast.lane.b32.xlu0 %v3244_v36, 360 }
  0xe2   :  { %v153_v52 = vpop.trf.xlu0 }
  0xe3   :  { %3005 = vmatmul.mubr.msk.f32.gmra.mrb[14].mxu0 %vm154_vm0, %v153_v52 }
  0xe4   :  { %1429 = vbcast.lane.b32.xlu0 %v3244_v36, 376 }
  0xe6   :  { %v412_v53 = vpop.trf.xlu0 }
  0xe7   :  { %3009 = vmatprep.mubr.msk.f32.mxu1 %vm154_vm0, %v412_v53 }
  0xea   :  { %v413_v54 = vpop.trf.xlu0 }
  0xeb   :  { %3010 = vmatmul.mubr.msk.f32.vlgmr.msra.gmra.mrb[0].mxu1 %vm154_vm0, %v413_v54 }
  0xee   :  { %v414_v55 = vpop.trf.xlu0 }
  0xef   :  { %3012 = vmatprep.mubr.msk.f32.mxu1 %vm154_vm0, %v414_v55 }
  0xf2   :  { %v415_v56 = vpop.trf.xlu0 }
  0xf3   :  { %3013 = vmatmul.mubr.msk.f32.gmra.mrb[2].mxu1 %vm154_vm0, %v415_v56 }
  0xf6   :  { %v416_v57 = vpop.trf.xlu0 }
  0xf7   :  { %3015 = vmatprep.mubr.msk.f32.mxu1 %vm154_vm0, %v416_v57 }
  0xfa   :  { %v417_v58 = vpop.trf.xlu0 }
  0xfb   :  { %3016 = vmatmul.mubr.msk.f32.gmra.mrb[4].mxu1 %vm154_vm0, %v417_v58 }
  0xfe   :  { %v418_v59 = vpop.trf.xlu0 }
  0xff   :  { %3018 = vmatprep.mubr.msk.f32.mxu1 %vm154_vm0, %v418_v59 }
 0x102   :  { %v419_v61 = vpop.trf.xlu0 }
 0x103   :  { %3019 = vmatmul.mubr.msk.f32.gmra.mrb[6].mxu1 %vm154_vm0, %v419_v61  ;;  %1618 = vadd.xlane.f32.xlu0 %v1617_v60  ;;  %v3369_v61 = vpop.permute.xlu1 %798 }
 0x106   :  { %v420_v62 = vpop.trf.xlu0 }
 0x107   :  { %3021 = vmatprep.mubr.msk.f32.mxu1 %vm154_vm0, %v420_v62 }
 0x10a   :  { %v421_v63 = vpop.trf.xlu0 }
 0x10b   :  { %3022 = vmatmul.mubr.msk.f32.gmra.mrb[8].mxu1 %vm154_vm0, %v421_v63 }
 0x10e   :  { %v422_v1 = vpop.trf.xlu0 }
 0x10f   :  { %3024 = vmatprep.mubr.msk.f32.mxu1 %vm154_vm0, %v422_v1 }
 0x112   :  { %v423_v2 = vpop.trf.xlu0 }
 0x113   :  { %3025 = vmatmul.mubr.msk.f32.gmra.mrb[10].mxu1 %vm154_vm0, %v423_v2 }
 0x116   :  { %v424_v3 = vpop.trf.xlu0 }
 0x117   :  { %3027 = vmatprep.mubr.msk.f32.mxu1 %vm154_vm0, %v424_v3 }
 0x11a   :  { %v425_v4 = vpop.trf.xlu0 }
 0x11b   :  { %3028 = vmatmul.mubr.msk.f32.gmra.mrb[12].mxu1 %vm154_vm0, %v425_v4  ;;  %v3379_v4 = vpop.permute.xlu1 %806 }
 0x11e   :  { %v426_v5 = vpop.trf.xlu0 }
 0x11f   :  { %3030 = vmatprep.mubr.msk.f32.mxu1 %vm154_vm0, %v426_v5 }
 0x122   :  { %v427_v6 = vpop.trf.xlu0 }
 0x123   :  { %3031 = vmatmul.mubr.msk.f32.gmra.mrb[14].mxu1 %vm154_vm0, %v427_v6 }
 0x17e   :  { %v2985_v11 = vpop.f32.mrb[0].mxu0 }
 0x17f   :  { %v1275_v12 = vmul.f32 %v2985_v11, %v2985_v11  ;;  %v3307_v13 = vpop.f32.mrb[1].mxu0  ;;  %v1321_v14 = vmul.f32 %v2985_v11, %v3244_v36  ;;  %v742_v15 = vmul.f32 %v2985_v11, %v3302_v9 }
 0x180   :  { %v1274_v16 = vmul.f32 %v3307_v13, %v3307_v13  ;;  %v741_v19 = vmul.f32 %v2931_v17, %v3307_v13 }
 0x181   :  { %1338 = vadd.xlane.f32.xlu0 %v1321_v14  ;;  %759 = vadd.xlane.f32.xlu1 %v742_v15  ;;  %v662_v15 = vadd.s32 16, %v3234_v30 }
 0x182   :  { %v1290_v18 = vadd.f32 %v1275_v12, %v1274_v16  ;;  %v3395_v16 = vpop.permute.xlu1 %810 }
 0x183   :  { %vm678_vm5 = vcmp.eq.s32.totalorder %v662_v15, %v3297_v7 }
 0x185   :  { %757 = vadd.xlane.f32.xlu1 %v741_v19  ;;  %v1320_v19 = vmul.f32 %v3244_v36, %v3307_v13  ;;  %v665_v13 = vadd.s32 40, %v3234_v30 }
 0x186   :  { %v3319_v21 = vpop.f32.mrb[2].mxu0 }
 0x187   :  { %v3321_v22 = vpop.f32.mrb[3].mxu0  ;;  %v744_v23 = vmul.f32 %v3319_v21, %v3317_v20  ;;  %v1277_v25 = vmul.f32 %v3319_v21, %v3319_v21  ;;  %vm681_vm6 = vcmp.eq.s32.totalorder %v665_v13, %v3297_v7 }
 0x188   :  { %v1276_v24 = vmul.f32 %v3321_v22, %v3321_v22 }
 0x189   :  { %763 = vadd.xlane.f32.xlu1 %v744_v23 }
 0x18a   :  { %v1291_v26 = vadd.f32 %v1290_v18, %v1276_v24 }
 0x18c   :  { %v1292_v27 = vadd.f32 %v1291_v26, %v1277_v25  ;;  %v2933_v26 = vsel %vm678_vm5, 1.0, %v3188_v0 }
 0x18e   :  { %v3329_v28 = vpop.f32.mrb[4].mxu0 }
 0x18f   :  { %v3331_v29 = vpop.f32.mrb[5].mxu0  ;;  %v1279_v33 = vmul.f32 %v3329_v28, %v3329_v28 }
 0x190   :  { %v1278_v31 = vmul.f32 %v3331_v29, %v3331_v29 }
 0x192   :  { %v1293_v34 = vadd.f32 %v1292_v27, %v1278_v31 }
 0x194   :  { %v1294_v35 = vadd.f32 %v1293_v34, %v1279_v33  ;;  %v1323_v33 = vmul.f32 %v3319_v21, %v3244_v36  ;;  %v1322_v21 = vmul.f32 %v3244_v36, %v3321_v22 }
 0x196   :  { %v3337_v37 = vpop.f32.mrb[6].mxu0 }
 0x197   :  { %v3339_v38 = vpop.f32.mrb[7].mxu0  ;;  %v1281_v40 = vmul.f32 %v3337_v37, %v3337_v37 }
 0x198   :  { %v1280_v39 = vmul.f32 %v3339_v38, %v3339_v38 }
 0x19a   :  { %v1295_v41 = vadd.f32 %v1294_v35, %v1280_v39  ;;  %v664_v35 = vadd.s32 32, %v3234_v30 }
 0x19c   :  { %v1296_v42 = vadd.f32 %v1295_v41, %v1281_v40  ;;  %vm680_vm7 = vcmp.eq.s32.totalorder %v664_v35, %v3297_v7 }
 0x19e   :  { %v3345_v43 = vpop.f32.mrb[8].mxu0 }
 0x19f   :  { %v3347_v44 = vpop.f32.mrb[9].mxu0  ;;  %v1283_v46 = vmul.f32 %v3345_v43, %v3345_v43 }
 0x1a0   :  { %v1282_v45 = vmul.f32 %v3347_v44, %v3347_v44 }
 0x1a2   :  { %v1297_v47 = vadd.f32 %v1296_v42, %v1282_v45 }
 0x1a4   :  { %v1298_v48 = vadd.f32 %v1297_v47, %v1283_v46  ;;  %v2936_v47 = vsel %vm681_vm6, 1.0, %v3188_v0 }
 0x1a6   :  { %v3353_v49 = vpop.f32.mrb[10].mxu0 }
 0x1a7   :  { %v3355_v50 = vpop.f32.mrb[11].mxu0  ;;  %v1285_v52 = vmul.f32 %v3353_v49, %v3353_v49 }
 0x1a8   :  { %v1284_v51 = vmul.f32 %v3355_v50, %v3355_v50 }
 0x1aa   :  { %v1299_v53 = vadd.f32 %v1298_v48, %v1284_v51  ;;  %v1325_v51 = vmul.f32 %v3329_v28, %v3244_v36 }
 0x1ac   :  { %v1300_v54 = vadd.f32 %v1299_v53, %v1285_v52  ;;  %v746_v52 = vmul.f32 %v3329_v28, %v2936_v47 }
 0x1ae   :  { %v3361_v55 = vpop.f32.mrb[12].mxu0 }
 0x1af   :  { %v3363_v56 = vpop.f32.mrb[13].mxu0  ;;  %v1287_v58 = vmul.f32 %v3361_v55, %v3361_v55 }
 0x1b0   :  { %v1286_v57 = vmul.f32 %v3363_v56, %v3363_v56 }
 0x1b2   :  { %v1301_v59 = vadd.f32 %v1300_v54, %v1286_v57  ;;  %v2935_v54 = vsel %vm680_vm7, 1.0, %v3188_v0  ;;  %v666_v57 = vadd.s32 48, %v3234_v30 }
 0x1b4   :  { %v1302_v60 = vadd.f32 %v1301_v59, %v1287_v58  ;;  %vm682_vm8 = vcmp.eq.s32.totalorder %v666_v57, %v3297_v7 }
 0x1b5   :  { %v2937_v15 = vsel %vm682_vm8, 1.0, %v3188_v0 }
 0x1b6   :  { %v3371_v62 = vpop.f32.mrb[14].mxu0 }
 0x1b7   :  { %v3373_v63 = vpop.f32.mrb[15].mxu0  ;;  %v1289_v2 = vmul.f32 %v3371_v62, %v3371_v62 }
 0x1b8   :  { %v1288_v1 = vmul.f32 %v3373_v63, %v3373_v63 }
 0x1ba   :  { %v1303_v3 = vadd.f32 %v1302_v60, %v1288_v1 }
 0x1bc   :  { %v3381_v5 = vadd.f32 %v1303_v3, %v1289_v2  ;;  %v667_v3 = vadd.s32 56, %v3234_v30 }
 0x1be   :  { %v3383_v6 = vpop.f32.mrb[0].mxu1  ;;  %vm683_vm9 = vcmp.eq.s32.totalorder %v667_v3, %v3297_v7 }
 0x1bf   :  { %v2324_v8 = vmul.f32 %v3383_v6, %v3383_v6  ;;  %v3387_v10 = vpop.f32.mrb[1].mxu1  ;;  %v1824_v11 = vmul.f32 %v3383_v6, %v3302_v9 }
 0x1c0   :  { %v2323_v12 = vmul.f32 %v3387_v10, %v3387_v10  ;;  %v1823_v14 = vmul.f32 %v2931_v17, %v3387_v10  ;;  %v3406_v17 = vpop.permute.xlu1 %814 }
 0x1c1   :  { %1841 = vadd.xlane.f32.xlu0 %v1824_v11 }
 0x1c2   :  { %v2339_v18 = vadd.f32 %v2324_v8, %v2323_v12  ;;  %v1327_v12 = vmul.f32 %v3337_v37, %v3244_v36 }
 0x1c4   :  { %v3419_v39 = vpop.permute.xlu1 %818 }
 0x1c5   :  { %1336 = vadd.xlane.f32.xlu0 %v1320_v19 }
 0x1c6   :  { %v3400_v23 = vpop.f32.mrb[2].mxu1 }
 0x1c7   :  { %v3402_v9 = vpop.f32.mrb[3].mxu1  ;;  %v1826_v24 = vmul.f32 %v3400_v23, %v3317_v20  ;;  %v2326_v27 = vmul.f32 %v3400_v23, %v3400_v23  ;;  %v743_v20 = vmul.f32 %v2933_v26, %v3321_v22 }
 0x1c8   :  { %v2325_v25 = vmul.f32 %v3402_v9, %v3402_v9  ;;  %v1825_v42 = vmul.f32 %v2933_v26, %v3402_v9  ;;  %v3437_v53 = vpop.permute.xlu1 %822  ;;  %v1324_v26 = vmul.f32 %v3244_v36, %v3331_v29 }
 0x1c9   :  { %1839 = vadd.xlane.f32.xlu0 %v1823_v14  ;;  %1845 = vadd.xlane.f32.xlu1 %v1826_v24  ;;  %v745_v14 = vmul.f32 %v2935_v54, %v3331_v29 }
 0x1ca   :  { %v2340_v31 = vadd.f32 %v2339_v18, %v2325_v25 }
 0x1cc   :  { %v2341_v34 = vadd.f32 %v2340_v31, %v2326_v27  ;;  %v3453_v8 = vpop.permute.xlu1 %826 }
 0x1cd   :  { %1342 = vadd.xlane.f32.xlu0 %v1323_v33  ;;  %761 = vadd.xlane.f32.xlu1 %v743_v20  ;;  %v2938_v33 = vsel %vm683_vm9, 1.0, %v3188_v0 }
 0x1ce   :  { %v3421_v40 = vpop.f32.mrb[4].mxu1  ;;  %v748_v35 = vmul.f32 %v3337_v37, %v2938_v33 }
 0x1cf   :  { %v3423_v41 = vpop.f32.mrb[5].mxu1  ;;  %v2328_v45 = vmul.f32 %v3421_v40, %v3421_v40  ;;  %v1828_v59 = vmul.f32 %v3421_v40, %v2936_v47 }
 0x1d0   :  { %v2327_v46 = vmul.f32 %v3423_v41, %v3423_v41  ;;  %v1827_v58 = vmul.f32 %v2935_v54, %v3423_v41  ;;  %v3467_v13 = vpop.permute.xlu1 %830  ;;  %v747_v54 = vmul.f32 %v2937_v15, %v3339_v38 }
 0x1d1   :  { %1843 = vadd.xlane.f32.xlu0 %v1825_v42  ;;  %1340 = vadd.xlane.f32.xlu1 %v1322_v21 }
 0x1d2   :  { %v2342_v48 = vadd.f32 %v2341_v34, %v2327_v46  ;;  %v1329_v34 = vmul.f32 %v3345_v43, %v3244_v36  ;;  %v1331_v46 = vmul.f32 %v3353_v49, %v3244_v36 }
 0x1d4   :  { %v2343_v22 = vadd.f32 %v2342_v48, %v2328_v45  ;;  %v3478_v21 = vpop.permute.xlu1 %834 }
 0x1d5   :  { %1346 = vadd.xlane.f32.xlu0 %v1325_v51  ;;  %767 = vadd.xlane.f32.xlu1 %v746_v52  ;;  %v669_v51 = vadd.s32 72, %v3234_v30 }
 0x1d6   :  { %v3443_v60 = vpop.f32.mrb[6].mxu1 }
 0x1d7   :  { %v3445_v1 = vpop.f32.mrb[7].mxu1  ;;  %v2330_v28 = vmul.f32 %v3443_v60, %v3443_v60  ;;  %v1830_v29 = vmul.f32 %v3443_v60, %v2938_v33  ;;  %vm685_vm10 = vcmp.eq.s32.totalorder %v669_v51, %v3297_v7  ;;  %v674_v51 = vadd.s32 112, %v3234_v30 }
 0x1d8   :  { %v2329_v2 = vmul.f32 %v3445_v1, %v3445_v1  ;;  %v1829_v19 = vmul.f32 %v2937_v15, %v3445_v1  ;;  %v3494_v57 = vpop.permute.xlu1 %838  ;;  %v3511_v15 = vsel %vm685_vm10, 1.0, %v3188_v0 }
 0x1d9   :  { %1847 = vadd.xlane.f32.xlu0 %v1827_v58  ;;  %1849 = vadd.xlane.f32.xlu1 %v1828_v59  ;;  %v668_v59 = vadd.s32 64, %v3234_v30  ;;  %vm690_vm15 = vcmp.eq.s32.totalorder %v674_v51, %v3297_v7 }
 0x1da   :  { %v2344_v11 = vadd.f32 %v2343_v22, %v2329_v2  ;;  %v1333_v22 = vmul.f32 %v3361_v55, %v3244_v36  ;;  %v1335_v2 = vmul.f32 %v3371_v62, %v3244_v36 }
 0x1db   :  { %vm684_vm11 = vcmp.eq.s32.totalorder %v668_v59, %v3297_v7 }
 0x1dc   :  { %v2345_v18 = vadd.f32 %v2344_v11, %v2330_v28  ;;  %v1326_v11 = vmul.f32 %v3244_v36, %v3339_v38  ;;  %v750_v38 = vmul.f32 %v3345_v43, %v3511_v15 }
 0x1dd   :  { %1350 = vadd.xlane.f32.xlu0 %v1327_v12  ;;  %765 = vadd.xlane.f32.xlu1 %v745_v14 }
 0x1de   :  { %v3461_v24 = vpop.f32.mrb[8].mxu1 }
 0x1df   :  { %v3463_v25 = vpop.f32.mrb[9].mxu1  ;;  %v2332_v27 = vmul.f32 %v3461_v24, %v3461_v24 }
 0x1e0   :  { %v2331_v31 = vmul.f32 %v3463_v25, %v3463_v25 }
 0x1e1   :  { %1851 = vadd.xlane.f32.xlu0 %v1829_v19  ;;  %1344 = vadd.xlane.f32.xlu1 %v1324_v26  ;;  %v3515_v19 = vpop.permute.xlu1 %842 }
 0x1e2   :  { %v2346_v20 = vadd.f32 %v2345_v18, %v2331_v31  ;;  %v670_v18 = vadd.s32 80, %v3234_v30 }
 0x1e4   :  { %v2347_v42 = vadd.f32 %v2346_v20, %v2332_v27  ;;  %v2939_v27 = vsel %vm684_vm11, 1.0, %v3188_v0  ;;  %vm686_vm12 = vcmp.eq.s32.totalorder %v670_v18, %v3297_v7  ;;  %v672_v20 = vadd.s32 96, %v3234_v30 }
 0x1e5   :  { %1354 = vadd.xlane.f32.xlu0 %v1329_v34  ;;  %771 = vadd.xlane.f32.xlu1 %v748_v35  ;;  %v1831_v33 = vmul.f32 %v2939_v27, %v3463_v25  ;;  %v671_v34 = vadd.s32 88, %v3234_v30  ;;  %v749_v43 = vmul.f32 %v2939_v27, %v3347_v44  ;;  %v673_v18 = vadd.s32 104, %v3234_v30 }
 0x1e6   :  { %v3480_v45 = vpop.f32.mrb[10].mxu1  ;;  %vm688_vm13 = vcmp.eq.s32.totalorder %v672_v20, %v3297_v7  ;;  %v1330_v27 = vmul.f32 %v3244_v36, %v3355_v50 }
 0x1e7   :  { %v3484_v47 = vpop.f32.mrb[11].mxu1  ;;  %v2334_v48 = vmul.f32 %v3480_v45, %v3480_v45  ;;  %vm687_vm14 = vcmp.eq.s32.totalorder %v671_v34, %v3297_v7  ;;  %vm689_vm0 = vcmp.eq.s32.totalorder %v673_v18, %v3297_v7  ;;  %v675_v34 = vadd.s32 120, %v3234_v30 }
 0x1e8   :  { %v2333_v37 = vmul.f32 %v3484_v47, %v3484_v47 }
 0x1e9   :  { %1358 = vadd.xlane.f32.xlu0 %v1331_v46  ;;  %1853 = vadd.xlane.f32.xlu1 %v1830_v29  ;;  %v3530_v29 = vpop.permute.xlu1 %846  ;;  %v2941_v46 = vsel %vm686_vm12, 1.0, %v3188_v0  ;;  %vm691_vm2 = vcmp.eq.s32.totalorder %v675_v34, %v3297_v7 }
 0x1ea   :  { %v2348_v52 = vadd.f32 %v2347_v42, %v2333_v37 }
 0x1ec   :  { %v2349_v58 = vadd.f32 %v2348_v52, %v2334_v48 }
 0x1ed   :  { %1362 = vadd.xlane.f32.xlu0 %v1333_v22  ;;  %769 = vadd.xlane.f32.xlu1 %v747_v54  ;;  %v1328_v22 = vmul.f32 %v3244_v36, %v3347_v44  ;;  %v2943_v54 = vsel %vm688_vm13, 1.0, %v3188_v0 }
 0x1ee   :  { %v3498_v28 = vpop.f32.mrb[12].mxu1 }
 0x1ef   :  { %v3502_v3 = vpop.f32.mrb[13].mxu1  ;;  %v2336_v12 = vmul.f32 %v3498_v28, %v3498_v28 }
 0x1f0   :  { %v2335_v14 = vmul.f32 %v3502_v3, %v3502_v3 }
 0x1f1   :  { %1366 = vadd.xlane.f32.xlu0 %v1335_v2  ;;  %1348 = vadd.xlane.f32.xlu1 %v1326_v11  ;;  %v1835_v2 = vmul.f32 %v2943_v54, %v3502_v3  ;;  %v3549_v11 = vpop.permute.xlu1 %850 }
 0x1f2   :  { %v2350_v26 = vadd.f32 %v2349_v58, %v2335_v14  ;;  %v2942_v58 = vsel %vm687_vm14, 1.0, %v3188_v0  ;;  %v2945_v14 = vsel %vm690_vm15, 1.0, %v3188_v0 }
 0x1f4   :  { %v2351_v31 = vadd.f32 %v2350_v26, %v2336_v12  ;;  %v752_v12 = vmul.f32 %v3353_v49, %v2942_v58  ;;  %v751_v26 = vmul.f32 %v2941_v46, %v3355_v50  ;;  %v3189_v49 = vmov 0  }
 0x1f5   :  { %1305 = vadd.xlane.f32.xlu0 %v3381_v5  ;;  %775 = vadd.xlane.f32.xlu1 %v750_v38  ;;  %v1833_v5 = vmul.f32 %v2941_v46, %v3484_v47  ;;  %v3556_v38 = vpop.permute.xlu1 %854 }
 0x1f6   :  { %v3525_v35 = vpop.f32.mrb[14].mxu1  ;;  %4647 = vst [vmem:[#allocation19_spill] sm:$0xff] %v3556_v38  ;;  %3060 = vset.pattern.permute.xlu0 %v3189_v49  ;;  %3061 = vset.pattern.permute.xlu1 %v3189_v49 }
 0x1f7   :  { %v3527_v42 = vpop.f32.mrb[15].mxu1  ;;  %v2338_v48 = vmul.f32 %v3525_v35, %v3525_v35 }
 0x1f8   :  { %v2337_v37 = vmul.f32 %v3527_v42, %v3527_v42  ;;  %v1837_v44 = vmul.f32 %v2945_v14, %v3527_v42 }
 0x1f9   :  { %1855 = vadd.xlane.f32.xlu0 %v1831_v33  ;;  %773 = vadd.xlane.f32.xlu1 %v749_v43  ;;  %v3562_v33 = vpop.permute.xlu1 %858  ;;  %v1806_v43 = vld [vmem:[#allocation3] sm:$0x1] }
 0x1fa   :  { %v2352_v52 = vadd.f32 %v2351_v31, %v2337_v37  ;;  %v2944_v31 = vsel %vm689_vm0, 1.0, %v3188_v0  ;;  %v3566_v46 = vmul.f32 %v1806_v43, %v1806_v43 }
 0x1fb   :  { %v754_v20 = vmul.f32 %v3361_v55, %v2944_v31  ;;  %v2946_v55 = vsel %vm691_vm2, 1.0, %v3188_v0  ;;  %v1334_v0 = vmul.f32 %v3244_v36, %v3373_v63 }
 0x1fc   :  { %v3545_v59 = vadd.f32 %v2352_v52, %v2338_v48  ;;  %4648 = vst [vmem:[#allocation20_spill] sm:$0xff] %v3566_v46  ;;  %v753_v48 = vmul.f32 %v2943_v54, %v3363_v56  ;;  %v1872_v50 = vmul.f32 0.125, %v3566_v46  ;;  %v3582_v54 = vpop.permute.xlu0 %802 }
 0x1fd   :  { %1859 = vadd.xlane.f32.xlu0 %v1833_v5  ;;  %1352 = vadd.xlane.f32.xlu1 %v1328_v22  ;;  %v3569_v37 = vpop.permute.xlu1 %1369  ;;  %v1332_v5 = vmul.f32 %v3244_v36, %v3363_v56  ;;  %v756_v22 = vmul.f32 %v3371_v62, %v2946_v55  ;;  %v1832_v62 = vmul.f32 %v3461_v24, %v3511_v15 }
 0x1fe   :  { %4646 = vst [vmem:[#allocation18_spill] sm:$0xff] %v3545_v59  ;;  %v3579_v52 = vrot.slane %v1872_v50, %v3237_v32  ;;  %v1838_v15 = vmul.f32 %v3525_v35, %v2946_v55 }
 0x200   :  { %v3588_v56 = vpop.permute.xlu0 %1373 }
 0x201   :  { %1863 = vadd.xlane.f32.xlu0 %v1835_v2  ;;  %779 = vadd.xlane.f32.xlu1 %v752_v12  ;;  %v3576_v51 = vpop.permute.xlu1 %1377  ;;  %v755_v2 = vmul.f32 %v2945_v14, %v3373_v63  ;;  %v1834_v14 = vmul.f32 %v3480_v45, %v2942_v58  ;;  %v1836_v63 = vmul.f32 %v3498_v28, %v2944_v31 }
 0x204   :  { %v3598_v18 = vpop.permute.xlu0 %1389 }
 0x205   :  { %1867 = vadd.xlane.f32.xlu0 %v1837_v44  ;;  %777 = vadd.xlane.f32.xlu1 %v751_v26  ;;  %v3586_v12 = vpop.permute.xlu1 %1381 }
 0x208   :  { %v3604_v36 = vpop.permute.xlu0 %1397 }
 0x209   :  { %1356 = vadd.xlane.f32.xlu1 %v1330_v27  ;;  %v3593_v44 = vpop.permute.xlu1 %1385 }
 0x20c   :  { %v3612_v49 = vpop.permute.xlu0 %1405 }
 0x20d   :  { %783 = vadd.xlane.f32.xlu1 %v754_v20  ;;  %v3602_v26 = vpop.permute.xlu1 %1393 }
 0x210   :  { %v3617_v20 = vpop.permute.xlu0 %1413 }
 0x211   :  { %781 = vadd.xlane.f32.xlu1 %v753_v48  ;;  %v3609_v27 = vpop.permute.xlu1 %1401 }
 0x212   :  { %4649 = vst [vmem:[#allocation21_spill] sm:$0xff] %v3609_v27 }
 0x214   :  { %v3621_v31 = vpop.permute.xlu0 %1421 }
 0x215   :  { %1360 = vadd.xlane.f32.xlu1 %v1332_v5  ;;  %v3615_v58 = vpop.permute.xlu1 %1409 }
 0x216   :  { %4650 = vst [vmem:[#allocation22_spill] sm:$0xff] %v3615_v58 }
 0x218   :  { %v3625_v50 = vpop.permute.xlu0 %1429 }
 0x219   :  { %787 = vadd.xlane.f32.xlu1 %v756_v22  ;;  %v3619_v34 = vpop.permute.xlu1 %1417  ;;  %v3633_v22 = vrot.slane %v1806_v43, %v3237_v32 }
 0x21a   :  { %4651 = vst [vmem:[#allocation23_spill] sm:$0xff] %v3619_v34 }
 0x21b   :  { %1879 = vbcast.lane.b32.xlu0 %v3579_v52, 256  ;;  %4654 = vst [vmem:[#allocation26_spill] sm:$0xff] %v3633_v22  ;;  %v2372_v43 = vmul.f32 %v3400_v23, %v3633_v22  ;;  %v2370_v34 = vmul.f32 %v3383_v6, %v3633_v22 }
 0x21c   :  { %v3629_v55 = vpop.xlane.xlu0 %1618 }
 0x21d   :  { %785 = vadd.xlane.f32.xlu1 %v755_v2  ;;  %v3623_v48 = vpop.permute.xlu1 %1425  ;;  %4653 = vst [vmem:[#allocation25_spill] sm:$0xff] %v3629_v55 }
 0x21e   :  { %4652 = vst [vmem:[#allocation24_spill] sm:$0xff] %v3623_v48 }
 0x21f   :  { %1895 = vbcast.lane.b32.xlu0 %v3579_v52, 288 }
 0x221   :  { %1364 = vadd.xlane.f32.xlu1 %v1334_v0  ;;  %v760_v5 = vpop.xlane.xlu1 %759  ;;  %v1339_v0 = vpop.xlane.xlu0 %1338 }
 0x222   :  { %v877_v48 = vsub.f32 %v760_v5, %v3582_v54  ;;  %v2374_v5 = vmul.f32 %v3421_v40, %v3633_v22 }
 0x223   :  { %1903 = vbcast.lane.b32.xlu0 %v3579_v52, 304 }
 0x225   :  { %1857 = vadd.xlane.f32.xlu1 %v1832_v62  ;;  %v758_v2 = vpop.xlane.xlu1 %757  ;;  %v2369_v62 = vmul.f32 %v3633_v22, %v3387_v10 }
 0x227   :  { %1911 = vbcast.lane.b32.xlu0 %v3579_v52, 320 }
 0x229   :  { %1861 = vadd.xlane.f32.xlu1 %v1834_v14  ;;  %v3638_v14 = vpop.xlane.xlu1 %763 }
 0x22b   :  { %1919 = vbcast.lane.b32.xlu0 %v3579_v52, 336 }
 0x22d   :  { %1865 = vadd.xlane.f32.xlu1 %v1836_v63 }
 0x22f   :  { %1927 = vbcast.lane.b32.xlu0 %v3579_v52, 352 }
 0x231   :  { %1869 = vadd.xlane.f32.xlu1 %v1838_v15  ;;  %v2371_v15 = vmul.f32 %v3633_v22, %v3402_v9 }
 0x233   :  { %1935 = vbcast.lane.b32.xlu0 %v3579_v52, 368 }
 0x242   :  { %1883 = vbcast.lane.b32.xlu1 %v3579_v52, 264 }
 0x246   :  { %1887 = vbcast.lane.b32.xlu1 %v3579_v52, 272 }
 0x24a   :  { %1891 = vbcast.lane.b32.xlu1 %v3579_v52, 280 }
 0x24e   :  { %1899 = vbcast.lane.b32.xlu1 %v3579_v52, 296  ;;  %v3640_v63 = vpop.xlane.xlu0 %1841 }
 0x24f   :  { %4655 = vst [vmem:[#allocation27_spill] sm:$0xff] %v3640_v63  ;;  %v1448_v63 = vmul.f32 %v3588_v56, %v1339_v0  ;;  %v879_v56 = vsub.f32 %v3638_v14, %v3395_v16  ;;  %v2376_v0 = vmul.f32 %v3443_v60, %v3633_v22  ;;  %v2378_v60 = vmul.f32 %v3461_v24, %v3633_v22 }
 0x250   :  { %v2380_v24 = vmul.f32 %v3480_v45, %v3633_v22  ;;  %v2382_v45 = vmul.f32 %v3498_v28, %v3633_v22 }
 0x252   :  { %2385 = vadd.xlane.f32.xlu0 %v2369_v62  ;;  %1907 = vbcast.lane.b32.xlu1 %v3579_v52, 312  ;;  %v3650_v55 = vpop.xlane.xlu0 %1336  ;;  %v2373_v62 = vmul.f32 %v3633_v22, %v3423_v41 }
 0x256   :  { %2389 = vadd.xlane.f32.xlu0 %v2371_v15  ;;  %1915 = vbcast.lane.b32.xlu1 %v3579_v52, 328  ;;  %v3646_v32 = vpop.xlane.xlu1 %1845  ;;  %v3655_v46 = vpop.xlane.xlu0 %1839  ;;  %v2375_v15 = vmul.f32 %v3633_v22, %v3445_v1  ;;  %v2381_v1 = vmul.f32 %v3633_v22, %v3502_v3  ;;  %v876_v3 = vsub.f32 %v758_v2, %v3369_v61 }
 0x257   :  { %4656 = vst [vmem:[#allocation28_spill] sm:$0xff] %v3646_v32 }
 0x25a   :  { %2391 = vadd.xlane.f32.xlu0 %v2372_v43  ;;  %1923 = vbcast.lane.b32.xlu1 %v3579_v52, 344  ;;  %v762_v10 = vpop.xlane.xlu1 %761  ;;  %v2377_v43 = vmul.f32 %v3633_v22, %v3463_v25  ;;  %v1343_v59 = vpop.xlane.xlu0 %1342  ;;  %v2383_v25 = vmul.f32 %v3633_v22, %v3527_v42  ;;  %v3697_v42 = vmul.f32 0.14285715, %v876_v3 }
 0x25b   :  { %v878_v61 = vsub.f32 %v762_v10, %v3379_v4  ;;  %v1450_v4 = vmul.f32 %v3586_v12, %v1343_v59  ;;  %v3733_v10 = vmul.f32 0.14285715, %v879_v56 }
 0x25c   :  { %v909_v58 = vmax.f32 %v3697_v42, 0.0 }
 0x25e   :  { %2393 = vadd.xlane.f32.xlu0 %v2373_v62  ;;  %1931 = vbcast.lane.b32.xlu1 %v3579_v52, 360  ;;  %v3658_v9 = vpop.xlane.xlu1 %1340  ;;  %v2379_v62 = vmul.f32 %v3633_v22, %v3484_v47  ;;  %v3671_v30 = vpop.xlane.xlu0 %1843  ;;  %v3718_v27 = vadd.f32 0.0001, %v909_v58 }
 0x260   :  { %3062 = vrsqrt.f32 %v3718_v27  ;;  %vm943_vm5 = vcmp.eq.f32.partialorder %v3718_v27, inf  ;;  %vm945_vm7 = vcmp.eq.f32.partialorder %v3718_v27, 0.0 }
 0x262   :  { %2397 = vadd.xlane.f32.xlu0 %v2375_v15  ;;  %1939 = vbcast.lane.b32.xlu1 %v3579_v52, 376  ;;  %v3663_v23 = vpop.xlane.xlu1 %767  ;;  %v3681_v15 = vpop.xlane.xlu0 %1346 }
 0x266   :  { %2401 = vadd.xlane.f32.xlu0 %v2377_v43  ;;  %v3667_v41 = vpop.xlane.xlu1 %1849  ;;  %v3685_v47 = vpop.xlane.xlu0 %1847 }
 0x267   :  { %4657 = vst [vmem:[#allocation29_spill] sm:$0xff] %v3667_v41 }
 0x26a   :  { %2405 = vadd.xlane.f32.xlu0 %v2379_v62  ;;  %v3673_v7 = vpop.xlane.xlu1 %765  ;;  %v3691_v41 = vpop.xlane.xlu0 %1350 }
 0x26e   :  { %2409 = vadd.xlane.f32.xlu0 %v2381_v1  ;;  %v3677_v52 = vpop.xlane.xlu1 %1344  ;;  %v3699_v32 = vpop.xlane.xlu0 %1851 }
 0x272   :  { %2413 = vadd.xlane.f32.xlu0 %v2383_v25  ;;  %v3683_v43 = vpop.xlane.xlu1 %771  ;;  %v3713_v3 = vpop.xlane.xlu0 %1354 }
 0x276   :  { %v3687_v38 = vpop.xlane.xlu1 %1853  ;;  %v3736_v59 = vpop.xlane.xlu0 %1358 }
 0x277   :  { %4658 = vst [vmem:[#allocation30_spill] sm:$0xff] %v3687_v38  ;;  %v3705_v38 = vmul.f32 0.14285715, %v877_v48 }
 0x279   :  { %4659 = vst [vmem:[#allocation31_spill] sm:$0xff] %v3705_v38  ;;  %v910_v6 = vmax.f32 %v3705_v38, 0.0 }
 0x27a   :  { %v3689_v62 = vpop.xlane.xlu1 %769 }
 0x27e   :  { %v3694_v1 = vpop.xlane.xlu1 %1348 }
 0x282   :  { %v3701_v25 = vpop.xlane.xlu1 %775 }
 0x286   :  { %2387 = vadd.xlane.f32.xlu1 %v2370_v34  ;;  %v774_v2 = vpop.xlane.xlu1 %773  ;;  %v3723_v34 = vmul.f32 0.14285715, %v878_v61 }
 0x287   :  { %v884_v54 = vsub.f32 %v774_v2, %v3467_v13  ;;  %v912_v2 = vmax.f32 %v3733_v10, 0.0 }
 0x288   :  { %1483 = vperm.xlu0 %3060, %v1448_v63   ;;  %4661 = vst [vmem:[#allocation33_spill] sm:$0xff] %v3723_v34  ;;  %v3730_v63 = vadd.f32 0.0001, %v910_v6  ;;  %v911_v16 = vmax.f32 %v3723_v34, 0.0 }
 0x289   :  { %v3716_v48 = vmul.f32 0.14285715, %v884_v54 }
 0x28a   :  { %2395 = vadd.xlane.f32.xlu1 %v2374_v5  ;;  %v3725_v13 = vpop.xlane.xlu1 %1352  ;;  %v3745_v54 = vadd.f32 0.0001, %v911_v16  ;;  %v880_v5 = vsub.f32 %v3673_v7, %v3406_v17  ;;  %vm950_vm6 = vcmp.eq.f32.partialorder %v3730_v63, inf  ;;  %vm952_vm10 = vcmp.eq.f32.partialorder %v3730_v63, 0.0 }
 0x28b   :  { %4660 = vst [vmem:[#allocation32_spill] sm:$0xff] %v3716_v48  ;;  %v917_v40 = vmax.f32 %v3716_v48, 0.0 }
 0x28c   :  { %1489 = vperm.xlu0 %3060, %v1450_v4   ;;  %v3756_v4 = vpop.xlane.xlu0 %1362  ;;  %v3763_v7 = vmul.f32 0.14285715, %v880_v5  ;;  %vm957_vm11 = vcmp.eq.f32.partialorder %v3745_v54, inf  ;;  %vm959_vm13 = vcmp.eq.f32.partialorder %v3745_v54, 0.0 }
 0x28d   :  { %v933_v58 = vadd.f32 0.0001, %v917_v40 }
 0x28e   :  { %2399 = vadd.xlane.f32.xlu1 %v2376_v0  ;;  %v780_v12 = vpop.xlane.xlu1 %779  ;;  %v3760_v0 = vadd.f32 0.0001, %v912_v2  ;;  %4662 = vst [vmem:[#allocation34_spill] sm:$0xff] %v3763_v7 }
 0x28f   :  { %3064 = vrsqrt.f32 %v933_v58  ;;  %v887_v14 = vsub.f32 %v780_v12, %v3515_v19  ;;  %v881_v19 = vsub.f32 %v3663_v23, %v3419_v39  ;;  %v3063_v39 = vpop.eup %3062  ;;  %v882_v12 = vsub.f32 %v3689_v62, %v3437_v53 }
 0x290   :  { %3066 = vrsqrt.f32 %v3730_v63  ;;  %v3778_v2 = vpop.xlane.xlu0 %1366  ;;  %vm999_vm3 = vcmp.eq.f32.partialorder %v933_v58, inf  ;;  %v1002_v28 = vand.u32 2147483648, %v933_v58  ;;  %v942_v48 = vmul.f32 %v3063_v39, %v3718_v27 }
 0x291   :  { %v3742_v61 = vmul.f32 0.14285715, %v887_v14  ;;  %3068 = vrsqrt.f32 %v3745_v54  ;;  %v3767_v16 = vmul.f32 0.14285715, %v881_v19  ;;  %v2384_v14 = vmul.f32 %v3525_v35, %v3633_v22 }
 0x292   :  { %2403 = vadd.xlane.f32.xlu1 %v2378_v60  ;;  %v3749_v6 = vpop.xlane.xlu1 %777  ;;  %v913_v60 = vmax.f32 %v3763_v7, 0.0  ;;  %v883_v53 = vsub.f32 %v3683_v43, %v3453_v8  ;;  %vm1001_vm4 = vcmp.eq.f32.partialorder %v933_v58, 0.0  ;;  %v3785_v22 = vmul.f32 0.14285715, %v882_v12 }
 0x293   :  { %v920_v56 = vmax.f32 %v3742_v61, 0.0  ;;  %v953_v8 = vand.u32 2147483648, %v3730_v63  ;;  %vm964_vm12 = vcmp.eq.f32.partialorder %v3760_v0, inf  ;;  %vm966_vm14 = vcmp.eq.f32.partialorder %v3760_v0, 0.0 }
 0x294   :  { %v3799_v43 = vmul.f32 0.14285715, %v883_v53 }
 0x295   :  { %v3758_v40 = vadd.f32 0.0001, %v920_v56 }
 0x296   :  { %2407 = vadd.xlane.f32.xlu1 %v2380_v24  ;;  %v3765_v17 = vpop.xlane.xlu1 %1356  ;;  %v914_v24 = vmax.f32 %v3767_v16, 0.0 }
 0x297   :  { %4663 = vst [vmem:[#allocation35_spill] sm:$0xff] %v3765_v17  ;;  %3070 = vrsqrt.f32 %v3758_v40  ;;  %vm1020_vm8 = vcmp.eq.f32.partialorder %v3758_v40, inf  ;;  %vm1022_vm9 = vcmp.eq.f32.partialorder %v3758_v40, 0.0 }
 0x298   :  { %3072 = vrsqrt.f32 %v3760_v0  ;;  %v3794_v17 = vadd.f32 0.0001, %v914_v24 }
 0x299   :  { %v3065_v23 = vpop.eup %3064 }
 0x29a   :  { %2411 = vadd.xlane.f32.xlu1 %v2382_v45  ;;  %v784_v5 = vpop.xlane.xlu1 %783  ;;  %v998_v19 = vmul.f32 %v3065_v23, %v933_v58  ;;  %v3067_v56 = vpop.eup %3066  ;;  %v3787_v45 = vadd.f32 0.0001, %v913_v60 }
 0x29b   :  { %v889_v35 = vsub.f32 %v784_v5, %v3549_v11  ;;  %v949_v39 = vmul.f32 %v3067_v56, %v3730_v63  ;;  %v3069_v11 = vpop.eup %3068  ;;  %v915_v5 = vmax.f32 %v3785_v22, 0.0  ;;  %v946_v56 = vand.u32 2147483648, %v3718_v27 }
 0x29c   :  { %v1000_v62 = vsel %vm999_vm3, %v933_v58, %v998_v19  ;;  %v3801_v58 = vpop.xlane.xlu0 %1305  ;;  %v885_v19 = vsub.f32 %v3701_v25, %v3478_v21  ;;  %3074 = vrsqrt.f32 %v3787_v45  ;;  %v1452_v21 = vmul.f32 %v3598_v18, %v3681_v15 }
 0x29d   :  { %v1003_v7 = vsel %vm1001_vm4, %v1002_v28, %v1000_v62  ;;  %v3789_v23 = vmul.f32 0.14285715, %v889_v35  ;;  %4664 = vst [vmem:[#allocation36_spill] sm:$0xff] %v3801_v58  ;;  %3076 = vrsqrt.f32 %v3794_v17  ;;  %v916_v35 = vmax.f32 %v3799_v43, 0.0 }
 0x29e   :  { %2415 = vadd.xlane.f32.xlu1 %v2384_v14  ;;  %v3791_v34 = vpop.xlane.xlu1 %781  ;;  %v1061_v38 = vsub.f32 1.0, %v1003_v7  ;;  %v944_v7 = vsel %vm943_vm5, %v3718_v27, %v942_v48  ;;  %v951_v48 = vsel %vm950_vm6, %v3730_v63, %v949_v39  ;;  %v956_v27 = vmul.f32 %v3069_v11, %v3745_v54 }
 0x29f   :  { %v922_v12 = vmax.f32 %v3789_v23, 0.0  ;;  %v947_v25 = vsel %vm945_vm7, %v946_v56, %v944_v7  ;;  %v1023_v62 = vand.u32 2147483648, %v3758_v40  ;;  %v3829_v39 = vmul.f32 0.14285715, %v885_v19 }
 0x2a0   :  { %v1077_v14 = vmax.f32 %v1061_v38, 0.0  ;;  %v3833_v15 = vpop.xlane.xlu0 %1855  ;;  %v886_v11 = vsub.f32 %v3749_v6, %v3494_v57  ;;  %v954_v56 = vsel %vm952_vm10, %v953_v8, %v951_v48  ;;  %v958_v6 = vsel %vm957_vm11, %v3745_v54, %v956_v27 }
 0x2a1   :  { %v3071_v60 = vpop.eup %3070  ;;  %v3811_v24 = vadd.f32 0.0001, %v922_v12  ;;  %v3827_v12 = vadd.f32 0.0001, %v915_v5  ;;  %4665 = vst [vmem:[#allocation37_spill] sm:$0xff] %v3833_v15  ;;  %v918_v57 = vmax.f32 %v3829_v39, 0.0  ;;  %v888_v63 = vsub.f32 %v3791_v34, %v3530_v29 }
 0x2a2   :  { %1126 = vperm.xlu0 %3060, %v1077_v14   ;;  %v3813_v28 = vpop.xlane.xlu1 %1360  ;;  %v1019_v38 = vmul.f32 %v3071_v60, %v3758_v40  ;;  %v3073_v53 = vpop.eup %3072  ;;  %v1053_v60 = vsub.f32 1.0, %v947_v25  ;;  %v960_v25 = vand.u32 2147483648, %v3745_v54  ;;  %v1454_v34 = vmul.f32 %v3604_v36, %v3691_v41 }
 0x2a3   :  { %3078 = vrsqrt.f32 %v3811_v24  ;;  %vm971_vm15 = vcmp.eq.f32.partialorder %v3787_v45, inf  ;;  %vm1034_vm0 = vcmp.eq.f32.partialorder %v3811_v24, inf  ;;  %vm1036_vm2 = vcmp.eq.f32.partialorder %v3811_v24, 0.0 }
 0x2a4   :  { %v1021_v18 = vsel %vm1020_vm8, %v3758_v40, %v1019_v38  ;;  %v963_v38 = vmul.f32 %v3073_v53, %v3760_v0  ;;  %v3841_v40 = vadd.f32 0.0001, %v916_v35  ;;  %3080 = vrsqrt.f32 %v3827_v12 }
 0x2a5   :  { %v1024_v7 = vsel %vm1022_vm9, %v1023_v62, %v1021_v18  ;;  %v967_v53 = vand.u32 2147483648, %v3760_v0  ;;  %v3857_v62 = vpop.xlane.xlu0 %1859  ;;  %v1069_v18 = vmax.f32 %v1053_v60, 0.0  ;;  %vm973_vm3 = vcmp.eq.f32.partialorder %v3787_v45, 0.0 }
 0x2a6   :  { %1495 = vperm.xlu0 %3060, %v1452_v21   ;;  %v788_v14 = vpop.xlane.xlu1 %787  ;;  %v1064_v19 = vsub.f32 1.0, %v1024_v7  ;;  %v3846_v21 = vmul.f32 0.14285715, %v886_v11  ;;  %v3075_v35 = vpop.eup %3074  ;;  %4666 = vst [vmem:[#allocation38_spill] sm:$0xff] %v3857_v62  ;;  %v1054_v11 = vsub.f32 1.0, %v954_v56  ;;  %v961_v7 = vsel %vm959_vm13, %v960_v25, %v958_v6 }
 0x2a7   :  { %v891_v5 = vsub.f32 %v788_v14, %v3562_v33  ;;  %v3077_v29 = vpop.eup %3076  ;;  %v3863_v14 = vadd.f32 0.0001, %v918_v57  ;;  %3082 = vrsqrt.f32 %v3841_v40  ;;  %v3868_v62 = vmul.f32 0.14285715, %v888_v63 }
 0x2a8   :  { %v1080_v33 = vmax.f32 %v1064_v19, 0.0  ;;  %v919_v58 = vmax.f32 %v3846_v21, 0.0  ;;  %v970_v36 = vmul.f32 %v3075_v35, %v3787_v45  ;;  %v1070_v41 = vmax.f32 %v1054_v11, 0.0 }
 0x2a9   :  { %v3850_v8 = vmul.f32 0.14285715, %v891_v5  ;;  %v965_v5 = vsel %vm964_vm12, %v3760_v0, %v963_v38  ;;  %v1055_v54 = vsub.f32 1.0, %v961_v7  ;;  %v977_v6 = vmul.f32 %v3077_v29, %v3794_v17  ;;  %v3881_v63 = vpop.xlane.xlu0 %1863 }
 0x2aa   :  { %v3852_v48 = vpop.xlane.xlu1 %785  ;;  %1135 = vperm.xlu0 %3060, %v1080_v33   ;;  %v968_v38 = vsel %vm966_vm14, %v967_v53, %v965_v5  ;;  %v3883_v33 = vadd.f32 0.0001, %v919_v58  ;;  %v921_v0 = vmax.f32 %v3868_v62, 0.0  ;;  %v1037_v53 = vand.u32 2147483648, %v3811_v24 }
 0x2ab   :  { %v924_v27 = vmax.f32 %v3850_v8, 0.0  ;;  %v1056_v29 = vsub.f32 1.0, %v968_v38  ;;  %v974_v58 = vand.u32 2147483648, %v3787_v45  ;;  %v1071_v7 = vmax.f32 %v1055_v54, 0.0 }
 0x2ac   :  { %vm978_vm4 = vcmp.eq.f32.partialorder %v3794_v17, inf  ;;  %v3897_v5 = vadd.f32 0.0001, %v921_v0  ;;  %v981_v38 = vand.u32 2147483648, %v3794_v17  ;;  %vm980_vm5 = vcmp.eq.f32.partialorder %v3794_v17, 0.0 }
 0x2ad   :  { %v3079_v19 = vpop.eup %3078  ;;  %v3870_v60 = vadd.f32 0.0001, %v924_v27  ;;  %vm985_vm6 = vcmp.eq.f32.partialorder %v3827_v12, inf  ;;  %vm987_vm9 = vcmp.eq.f32.partialorder %v3827_v12, 0.0  ;;  %vm992_vm10 = vcmp.eq.f32.partialorder %v3841_v40, inf }
 0x2ae   :  { %v3872_v56 = vpop.xlane.xlu1 %1364  ;;  %1501 = vperm.xlu0 %3060, %v1454_v34   ;;  %v1033_v57 = vmul.f32 %v3079_v19, %v3811_v24  ;;  %v3081_v35 = vpop.eup %3080  ;;  %vm994_vm11 = vcmp.eq.f32.partialorder %v3841_v40, 0.0  ;;  %vm1006_vm12 = vcmp.eq.f32.partialorder %v3863_v14, inf  ;;  %vm1008_vm13 = vcmp.eq.f32.partialorder %v3863_v14, 0.0 }
 0x2af   :  { %1102 = vperm.xlu1 %3061, %v1069_v18   ;;  %3084 = vrsqrt.f32 %v3870_v60  ;;  %v972_v18 = vsel %vm971_vm15, %v3787_v45, %v970_v36  ;;  %v1072_v45 = vmax.f32 %v1056_v29, 0.0  ;;  %vm1048_vm7 = vcmp.eq.f32.partialorder %v3870_v60, inf }
 0x2b0   :  { %3086 = vrsqrt.f32 %v3863_v14  ;;  %v1035_v27 = vsel %vm1034_vm0, %v3811_v24, %v1033_v57  ;;  %v979_v24 = vsel %vm978_vm4, %v3794_v17, %v977_v6  ;;  %v984_v57 = vmul.f32 %v3081_v35, %v3827_v12 }
 0x2b1   :  { %v1038_v11 = vsel %vm1036_vm2, %v1037_v53, %v1035_v27  ;;  %3088 = vrsqrt.f32 %v3883_v33  ;;  %v3083_v54 = vpop.eup %3082  ;;  %v3904_v53 = vpop.xlane.xlu0 %1867  ;;  %v982_v27 = vsel %vm980_vm5, %v981_v38, %v979_v24  ;;  %v1456_v35 = vmul.f32 %v3612_v49, %v3713_v3 }
 0x2b2   :  { %v3886_v25 = vpop.xlane.xlu1 %1857  ;;  %v1066_v34 = vsub.f32 1.0, %v1038_v11  ;;  %3090 = vrsqrt.f32 %v3897_v5  ;;  %v986_v17 = vsel %vm985_vm6, %v3827_v12, %v984_v57  ;;  %v991_v29 = vmul.f32 %v3083_v54, %v3841_v40 }
 0x2b3   :  { %4667 = vst [vmem:[#allocation39_spill] sm:$0xff] %v3886_v25  ;;  %1105 = vperm.xlu1 %3061, %v1070_v41   ;;  %v975_v41 = vsel %vm973_vm3, %v974_v58, %v972_v18  ;;  %vm1050_vm8 = vcmp.eq.f32.partialorder %v3870_v60, 0.0  ;;  %vm1013_vm14 = vcmp.eq.f32.partialorder %v3883_v33, inf  ;;  %vm1015_vm15 = vcmp.eq.f32.partialorder %v3883_v33, 0.0 }
 0x2b4   :  { %v1082_v36 = vmax.f32 %v1066_v34, 0.0  ;;  %v1057_v0 = vsub.f32 1.0, %v975_v41  ;;  %v1051_v34 = vand.u32 2147483648, %v3870_v60  ;;  %v988_v41 = vand.u32 2147483648, %v3827_v12 }
 0x2b5   :  { %v1880_v49 = vpop.permute.xlu0 %1879  ;;  %vm1027_vm0 = vcmp.eq.f32.partialorder %v3897_v5, inf  ;;  %vm1029_vm2 = vcmp.eq.f32.partialorder %v3897_v5, 0.0 }
 0x2b6   :  { %v3899_v19 = vpop.xlane.xlu1 %1861  ;;  %1141 = vperm.xlu0 %3060, %v1082_v36   ;;  %v1073_v24 = vmax.f32 %v1057_v0, 0.0  ;;  %v989_v57 = vsel %vm987_vm9, %v988_v41, %v986_v17 }
 0x2b7   :  { %4668 = vst [vmem:[#allocation40_spill] sm:$0xff] %v3899_v19  ;;  %1108 = vperm.xlu1 %3061, %v1071_v7   ;;  %v1058_v7 = vsub.f32 1.0, %v982_v27 }
 0x2b9   :  { %v3085_v11 = vpop.eup %3084  ;;  %v1896_v41 = vpop.permute.xlu0 %1895 }
 0x2ba   :  { %v3908_v18 = vpop.xlane.xlu1 %1865  ;;  %v3087_v6 = vpop.eup %3086  ;;  %v1047_v58 = vmul.f32 %v3085_v11, %v3870_v60  ;;  %1507 = vperm.xlu0 %3060, %v1456_v35   ;;  %v995_v11 = vand.u32 2147483648, %v3841_v40 }
 0x2bb   :  { %4669 = vst [vmem:[#allocation41_spill] sm:$0xff] %v3908_v18  ;;  %1111 = vperm.xlu1 %3061, %v1072_v45   ;;  %v993_v45 = vsel %vm992_vm10, %v3841_v40, %v991_v29  ;;  %v1005_v27 = vmul.f32 %v3087_v6, %v3863_v14  ;;  %v3089_v0 = vpop.eup %3088 }
 0x2bc   :  { %v1049_v36 = vsel %vm1048_vm7, %v3870_v60, %v1047_v58  ;;  %v1074_v60 = vmax.f32 %v1058_v7, 0.0  ;;  %v1059_v58 = vsub.f32 1.0, %v989_v57  ;;  %v1012_v29 = vmul.f32 %v3089_v0, %v3883_v33  ;;  %v3091_v6 = vpop.eup %3090 }
 0x2bd   :  { %v1052_v38 = vsel %vm1050_vm8, %v1051_v34, %v1049_v36  ;;  %v996_v34 = vsel %vm994_vm11, %v995_v11, %v993_v45  ;;  %v1007_v17 = vsel %vm1006_vm12, %v3863_v14, %v1005_v27  ;;  %v1458_v7 = vmul.f32 %v3617_v20, %v3736_v59 }
 0x2be   :  { %v3922_v3 = vpop.xlane.xlu1 %1869  ;;  %v1068_v54 = vsub.f32 1.0, %v1052_v38  ;;  %v1075_v36 = vmax.f32 %v1059_v58, 0.0  ;;  %v1060_v40 = vsub.f32 1.0, %v996_v34  ;;  %v1957_v38 = vsub.f32 %v3655_v46, %v1880_v49 }
 0x2bf   :  { %4670 = vst [vmem:[#allocation42_spill] sm:$0xff] %v3922_v3  ;;  %1114 = vperm.xlu1 %3061, %v1073_v24   ;;  %v1009_v24 = vand.u32 2147483648, %v3863_v14  ;;  %v1014_v45 = vsel %vm1013_vm14, %v3883_v33, %v1012_v29  ;;  %v1026_v27 = vmul.f32 %v3091_v6, %v3897_v5  ;;  %v1016_v0 = vand.u32 2147483648, %v3883_v33  ;;  %v1904_v14 = vpop.permute.xlu0 %1903 }
 0x2c0   :  { %v1084_v35 = vmax.f32 %v1068_v54, 0.0  ;;  %v1460_v20 = vmul.f32 %v3621_v31, %v3756_v4  ;;  %v1076_v59 = vmax.f32 %v1060_v40, 0.0  ;;  %v3946_v46 = vmul.f32 0.14285715, %v1957_v38 }
 0x2c1   :  { %v1010_v57 = vsel %vm1008_vm13, %v1009_v24, %v1007_v17  ;;  %v1030_v58 = vand.u32 2147483648, %v3897_v5  ;;  %v1462_v31 = vmul.f32 %v3625_v50, %v3778_v2  ;;  %v1632_v24 = vmul.f32 %v3697_v42, %v3697_v42 }
 0x2c2   :  { %v3929_v12 = vpop.permute.xlu1 %1883  ;;  %1147 = vperm.xlu0 %3060, %v1084_v35   ;;  %v1062_v11 = vsub.f32 1.0, %v1010_v57  ;;  %4671 = vst [vmem:[#allocation43_spill] sm:$0xff] %v3946_v46  ;;  %v1017_v35 = vsel %vm1015_vm15, %v1016_v0, %v1014_v45  ;;  %v1989_v33 = vmax.f32 %v3946_v46, 0.0  ;;  %v1637_v45 = vmul.f32 %v3767_v16, %v3767_v16 }
 0x2c3   :  { %1117 = vperm.xlu1 %3061, %v1074_v60   ;;  %v1028_v60 = vsel %vm1027_vm0, %v3897_v5, %v1026_v27  ;;  %v1063_v34 = vsub.f32 1.0, %v1017_v35  ;;  %v3959_v6 = vpop.permute.xlu0 %1911  ;;  %v1963_v5 = vsub.f32 %v3699_v32, %v1904_v14  ;;  %v1447_v32 = vmul.f32 %v3569_v37, %v3650_v55 }
 0x2c4   :  { %v1078_v4 = vmax.f32 %v1062_v11, 0.0  ;;  %v1031_v29 = vsel %vm1029_vm2, %v1030_v58, %v1028_v60  ;;  %4673 = vst [vmem:[#allocation45_spill] sm:$0xff] %v3959_v6  ;;  %v2005_v2 = vadd.f32 0.0001, %v1989_v33  ;;  %v1451_v11 = vmul.f32 %v3593_v44, %v3677_v52  ;;  %v4677_v58 = vld [vmem:[#allocation21_spill] sm:$0xff] }
 0x2c5   :  { %v1065_v50 = vsub.f32 1.0, %v1031_v29  ;;  %v3970_v57 = vmul.f32 0.14285715, %v1963_v5  ;;  %v1641_v14 = vmul.f32 %v3829_v39, %v3829_v39  ;;  %v1643_v35 = vmul.f32 %v3742_v61, %v3742_v61 }
 0x2c6   :  { %1513 = vperm.xlu0 %3060, %v1458_v7   ;;  %v1888_v54 = vpop.permute.xlu1 %1887  ;;  %v1079_v7 = vmax.f32 %v1063_v34, 0.0  ;;  %3092 = vrsqrt.f32 %v2005_v2  ;;  %vm2023_vm3 = vcmp.eq.f32.partialorder %v2005_v2, inf  ;;  %v2026_v60 = vand.u32 2147483648, %v2005_v2 }
 0x2c7   :  { %1120 = vperm.xlu1 %3061, %v1075_v36   ;;  %v1959_v49 = vsub.f32 %v3671_v30, %v1888_v54  ;;  %v1961_v30 = vsub.f32 %v3685_v47, %v1896_v41  ;;  %v1635_v47 = vmul.f32 %v3733_v10, %v3733_v10  ;;  %v1081_v41 = vmax.f32 %v1065_v50, 0.0  ;;  %4675 = vst [vmem:[#allocation47_spill] sm:$0xff] %v3970_v57  ;;  %v3972_v42 = vpop.permute.xlu0 %1919 }
 0x2c8   :  { %4676 = vst [vmem:[#allocation48_spill] sm:$0xff] %v3972_v42  ;;  %v1995_v10 = vmax.f32 %v3970_v57, 0.0  ;;  %vm2025_vm4 = vcmp.eq.f32.partialorder %v2005_v2, 0.0 }
 0x2c9   :  { %v3957_v17 = vmul.f32 0.14285715, %v1959_v49  ;;  %v3963_v36 = vmul.f32 0.14285715, %v1961_v30  ;;  %v1453_v49 = vmul.f32 %v3602_v26, %v3694_v1 }
 0x2ca   :  { %1519 = vperm.xlu0 %3060, %v1460_v20   ;;  %v1449_v20 = vmul.f32 %v3576_v51, %v3658_v9  ;;  %v3988_v37 = vadd.f32 0.0001, %v1995_v10  ;;  %v1892_v1 = vpop.permute.xlu1 %1891 }
 0x2cb   :  { %1123 = vperm.xlu1 %3061, %v1076_v59   ;;  %4672 = vst [vmem:[#allocation44_spill] sm:$0xff] %v3957_v17  ;;  %4674 = vst [vmem:[#allocation46_spill] sm:$0xff] %v3963_v36  ;;  %v1991_v40 = vmax.f32 %v3957_v17, 0.0  ;;  %v1993_v38 = vmax.f32 %v3963_v36, 0.0  ;;  %v3981_v0 = vpop.permute.xlu0 %1927  ;;  %v1639_v59 = vmul.f32 %v3799_v43, %v3799_v43  ;;  %v4712_v17 = vld [vmem:[#allocation16_spill] sm:$0xff] }
 0x2cc   :  { %vm2065_vm9 = vcmp.eq.f32.partialorder %v3988_v37, inf  ;;  %vm2067_vm10 = vcmp.eq.f32.partialorder %v3988_v37, 0.0 }
 0x2cd   :  { %v2007_v54 = vadd.f32 0.0001, %v1991_v40  ;;  %v3978_v27 = vadd.f32 0.0001, %v1993_v38 }
 0x2ce   :  { %1525 = vperm.xlu0 %3060, %v1462_v31   ;;  %v1455_v31 = vmul.f32 %v4677_v58, %v3725_v13  ;;  %v1647_v13 = vmul.f32 %v3850_v8, %v3850_v8  ;;  %v4681_v8 = vld [vmem:[#allocation23_spill] sm:$0xff] }
 0x2cf   :  { %1129 = vperm.xlu1 %3061, %v1078_v4   ;;  %3094 = vrsqrt.f32 %v2007_v54  ;;  %v3990_v16 = vpop.permute.xlu0 %1935  ;;  %v1645_v4 = vmul.f32 %v3789_v23, %v3789_v23  ;;  %vm2037_vm5 = vcmp.eq.f32.partialorder %v2007_v54, inf  ;;  %v2040_v29 = vand.u32 2147483648, %v2007_v54 }
 0x2d0   :  { %3096 = vrsqrt.f32 %v3978_v27  ;;  %v3093_v55 = vpop.eup %3092  ;;  %vm2039_vm6 = vcmp.eq.f32.partialorder %v2007_v54, 0.0  ;;  %vm2051_vm7 = vcmp.eq.f32.partialorder %v3978_v27, inf  ;;  %vm2053_vm8 = vcmp.eq.f32.partialorder %v3978_v27, 0.0 }
 0x2d1   :  { %3098 = vrsqrt.f32 %v3988_v37  ;;  %v2022_v51 = vmul.f32 %v3093_v55, %v2005_v2 }
 0x2d2   :  { %1665 = vperm.xlu0 %3060, %v1632_v24   ;;  %v4678_v24 = vld [vmem:[#allocation35_spill] sm:$0xff] }
 0x2d3   :  { %1132 = vperm.xlu1 %3061, %v1079_v7   ;;  %v2024_v44 = vsel %vm2023_vm3, %v2005_v2, %v2022_v51  ;;  %v4679_v7 = vld [vmem:[#allocation22_spill] sm:$0xff]  ;;  %v4680_v2 = vld [vmem:[#allocation27_spill] sm:$0xff]  ;;  %v2068_v51 = vand.u32 2147483648, %v3988_v37 }
 0x2d4   :  { %v2027_v26 = vsel %vm2025_vm4, %v2026_v60, %v2024_v44  ;;  %v1457_v50 = vmul.f32 %v4679_v7, %v4678_v24  ;;  %v1958_v5 = vsub.f32 %v4680_v2, %v3929_v12  ;;  %v4690_v7 = vld [vmem:[#allocation33_spill] sm:$0xff] }
 0x2d5   :  { %v2133_v23 = vsub.f32 1.0, %v2027_v26 }
 0x2d6   :  { %1674 = vperm.xlu0 %3060, %v1635_v47   ;;  %v4025_v12 = vmul.f32 0.14285715, %v1958_v5 }
 0x2d7   :  { %1138 = vperm.xlu1 %3061, %v1081_v41   ;;  %v2149_v10 = vmax.f32 %v2133_v23, 0.0 }
 0x2d8   :  { %4682 = vst [vmem:[#allocation21_spill] sm:$0xff] %v4025_v12 }
 0x2d9   :  { %v3095_v9 = vpop.eup %3094 }
 0x2da   :  { %1680 = vperm.xlu0 %3060, %v1637_v45   ;;  %v2036_v52 = vmul.f32 %v3095_v9, %v2007_v54  ;;  %v3097_v39 = vpop.eup %3096  ;;  %v1459_v45 = vmul.f32 %v4681_v8, %v3813_v28  ;;  %v4684_v28 = vld [vmem:[#allocation24_spill] sm:$0xff] }
 0x2db   :  { %1480 = vperm.xlu1 %3061, %v1447_v32   ;;  %v2050_v33 = vmul.f32 %v3097_v39, %v3978_v27  ;;  %v3099_v30 = vpop.eup %3098  ;;  %v2054_v32 = vand.u32 2147483648, %v3978_v27  ;;  %v1461_v9 = vmul.f32 %v4684_v28, %v3872_v56 }
 0x2dc   :  { %v2038_v61 = vsel %vm2037_vm5, %v2007_v54, %v2036_v52  ;;  %v2064_v41 = vmul.f32 %v3099_v30, %v3988_v37  ;;  %v1900_v54 = vpop.permute.xlu1 %1899  ;;  %v4686_v52 = vld [vmem:[#allocation29_spill] sm:$0xff]  ;;  %v4689_v30 = vld [vmem:[#allocation30_spill] sm:$0xff] }
 0x2dd   :  { %v2041_v40 = vsel %vm2039_vm6, %v2040_v29, %v2038_v61  ;;  %v2052_v47 = vsel %vm2051_vm7, %v3978_v27, %v2050_v33  ;;  %v1990_v27 = vmax.f32 %v4025_v12, 0.0  ;;  %v1962_v39 = vsub.f32 %v4686_v52, %v1900_v54 }
 0x2de   :  { %1686 = vperm.xlu0 %3060, %v1639_v59   ;;  %v4683_v59 = vld [vmem:[#allocation28_spill] sm:$0xff]  ;;  %vm1158_vm6 = vcmask 130112   ;;  %vm1165_vm7 = vcmask 195712  }
 0x2df   :  { %1486 = vperm.xlu1 %3061, %v1449_v20   ;;  %v3997_v43 = vpop.xlane.xlu0 %2385  ;;  %v2135_v20 = vsub.f32 1.0, %v2041_v40  ;;  %v1960_v55 = vsub.f32 %v4683_v59, %v1892_v1  ;;  %v2006_v61 = vadd.f32 0.0001, %v1990_v27  ;;  %v4043_v33 = vmul.f32 0.14285715, %v1962_v39 }
 0x2e1   :  { %v4035_v44 = vmul.f32 0.14285715, %v1960_v55  ;;  %4688 = vst [vmem:[#allocation22_spill] sm:$0xff] %v4043_v33  ;;  %3100 = vrsqrt.f32 %v2006_v61  ;;  %v1994_v5 = vmax.f32 %v4043_v33, 0.0  ;;  %vm2030_vm11 = vcmp.eq.f32.partialorder %v2006_v61, inf }
 0x2e2   :  { %1692 = vperm.xlu0 %3060, %v1641_v14   ;;  %v2066_v14 = vsel %vm2065_vm9, %v3988_v37, %v2064_v41  ;;  %vm2032_vm12 = vcmp.eq.f32.partialorder %v2006_v61, 0.0  ;;  %vm1179_vm9 = vcmask 326912  }
 0x2e3   :  { %1492 = vperm.xlu1 %3061, %v1451_v11   ;;  %v4007_v34 = vpop.xlane.xlu0 %2389  ;;  %v2055_v11 = vsel %vm2053_vm8, %v2054_v32, %v2052_v47  ;;  %4685 = vst [vmem:[#allocation35_spill] sm:$0xff] %v4035_v44  ;;  %v2069_v58 = vsel %vm2067_vm10, %v2068_v51, %v2066_v14  ;;  %v1992_v37 = vmax.f32 %v4035_v44, 0.0  ;;  %v4693_v47 = vld [vmem:[#allocation34_spill] sm:$0xff]  ;;  %v2010_v32 = vadd.f32 0.0001, %v1994_v5  ;;  %v4698_v14 = vld [vmem:[#allocation32_spill] sm:$0xff] }
 0x2e4   :  { %v2139_v1 = vsub.f32 1.0, %v2069_v58  ;;  %v1636_v41 = vmul.f32 %v4693_v47, %v4693_v47  ;;  %v1640_v51 = vmul.f32 %v4698_v14, %v4698_v14  ;;  %vm1172_vm8 = vcmask 261312  }
 0x2e5   :  { %v2008_v2 = vadd.f32 0.0001, %v1992_v37  ;;  %vm2058_vm15 = vcmp.eq.f32.partialorder %v2010_v32, inf  ;;  %vm2060_vm0 = vcmp.eq.f32.partialorder %v2010_v32, 0.0  ;;  %vm1186_vm10 = vcmask 392512  }
 0x2e6   :  { %1698 = vperm.xlu0 %3060, %v1643_v35   ;;  %v2137_v35 = vsub.f32 1.0, %v2055_v11  ;;  %v2155_v23 = vmax.f32 %v2139_v1, 0.0 }
 0x2e7   :  { %1498 = vperm.xlu1 %3061, %v1453_v49   ;;  %v4019_v38 = vpop.xlane.xlu0 %2391  ;;  %v2151_v49 = vmax.f32 %v2135_v20, 0.0  ;;  %3102 = vrsqrt.f32 %v2008_v2  ;;  %v1638_v20 = vmul.f32 %v3785_v22, %v3785_v22  ;;  %vm2044_vm13 = vcmp.eq.f32.partialorder %v2008_v2, inf }
 0x2e8   :  { %v2153_v56 = vmax.f32 %v2137_v35, 0.0  ;;  %3104 = vrsqrt.f32 %v2010_v32  ;;  %v4700_v35 = vld [vmem:[#allocation19_spill] sm:$0xff]  ;;  %vm2046_vm14 = vcmp.eq.f32.partialorder %v2008_v2, 0.0 }
 0x2e9   :  { %v890_v27 = vsub.f32 %v3852_v48, %v4700_v35 }
 0x2ea   :  { %1704 = vperm.xlu0 %3060, %v1645_v4   ;;  %v4687_v4 = vld [vmem:[#allocation31_spill] sm:$0xff] }
 0x2eb   :  { %1504 = vperm.xlu1 %3061, %v1455_v31   ;;  %v4038_v60 = vpop.xlane.xlu0 %2393  ;;  %v1908_v31 = vpop.permute.xlu1 %1907  ;;  %v1633_v26 = vmul.f32 %v4687_v4, %v4687_v4  ;;  %v907_v1 = vmul.f32 0.14285715, %v890_v27 }
 0x2ec   :  { %v1964_v29 = vsub.f32 %v4689_v30, %v1908_v31  ;;  %v3101_v55 = vpop.eup %3100 }
 0x2ed   :  { %v2029_v22 = vmul.f32 %v3101_v55, %v2006_v61 }
 0x2ee   :  { %1710 = vperm.xlu0 %3060, %v1647_v13   ;;  %v4053_v40 = vmul.f32 0.14285715, %v1964_v29 }
 0x2ef   :  { %1510 = vperm.xlu1 %3061, %v1457_v50   ;;  %v4046_v24 = vpop.xlane.xlu0 %2397  ;;  %v1634_v50 = vmul.f32 %v4690_v7, %v4690_v7  ;;  %v4050_v13 = vpop.permute.xlu1 %1915  ;;  %v2031_v58 = vsel %vm2030_vm11, %v2006_v61, %v2029_v22  ;;  %vm1193_vm11 = vcmask 458112  }
 0x2f0   :  { %4691 = vst [vmem:[#allocation27_spill] sm:$0xff] %v4050_v13  ;;  %4692 = vst [vmem:[#allocation23_spill] sm:$0xff] %v4053_v40  ;;  %v1996_v8 = vmax.f32 %v4053_v40, 0.0  ;;  %v4711_v40 = vld [vmem:[#allocation17_spill] sm:$0xff] }
 0x2f1   :  { %v1153_v57 = vadd.s32 4294967288, %v4711_v40  ;;  %v1160_v36 = vadd.s32 4294967280, %v4711_v40  ;;  %v1167_v3 = vadd.s32 4294967272, %v4711_v40  ;;  %v1174_v18 = vadd.s32 4294967264, %v4711_v40 }
 0x2f2   :  { %2182 = vperm.xlu0 %3060, %v2149_v10   ;;  %v4696_v10 = vld [vmem:[#allocation26_spill] sm:$0xff]  ;;  %v4065_v59 = vadd.f32 0.0001, %v1996_v8  ;;  %v1181_v33 = vadd.s32 4294967256, %v4711_v40 }
 0x2f3   :  { %1516 = vperm.xlu1 %3061, %v1459_v45   ;;  %v4058_v45 = vpop.xlane.xlu0 %2401  ;;  %v4060_v54 = vpop.permute.xlu1 %1923  ;;  %v4175_v46 = vsub.s32 %v1153_v57, %v4712_v17 }
 0x2f4   :  { %4694 = vst [vmem:[#allocation28_spill] sm:$0xff] %v4058_v45  ;;  %4695 = vst [vmem:[#allocation24_spill] sm:$0xff] %v4060_v54  ;;  %3106 = vrsqrt.f32 %v4065_v59  ;;  %vm2072_vm2 = vcmp.eq.f32.partialorder %v4065_v59, inf  ;;  %vm2074_vm3 = vcmp.eq.f32.partialorder %v4065_v59, 0.0  ;;  %v4207_v42 = vsub.s32 %v1181_v33, %v4712_v17 }
 0x2f6   :  { %2188 = vperm.xlu0 %3060, %v2151_v49   ;;  %v1642_v49 = vmul.f32 %v3846_v21, %v3846_v21 }
 0x2f7   :  { %1522 = vperm.xlu1 %3061, %v1461_v9   ;;  %v4068_v11 = vpop.xlane.xlu0 %2405  ;;  %v4072_v28 = vpop.permute.xlu1 %1931 }
 0x2f8   :  { %4697 = vst [vmem:[#allocation29_spill] sm:$0xff] %v4068_v11  ;;  %4699 = vst [vmem:[#allocation31_spill] sm:$0xff] %v4072_v28  ;;  %v3103_v9 = vpop.eup %3102 }
 0x2f9   :  { %v2043_v31 = vmul.f32 %v3103_v9, %v2008_v2  ;;  %v3105_v4 = vpop.eup %3104 }
 0x2fa   :  { %2194 = vperm.xlu0 %3060, %v2153_v56   ;;  %v1644_v56 = vmul.f32 %v3868_v62, %v3868_v62  ;;  %v2057_v30 = vmul.f32 %v3105_v4, %v2010_v32 }
 0x2fb   :  { %1668 = vperm.xlu1 %3061, %v1633_v26   ;;  %v4080_v52 = vpop.xlane.xlu0 %2409  ;;  %v4082_v39 = vpop.permute.xlu1 %1939  ;;  %v2033_v26 = vand.u32 2147483648, %v2006_v61  ;;  %v2045_v37 = vsel %vm2044_vm13, %v2008_v2, %v2043_v31  ;;  %vm1207_vm13 = vcmask 589312  }
 0x2fc   :  { %4701 = vst [vmem:[#allocation30_spill] sm:$0xff] %v4080_v52  ;;  %4702 = vst [vmem:[#allocation33_spill] sm:$0xff] %v4082_v39  ;;  %v2059_v61 = vsel %vm2058_vm15, %v2010_v32, %v2057_v30  ;;  %v1188_v52 = vadd.s32 4294967248, %v4711_v40  ;;  %vm1221_vm15 = vcmask 720512  }
 0x2fd   :  { %v2034_v21 = vsel %vm2032_vm12, %v2033_v26, %v2031_v58  ;;  %vm1200_vm12 = vcmask 523712  }
 0x2fe   :  { %2200 = vperm.xlu0 %3060, %v2155_v23   ;;  %v3107_v29 = vpop.eup %3106  ;;  %v1646_v23 = vmul.f32 %v907_v1, %v907_v1  ;;  %v2134_v5 = vsub.f32 1.0, %v2034_v21 }
 0x2ff   :  { %1671 = vperm.xlu1 %3061, %v1634_v50   ;;  %v4090_v7 = vpop.xlane.xlu0 %2413  ;;  %v2047_v50 = vand.u32 2147483648, %v2008_v2 }
 0x300   :  { %4703 = vst [vmem:[#allocation34_spill] sm:$0xff] %v4090_v7  ;;  %v2150_v55 = vmax.f32 %v2134_v5, 0.0  ;;  %v4192_v7 = vsub.s32 %v1167_v3, %v4712_v17 }
 0x301   :  { %v2048_v47 = vsel %vm2046_vm14, %v2047_v50, %v2045_v37  ;;  %vm1214_vm14 = vcmask 654912  }
 0x302   :  { %2418 = vbcast.lane.b32.xlu0 %v4696_v10, 256  ;;  %v2136_v14 = vsub.f32 1.0, %v2048_v47 }
 0x303   :  { %1677 = vperm.xlu1 %3061, %v1636_v41   ;;  %v2071_v41 = vmul.f32 %v3107_v29, %v4065_v59 }
 0x304   :  { %v2152_v35 = vmax.f32 %v2136_v14, 0.0 }
 0x305   :  { %v2073_v9 = vsel %vm2072_vm2, %v4065_v59, %v2071_v41  ;;  %vm4639_vm2 = vcmask 851712  }
 0x306   :  { %2434 = vbcast.lane.b32.xlu0 %v4696_v10, 288 }
 0x307   :  { %1683 = vperm.xlu1 %3061, %v1638_v20   ;;  %v4096_v8 = vpop.permute.xlu0 %1483  ;;  %v2061_v20 = vand.u32 2147483648, %v2010_v32 }
 0x308   :  { %v1534_v57 = vrot.slane %v4096_v8, %v4175_v46 }
 0x309   :  { %v2062_v22 = vsel %vm2060_vm0, %v2061_v20, %v2059_v61  ;;  %vm4640_vm0 = vcmask 786112  }
 0x30a   :  { %2442 = vbcast.lane.b32.xlu0 %v4696_v10, 304  ;;  %v2138_v27 = vsub.f32 1.0, %v2062_v22 }
 0x30b   :  { %1689 = vperm.xlu1 %3061, %v1640_v51   ;;  %v923_v51 = vmax.f32 %v907_v1, 0.0  ;;  %v4105_v31 = vpop.permute.xlu0 %1489 }
 0x30c   :  { %v2154_v26 = vmax.f32 %v2138_v27, 0.0  ;;  %v1544_v3 = vrot.slane %v4105_v31, %v4192_v7 }
 0x30d   :  { %v939_v58 = vadd.f32 0.0001, %v923_v51 }
 0x30e   :  { %2450 = vbcast.lane.b32.xlu0 %v4696_v10, 320 }
 0x30f   :  { %1695 = vperm.xlu1 %3061, %v1642_v49   ;;  %v2075_v49 = vand.u32 2147483648, %v4065_v59  ;;  %3108 = vrsqrt.f32 %v939_v58  ;;  %vm1041_vm4 = vcmp.eq.f32.partialorder %v939_v58, inf  ;;  %vm1043_vm5 = vcmp.eq.f32.partialorder %v939_v58, 0.0 }
 0x311   :  { %v2076_v32 = vsel %vm2074_vm3, %v2075_v49, %v2073_v9  ;;  %vm1242_vm3 = vcmask 917312  }
 0x312   :  { %2458 = vbcast.lane.b32.xlu0 %v4696_v10, 336 }
 0x313   :  { %1701 = vperm.xlu1 %3061, %v1644_v56   ;;  %v4087_v48 = vpop.xlane.xlu1 %2387  ;;  %v2140_v56 = vsub.f32 1.0, %v2076_v32 }
 0x315   :  { %v2156_v37 = vmax.f32 %v2140_v56, 0.0 }
 0x316   :  { %2466 = vbcast.lane.b32.xlu0 %v4696_v10, 352 }
 0x317   :  { %1707 = vperm.xlu1 %3061, %v1646_v23   ;;  %v4092_v62 = vpop.xlane.xlu1 %2395 }
 0x318   :  { %4704 = vst [vmem:[#allocation26_spill] sm:$0xff] %v4092_v62 }
 0x319   :  { %v3109_v50 = vpop.eup %3108 }
 0x31a   :  { %2474 = vbcast.lane.b32.xlu0 %v4696_v10, 368  ;;  %v1040_v47 = vmul.f32 %v3109_v50, %v939_v58 }
 0x31b   :  { %2185 = vperm.xlu1 %3061, %v2150_v55   ;;  %v4099_v2 = vpop.xlane.xlu1 %2399  ;;  %v1044_v55 = vand.u32 2147483648, %v939_v58 }
 0x31c   :  { %v1042_v41 = vsel %vm1041_vm4, %v939_v58, %v1040_v47  ;;  %vm4643_vm4 = vcmask 982912  }
 0x31d   :  { %v1045_v14 = vsel %vm1043_vm5, %v1044_v55, %v1042_v41  ;;  %vm4642_vm5 = vcmask 1048512  }
 0x31e   :  { %v1067_v9 = vsub.f32 1.0, %v1045_v14 }
 0x31f   :  { %2191 = vperm.xlu1 %3061, %v2152_v35   ;;  %v4107_v4 = vpop.xlane.xlu1 %2403 }
 0x320   :  { %4705 = vst [vmem:[#allocation32_spill] sm:$0xff] %v4107_v4  ;;  %v1083_v35 = vmax.f32 %v1067_v9, 0.0 }
 0x321   :  { %v4109_v1 = vpop.permute.xlu0 %1126 }
 0x323   :  { %2197 = vperm.xlu1 %3061, %v2154_v26   ;;  %v4111_v21 = vpop.xlane.xlu1 %2407 }
 0x324   :  { %4706 = vst [vmem:[#allocation19_spill] sm:$0xff] %v4111_v21 }
 0x325   :  { %v4115_v59 = vpop.permute.xlu0 %1495 }
 0x326   :  { %v1554_v33 = vrot.slane %v4115_v59, %v4207_v42 }
 0x327   :  { %2203 = vperm.xlu1 %3061, %v2156_v37   ;;  %v4113_v30 = vpop.xlane.xlu1 %2411 }
 0x328   :  { %4707 = vst [vmem:[#allocation49_spill] sm:$0xff] %v4113_v30 }
 0x329   :  { %v4120_v23 = vpop.permute.xlu0 %1135 }
 0x32b   :  { %2422 = vbcast.lane.b32.xlu1 %v4696_v10, 264  ;;  %v4118_v29 = vpop.xlane.xlu1 %2415 }
 0x32c   :  { %4708 = vst [vmem:[#allocation50_spill] sm:$0xff] %v4118_v29  ;;  %v4184_v29 = vsub.s32 %v1160_v36, %v4712_v17 }
 0x32d   :  { %v4128_v20 = vpop.permute.xlu0 %1501 }
 0x32f   :  { %2426 = vbcast.lane.b32.xlu1 %v4696_v10, 272  ;;  %v4123_v5 = vpop.permute.xlu1 %1102 }
 0x333   :  { %2430 = vbcast.lane.b32.xlu1 %v4696_v10, 280  ;;  %v4126_v61 = vpop.permute.xlu1 %1105 }
 0x335   :  { %v4133_v22 = vpop.permute.xlu0 %1141 }
 0x336   :  { %4709 = vst [vmem:[#allocation51_spill] sm:$0xff] %v4133_v22 }
 0x337   :  { %2438 = vbcast.lane.b32.xlu1 %v4696_v10, 296  ;;  %v4131_v51 = vpop.permute.xlu1 %1108 }
 0x339   :  { %v4138_v27 = vpop.permute.xlu0 %1507 }
 0x33b   :  { %2446 = vbcast.lane.b32.xlu1 %v4696_v10, 312  ;;  %v4136_v49 = vpop.permute.xlu1 %1111 }
 0x33f   :  { %1144 = vperm.xlu1 %3061, %v1083_v35   ;;  %v4140_v32 = vpop.permute.xlu1 %1114 }
 0x341   :  { %v4142_v26 = vpop.permute.xlu0 %1147 }
 0x342   :  { %4710 = vst [vmem:[#allocation52_spill] sm:$0xff] %v4142_v26 }
 0x343   :  { %v4144_v58 = vpop.permute.xlu1 %1117  ;;  %2454 = vbcast.lane.b32.xlu1 %v4696_v10, 328 }
 0x345   :  { %v4147_v56 = vpop.permute.xlu0 %1513 }
 0x347   :  { %v4149_v37 = vpop.permute.xlu1 %1120  ;;  %2462 = vbcast.lane.b32.xlu1 %v4696_v10, 344 }
 0x349   :  { %v4152_v50 = vpop.permute.xlu0 %1519 }
 0x34b   :  { %v4154_v47 = vpop.permute.xlu1 %1123  ;;  %2470 = vbcast.lane.b32.xlu1 %v4696_v10, 360 }
 0x34d   :  { %v4157_v41 = vpop.permute.xlu0 %1525 }
 0x34f   :  { %v4159_v55 = vpop.permute.xlu1 %1129  ;;  %2478 = vbcast.lane.b32.xlu1 %v4696_v10, 376  ;;  %v4180_v10 = vsub.s32 %v4711_v40, %v4712_v17 }
 0x351   :  { %v4162_v14 = vpop.permute.xlu0 %1665 }
 0x353   :  { %v4164_v9 = vpop.permute.xlu1 %1132 }
 0x355   :  { %v4166_v35 = vpop.permute.xlu0 %1674 }
 0x357   :  { %v4169_v30 = vpop.permute.xlu1 %1138 }
 0x359   :  { %v4172_v21 = vpop.permute.xlu0 %1680 }
 0x35b   :  { %v1481_v39 = vpop.permute.xlu1 %1480 }
 0x35c   :  { %v1530_v62 = vrot.slane %v1481_v39, %v4180_v10  ;;  %v4198_v39 = vsub.s32 %v1174_v18, %v4712_v17 }
 0x35d   :  { %v4187_v28 = vpop.permute.xlu0 %1686 }
 0x35e   :  { %v1535_v36 = vsel %vm1158_vm6, %v1534_v57, %v1530_v62  ;;  %v1202_v57 = vadd.s32 4294967232, %v4711_v40 }
 0x35f   :  { %v1487_v19 = vpop.permute.xlu1 %1486 }
 0x360   :  { %v1539_v54 = vrot.slane %v1487_v19, %v4184_v29  ;;  %v1195_v19 = vadd.s32 4294967240, %v4711_v40 }
 0x361   :  { %v4202_v8 = vpop.permute.xlu0 %1692 }
 0x362   :  { %v1540_v44 = vsel %vm1165_vm7, %v1539_v54, %v1535_v36  ;;  %v4214_v54 = vsub.s32 %v1188_v52, %v4712_v17  ;;  %v4222_v13 = vsub.s32 %v1195_v19, %v4712_v17  ;;  %v1223_v19 = vadd.s32 4294967208, %v4711_v40 }
 0x363   :  { %v1493_v25 = vpop.permute.xlu1 %1492  ;;  %v1545_v18 = vsel %vm1172_vm8, %v1544_v3, %v1540_v44  ;;  %v4228_v3 = vsub.s32 %v1202_v57, %v4712_v17 }
 0x364   :  { %v1549_v62 = vrot.slane %v1493_v25, %v4198_v39  ;;  %v1209_v25 = vadd.s32 4294967224, %v4711_v40  ;;  %v1564_v15 = vrot.slane %v4128_v20, %v4222_v13  ;;  %v4250_v20 = vsub.s32 %v1223_v19, %v4712_v17 }
 0x365   :  { %v4217_v31 = vpop.permute.xlu0 %1698 }
 0x366   :  { %v1550_v36 = vsel %vm1179_vm9, %v1549_v62, %v1545_v18  ;;  %v1216_v62 = vadd.s32 4294967216, %v4711_v40  ;;  %v4238_v6 = vsub.s32 %v1209_v25, %v4712_v17  ;;  %v1237_v25 = vadd.s32 4294967192, %v4711_v40 }
 0x367   :  { %v1499_v11 = vpop.permute.xlu1 %1498  ;;  %v1555_v52 = vsel %vm1186_vm10, %v1554_v33, %v1550_v36 }
 0x368   :  { %v1559_v44 = vrot.slane %v1499_v11, %v4214_v54  ;;  %v4243_v33 = vsub.s32 %v1216_v62, %v4712_v17  ;;  %v1244_v62 = vadd.s32 4294967184, %v4711_v40 }
 0x369   :  { %v4232_v59 = vpop.permute.xlu0 %1704 }
 0x36a   :  { %v1560_v18 = vsel %vm1193_vm11, %v1559_v44, %v1555_v52  ;;  %v1230_v44 = vadd.s32 4294967200, %v4711_v40 }
 0x36b   :  { %v1505_v11 = vpop.permute.xlu1 %1504  ;;  %v1565_v57 = vsel %vm1200_vm12, %v1564_v15, %v1560_v18  ;;  %v1584_v18 = vrot.slane %v4147_v56, %v4250_v20 }
 0x36c   :  { %v1569_v36 = vrot.slane %v1505_v11, %v4228_v3  ;;  %v1574_v11 = vrot.slane %v4138_v27, %v4238_v6  ;;  %v4261_v19 = vsub.s32 %v1230_v44, %v4712_v17  ;;  %v4267_v27 = vsub.s32 %v1237_v25, %v4712_v17 }
 0x36d   :  { %v4247_v12 = vpop.permute.xlu0 %1710 }
 0x36e   :  { %v1570_v52 = vsel %vm1207_vm13, %v1569_v36, %v1565_v57  ;;  %v1594_v44 = vrot.slane %v4152_v50, %v4267_v27 }
 0x36f   :  { %v1511_v4 = vpop.permute.xlu1 %1510  ;;  %v1575_v36 = vsel %vm1214_vm14, %v1574_v11, %v1570_v52  ;;  %v4273_v52 = vsub.s32 %v1244_v62, %v4712_v17 }
 0x370   :  { %v1579_v15 = vrot.slane %v1511_v4, %v4243_v33  ;;  %v1251_v4 = vadd.s32 4294967176, %v4711_v40 }
 0x371   :  { %v4264_v26 = vpop.permute.xlu0 %2182 }
 0x372   :  { %v1580_v57 = vsel %vm1221_vm15, %v1579_v15, %v1575_v36  ;;  %v4279_v25 = vsub.s32 %v1251_v4, %v4712_v17  ;;  %v1715_v17 = vrot.slane %v4162_v14, %v4180_v10 }
 0x373   :  { %v1585_v45 = vsel %vm4640_vm0, %v1584_v18, %v1580_v57  ;;  %v1517_v22 = vpop.permute.xlu1 %1516 }
 0x374   :  { %v1589_v56 = vrot.slane %v1517_v22, %v4261_v19  ;;  %v1604_v62 = vrot.slane %v4157_v41, %v4279_v25  ;;  %v1729_v41 = vrot.slane %v4166_v35, %v4192_v7 }
 0x375   :  { %v2189_v15 = vpop.permute.xlu0 %2188 }
 0x376   :  { %v1590_v11 = vsel %vm4639_vm2, %v1589_v56, %v1585_v45 }
 0x377   :  { %v1523_v36 = vpop.permute.xlu1 %1522  ;;  %v1595_v18 = vsel %vm1242_vm3, %v1594_v44, %v1590_v11 }
 0x378   :  { %v1599_v22 = vrot.slane %v1523_v36, %v4273_v52 }
 0x379   :  { %v2195_v57 = vpop.permute.xlu0 %2194 }
 0x37a   :  { %v1600_v50 = vsel %vm4643_vm4, %v1599_v22, %v1595_v18 }
 0x37b   :  { %v1669_v40 = vpop.permute.xlu1 %1668  ;;  %v4287_v45 = vsel %vm4642_vm5, %v1604_v62, %v1600_v50 }
 0x37c   :  { %4713 = vst [vmem:[#allocation16_spill] sm:$0xff] %v4287_v45  ;;  %v1719_v4 = vrot.slane %v1669_v40, %v4175_v46  ;;  %v1739_v40 = vrot.slane %v4172_v21, %v4207_v42  ;;  %v1759_v21 = vrot.slane %v4202_v8, %v4238_v6  ;;  %v1779_v8 = vrot.slane %v4232_v59, %v4267_v27 }
 0x37d   :  { %v2201_v44 = vpop.permute.xlu0 %2200 }
 0x37e   :  { %v1720_v56 = vsel %vm1158_vm6, %v1719_v4, %v1715_v17 }
 0x37f   :  { %v1672_v11 = vpop.permute.xlu1 %1671 }
 0x380   :  { %v1724_v36 = vrot.slane %v1672_v11, %v4184_v29 }
 0x381   :  { %v2419_v22 = vpop.permute.xlu0 %2418 }
 0x382   :  { %v1725_v18 = vsel %vm1165_vm7, %v1724_v36, %v1720_v56  ;;  %v2496_v62 = vmul.f32 %v2419_v22, %v3997_v43  ;;  %v1749_v56 = vrot.slane %v4187_v28, %v4222_v13  ;;  %v1769_v28 = vrot.slane %v4217_v31, %v4250_v20 }
 0x383   :  { %v1730_v50 = vsel %vm1172_vm8, %v1729_v41, %v1725_v18  ;;  %v1678_v45 = vpop.permute.xlu1 %1677  ;;  %v1789_v31 = vrot.slane %v4247_v12, %v4279_v25 }
 0x384   :  { %v1734_v14 = vrot.slane %v1678_v45, %v4198_v39  ;;  %2529 = vperm.xlu0 %3060, %v2496_v62  }
 0x386   :  { %v1735_v17 = vsel %vm1179_vm9, %v1734_v14, %v1730_v50 }
 0x387   :  { %v1740_v4 = vsel %vm1186_vm10, %v1739_v40, %v1735_v17  ;;  %v1684_v11 = vpop.permute.xlu1 %1683 }
 0x388   :  { %v1744_v35 = vrot.slane %v1684_v11, %v4214_v54 }
 0x38a   :  { %v1745_v43 = vsel %vm1193_vm11, %v1744_v35, %v1740_v4 }
 0x38b   :  { %v1750_v36 = vsel %vm1200_vm12, %v1749_v56, %v1745_v43  ;;  %v1690_v41 = vpop.permute.xlu1 %1689 }
 0x38c   :  { %v1754_v45 = vrot.slane %v1690_v41, %v4228_v3 }
 0x38e   :  { %v1755_v18 = vsel %vm1207_vm13, %v1754_v45, %v1750_v36 }
 0x38f   :  { %v1760_v22 = vsel %vm1214_vm14, %v1759_v21, %v1755_v18  ;;  %v1696_v62 = vpop.permute.xlu1 %1695  ;;  %v2232_v21 = vrot.slane %v4264_v26, %v4180_v10  ;;  %v2241_v18 = vrot.slane %v2189_v15, %v4184_v29  ;;  %v2261_v15 = vrot.slane %v2201_v44, %v4214_v54 }
 0x390   :  { %v1764_v50 = vrot.slane %v1696_v62, %v4243_v33 }
 0x392   :  { %v1765_v14 = vsel %vm1221_vm15, %v1764_v50, %v1760_v22 }
 0x393   :  { %v1770_v40 = vsel %vm4640_vm0, %v1769_v28, %v1765_v14  ;;  %v1702_v17 = vpop.permute.xlu1 %1701  ;;  %v2251_v28 = vrot.slane %v2195_v57, %v4198_v39 }
 0x394   :  { %v1774_v4 = vrot.slane %v1702_v17, %v4261_v19 }
 0x396   :  { %v1775_v11 = vsel %vm4639_vm2, %v1774_v4, %v1770_v40  ;;  %v1969_v4 = vsub.f32 %v3881_v63, %v3981_v0  ;;  %v1164_v63 = vrot.slane %v4131_v51, %v4184_v29  ;;  %v2435_v51 = vpop.permute.xlu0 %2434 }
 0x397   :  { %v1708_v35 = vpop.permute.xlu1 %1707  ;;  %v1780_v56 = vsel %vm1242_vm3, %v1779_v8, %v1775_v11 }
 0x398   :  { %v1784_v43 = vrot.slane %v1708_v35, %v4273_v52  ;;  %v4348_v57 = vmul.f32 0.14285715, %v1969_v4  ;;  %v1220_v4 = vrot.slane %v4164_v9, %v4243_v33  ;;  %v1227_v9 = vrot.slane %v4120_v23, %v4250_v20  ;;  %v4716_v23 = vld [vmem:[#allocation52_spill] sm:$0xff] }
 0x39a   :  { %v1785_v36 = vsel %vm4643_vm4, %v1784_v43, %v1780_v56  ;;  %v2001_v44 = vmax.f32 %v4348_v57, 0.0 }
 0x39b   :  { %v2186_v41 = vpop.permute.xlu1 %2185  ;;  %v4329_v45 = vsel %vm4642_vm5, %v1789_v31, %v1785_v36  ;;  %v1157_v31 = vrot.slane %v4126_v61, %v4175_v46 }
 0x39c   :  { %v2236_v59 = vrot.slane %v2186_v41, %v4175_v46  ;;  %v1152_v41 = vrot.slane %v4123_v5, %v4180_v10 }
 0x39e   :  { %v2237_v22 = vsel %vm1158_vm6, %v2236_v59, %v2232_v21  ;;  %v1171_v21 = vrot.slane %v4136_v49, %v4192_v7  ;;  %v1178_v59 = vrot.slane %v4140_v32, %v4198_v39  ;;  %v1159_v61 = vsel %vm1158_vm6, %v1157_v31, %v1152_v41 }
 0x39f   :  { %v2242_v62 = vsel %vm1165_vm7, %v2241_v18, %v2237_v22  ;;  %v2192_v50 = vpop.permute.xlu1 %2191  ;;  %v1185_v18 = vrot.slane %v4144_v58, %v4207_v42  ;;  %v1971_v49 = vsub.f32 %v3904_v53, %v3990_v16  ;;  %v1213_v16 = vrot.slane %v4159_v55, %v4238_v6 }
 0x3a0   :  { %v2246_v12 = vrot.slane %v2192_v50, %v4192_v7  ;;  %v2017_v50 = vadd.f32 0.0001, %v2001_v44  ;;  %v4714_v44 = vld [vmem:[#allocation51_spill] sm:$0xff] }
 0x3a1   :  { %v1241_v41 = vrot.slane %v4714_v44, %v4267_v27 }
 0x3a2   :  { %v2247_v14 = vsel %vm1172_vm8, %v2246_v12, %v2242_v62  ;;  %v1192_v62 = vrot.slane %v4149_v37, %v4214_v54  ;;  %v1199_v12 = vrot.slane %v4154_v47, %v4222_v13  ;;  %v2500_v37 = vmul.f32 %v2435_v51, %v4038_v60  ;;  %v2443_v47 = vpop.permute.xlu0 %2442 }
 0x3a3   :  { %v2252_v40 = vsel %vm1179_vm9, %v2251_v28, %v2247_v14  ;;  %v2198_v17 = vpop.permute.xlu1 %2197  ;;  %3110 = vrsqrt.f32 %v2017_v50 }
 0x3a4   :  { %v2256_v26 = vrot.slane %v2198_v17, %v4207_v42  ;;  %v4382_v17 = vmul.f32 0.14285715, %v1971_v49 }
 0x3a6   :  { %v2257_v8 = vsel %vm1186_vm10, %v2256_v26, %v2252_v40  ;;  %v1206_v26 = vrot.slane %v4109_v1, %v4228_v3  ;;  %v1234_v1 = vrot.slane %v4169_v30, %v4261_v19  ;;  %v4715_v30 = vld [vmem:[#allocation28_spill] sm:$0xff] }
 0x3a7   :  { %v2262_v11 = vsel %vm1193_vm11, %v2261_v15, %v2257_v8  ;;  %v2204_v35 = vpop.permute.xlu1 %2203  ;;  %v2502_v15 = vmul.f32 %v2443_v47, %v4046_v24  ;;  %v2003_v8 = vmax.f32 %v4382_v17, 0.0  ;;  %v2451_v24 = vpop.permute.xlu0 %2450  ;;  %v4721_v47 = vld [vmem:[#allocation29_spill] sm:$0xff] }
 0x3a8   :  { %v2266_v56 = vrot.slane %v2204_v35, %v4222_v13 }
 0x3a9   :  { %v2019_v31 = vadd.f32 0.0001, %v2003_v8  ;;  %v4723_v8 = vld [vmem:[#allocation39_spill] sm:$0xff] }
 0x3aa   :  { %v4351_v43 = vsel %vm1200_vm12, %v2266_v56, %v2262_v11 }
 0x3ab   :  { %v2423_v36 = vpop.permute.xlu1 %2422  ;;  %3112 = vrsqrt.f32 %v2019_v31 }
 0x3ac   :  { %v2497_v0 = vmul.f32 %v2423_v36, %v4087_v48  ;;  %v1166_v48 = vsel %vm1165_vm7, %v1164_v63, %v1159_v61 }
 0x3ad   :  { %v1173_v32 = vsel %vm1172_vm8, %v1171_v21, %v1166_v48 }
 0x3ae   :  { %2532 = vperm.xlu1 %3061, %v2497_v0   ;;  %v1180_v58 = vsel %vm1179_vm9, %v1178_v59, %v1173_v32  ;;  %v3111_v0 = vpop.eup %3110  ;;  %v2504_v59 = vmul.f32 %v2451_v24, %v4715_v30  ;;  %v2110_v32 = vand.u32 2147483648, %v2017_v50 }
 0x3af   :  { %v2427_v22 = vpop.permute.xlu1 %2426  ;;  %v1187_v28 = vsel %vm1186_vm10, %v1185_v18, %v1180_v58  ;;  %v4718_v58 = vld [vmem:[#allocation21_spill] sm:$0xff] }
 0x3b0   :  { %v2498_v5 = vmul.f32 %v2427_v22, %v4007_v34  ;;  %v1194_v40 = vsel %vm1193_vm11, %v1192_v62, %v1187_v28  ;;  %v2106_v22 = vmul.f32 %v3111_v0, %v2017_v50  ;;  %v2682_v28 = vmul.f32 %v4718_v58, %v4718_v58  ;;  %v4726_v0 = vld [vmem:[#allocation35_spill] sm:$0xff]  ;;  %v4731_v58 = vld [vmem:[#allocation17_spill] sm:$0xff] }
 0x3b1   :  { %v1201_v53 = vsel %vm1200_vm12, %v1199_v12, %v1194_v40  ;;  %v4720_v40 = vld [vmem:[#allocation37_spill] sm:$0xff]  ;;  %v2684_v44 = vmul.f32 %v4726_v0, %v4726_v0 }
 0x3b2   :  { %2535 = vperm.xlu0 %3060, %v2498_v5   ;;  %v4717_v5 = vld [vmem:[#allocation32_spill] sm:$0xff] }
 0x3b3   :  { %v2431_v14 = vpop.permute.xlu1 %2430 }
 0x3b4   :  { %v2499_v34 = vmul.f32 %v2431_v14, %v4019_v38  ;;  %v1208_v38 = vsel %vm1207_vm13, %v1206_v26, %v1201_v53  ;;  %v4719_v14 = vld [vmem:[#allocation45_spill] sm:$0xff] }
 0x3b5   :  { %v1215_v11 = vsel %vm1214_vm14, %v1213_v16, %v1208_v38  ;;  %v3113_v16 = vpop.eup %3112 }
 0x3b6   :  { %2541 = vperm.xlu0 %3060, %v2500_v37   ;;  %2538 = vperm.xlu1 %3061, %v2499_v34   ;;  %v1222_v55 = vsel %vm1221_vm15, %v1220_v4, %v1215_v11  ;;  %v1965_v37 = vsub.f32 %v4720_v40, %v4719_v14  ;;  %v2459_v34 = vpop.permute.xlu0 %2458  ;;  %v1792_v14 = vsel %vm1260_vm1, %v4329_v45, 0.0 }
 0x3b7   :  { %v4391_v60 = vpop.permute.xlu1 %2438  ;;  %v1229_v36 = vsel %vm4640_vm0, %v1227_v9, %v1222_v55  ;;  %vm2109_vm0 = vcmp.eq.f32.partialorder %v2017_v50, 0.0  ;;  %v2506_v26 = vmul.f32 %v2459_v34, %v4721_v47  ;;  %v2120_v55 = vmul.f32 %v3113_v16, %v2019_v31  ;;  %v4732_v16 = vld [vmem:[#allocation22_spill] sm:$0xff] }
 0x3b8   :  { %v1236_v63 = vsel %vm4639_vm2, %v1234_v1, %v1229_v36  ;;  %vm2107_vm2 = vcmp.eq.f32.partialorder %v2017_v50, inf  ;;  %v1981_v38 = vmul.f32 0.14285715, %v1965_v37  ;;  %v2124_v9 = vand.u32 2147483648, %v2019_v31 }
 0x3b9   :  { %v1243_v18 = vsel %vm1242_vm3, %v1241_v41, %v1236_v63  ;;  %v2108_v12 = vsel %vm2107_vm2, %v2017_v50, %v2106_v22  ;;  %vm2121_vm2 = vcmp.eq.f32.partialorder %v2019_v31, inf  ;;  %v4728_v22 = vld [vmem:[#allocation16_spill] sm:$0xff]  ;;  %v2686_v47 = vmul.f32 %v4732_v16, %v4732_v16  ;;  %v4739_v16 = vld [vmem:[#allocation42_spill] sm:$0xff] }
 0x3ba   :  { %2547 = vperm.xlu0 %3060, %v2502_v15   ;;  %v2111_v53 = vsel %vm2109_vm0, %v2110_v32, %v2108_v12  ;;  %v4722_v15 = vld [vmem:[#allocation27_spill] sm:$0xff]  ;;  %v1997_v1 = vmax.f32 %v1981_v38, 0.0  ;;  %v2122_v63 = vsel %vm2121_vm2, %v2019_v31, %v2120_v55  ;;  %vm2123_vm0 = vcmp.eq.f32.partialorder %v2019_v31, 0.0  ;;  %v2467_v41 = vpop.permute.xlu0 %2466  ;;  %v4730_v32 = vld [vmem:[#allocation40_spill] sm:$0xff] }
 0x3bb   :  { %v2447_v35 = vpop.permute.xlu1 %2446  ;;  %v2145_v4 = vsub.f32 1.0, %v2111_v53  ;;  %v1966_v11 = vsub.f32 %v4723_v8, %v4722_v15  ;;  %vm4641_vm2 = vcmp.lt.s32.totalorder %v4731_v58, 32  ;;  %v4733_v8 = vld [vmem:[#allocation34_spill] sm:$0xff] }
 0x3bc   :  { %v2503_v56 = vmul.f32 %v2447_v35, %v4099_v2  ;;  %v1255_v2 = vrot.slane %v4716_v23, %v4279_v25  ;;  %v4724_v35 = vld [vmem:[#allocation48_spill] sm:$0xff]  ;;  %v2013_v30 = vadd.f32 0.0001, %v1997_v1  ;;  %v4727_v23 = vld [vmem:[#allocation30_spill] sm:$0xff]  ;;  %v4734_v1 = vld [vmem:[#allocation31_spill] sm:$0xff] }
 0x3bd   :  { %v2161_v50 = vmax.f32 %v2145_v4, 0.0  ;;  %v4424_v24 = vmul.f32 0.14285715, %v1966_v11 }
 0x3be   :  { %2550 = vperm.xlu0 %3060, %v2503_v56   ;;  %v4725_v56 = vld [vmem:[#allocation38_spill] sm:$0xff]  ;;  %3114 = vrsqrt.f32 %v2013_v30 }
 0x3bf   :  { %v1145_v21 = vpop.permute.xlu1 %1144  ;;  %v1967_v36 = vsub.f32 %v4725_v56, %v4724_v35 }
 0x3c0   :  { %v1248_v61 = vrot.slane %v1145_v21, %v4273_v52  ;;  %v2125_v21 = vsel %vm2123_vm0, %v2124_v9, %v2122_v63  ;;  %vm2079_vm0 = vcmp.eq.f32.partialorder %v2013_v30, inf }
 0x3c2   :  { %v1250_v51 = vsel %vm4643_vm4, %v1248_v61, %v1243_v18  ;;  %2553 = vperm.xlu0 %3060, %v2504_v59   ;;  %v1983_v59 = vmul.f32 0.14285715, %v1967_v36  ;;  %v1998_v61 = vmax.f32 %v4424_v24, 0.0  ;;  %v2147_v18 = vsub.f32 1.0, %v2125_v21  ;;  %v4736_v36 = vld [vmem:[#allocation50_spill] sm:$0xff] }
 0x3c3   :  { %v2455_v48 = vpop.permute.xlu1 %2454  ;;  %v1257_v62 = vsel %vm4642_vm5, %v1255_v2, %v1250_v51  ;;  %v2508_v2 = vmul.f32 %v2467_v41, %v4727_v23  ;;  %v2082_v23 = vand.u32 2147483648, %v2013_v30 }
 0x3c4   :  { %v2505_v49 = vmul.f32 %v2455_v48, %v4717_v5  ;;  %v1607_v48 = vsel %vm1260_vm1, %v4728_v22, 0.0  ;;  %v1999_v31 = vmax.f32 %v1983_v59, 0.0  ;;  %v2014_v5 = vadd.f32 0.0001, %v1998_v61 }
 0x3c5   :  { %v1259_v34 = vsel %vm4641_vm2, %v1257_v62, 0.0  ;;  %v4735_v62 = vld [vmem:[#allocation41_spill] sm:$0xff]  ;;  %v2689_v61 = vmul.f32 %v1981_v38, %v1981_v38  ;;  %vm2081_vm2 = vcmp.eq.f32.partialorder %v2013_v30, 0.0 }
 0x3c6   :  { %2556 = vperm.xlu0 %3060, %v2505_v49   ;;  %v4729_v49 = vld [vmem:[#allocation24_spill] sm:$0xff]  ;;  %v2015_v40 = vadd.f32 0.0001, %v1999_v31  ;;  %3116 = vrsqrt.f32 %v2014_v5  ;;  %v1261_v4 = vsel %vm1260_vm1, %v1259_v34, 0.0  ;;  %v1970_v9 = vsub.f32 %v4735_v62, %v4734_v1  ;;  %v4738_v34 = vld [vmem:[#allocation33_spill] sm:$0xff] }
 0x3c7   :  { %v4430_v51 = vpop.permute.xlu1 %2462  ;;  %v1968_v12 = vsub.f32 %v4730_v32, %v4729_v49  ;;  %vm2086_vm5 = vcmp.eq.f32.partialorder %v2014_v5, inf  ;;  %v2691_v31 = vmul.f32 %v1983_v59, %v1983_v59  ;;  %v2089_v49 = vand.u32 2147483648, %v2014_v5  ;;  %v4737_v32 = vld [vmem:[#allocation26_spill] sm:$0xff] }
 0x3c8   :  { %3118 = vrsqrt.f32 %v2015_v40  ;;  %v3115_v15 = vpop.eup %3114  ;;  %v4453_v0 = vmul.f32 0.14285715, %v1970_v9  ;;  %vm2088_vm4 = vcmp.eq.f32.partialorder %v2014_v5, 0.0  ;;  %v1972_v38 = vsub.f32 %v4739_v16, %v4738_v34  ;;  %v4743_v16 = vld [vmem:[#allocation46_spill] sm:$0xff] }
 0x3c9   :  { %v4439_v37 = vmul.f32 0.14285715, %v1968_v12  ;;  %v2078_v35 = vmul.f32 %v3115_v15, %v2013_v30  ;;  %v2501_v12 = vmul.f32 %v4391_v60, %v4737_v32  ;;  %v2096_v59 = vand.u32 2147483648, %v2015_v40 }
 0x3ca   :  { %2717 = vperm.xlu0 %3060, %v2682_v28   ;;  %v2163_v28 = vmax.f32 %v2147_v18, 0.0  ;;  %v1988_v60 = vmul.f32 0.14285715, %v1972_v38  ;;  %v2685_v38 = vmul.f32 %v4743_v16, %v4743_v16 }
 0x3cb   :  { %v4443_v53 = vpop.permute.xlu1 %2470  ;;  %v2000_v45 = vmax.f32 %v4439_v37, 0.0 }
 0x3cc   :  { %v2004_v62 = vmax.f32 %v1988_v60, 0.0 }
 0x3ce   :  { %2559 = vperm.xlu0 %3060, %v2506_v26   ;;  %v2475_v26 = vpop.permute.xlu0 %2474 }
 0x3cf   :  { %v2510_v11 = vmul.f32 %v2475_v26, %v4733_v8  ;;  %v2479_v55 = vpop.permute.xlu1 %2478 }
 0x3d0   :  { %v3117_v56 = vpop.eup %3116  ;;  %v2511_v63 = vmul.f32 %v2479_v55, %v4736_v36 }
 0x3d1   :  { %v2085_v41 = vmul.f32 %v3117_v56, %v2014_v5 }
 0x3d2   :  { %2218 = vperm.xlu0 %3060, %v2161_v50   ;;  %v2016_v50 = vadd.f32 0.0001, %v2000_v45  ;;  %v3119_v21 = vpop.eup %3118 }
 0x3d3   :  { %v2087_v22 = vsel %vm2086_vm5, %v2014_v5, %v2085_v41  ;;  %vm2095_vm5 = vcmp.eq.f32.partialorder %v2015_v40, 0.0 }
 0x3d4   :  { %3120 = vrsqrt.f32 %v2016_v50  ;;  %v2103_v9 = vand.u32 2147483648, %v2016_v50 }
 0x3d6   :  { %2723 = vperm.xlu0 %3060, %v2684_v44   ;;  %v2080_v44 = vsel %vm2079_vm0, %v2013_v30, %v2078_v35  ;;  %v2090_v30 = vsel %vm2088_vm4, %v2089_v49, %v2087_v22  ;;  %vm2093_vm0 = vcmp.eq.f32.partialorder %v2015_v40, inf  ;;  %vm2100_vm4 = vcmp.eq.f32.partialorder %v2016_v50, inf }
 0x3d7   :  { %v2083_v18 = vsel %vm2081_vm2, %v2082_v23, %v2080_v44  ;;  %v2142_v15 = vsub.f32 1.0, %v2090_v30  ;;  %vm2102_vm2 = vcmp.eq.f32.partialorder %v2016_v50, 0.0 }
 0x3d9   :  { %v2158_v55 = vmax.f32 %v2142_v15, 0.0 }
 0x3da   :  { %1608 = vadd.xlane.f32.xlu1 %v1607_v48  ;;  %2565 = vperm.xlu0 %3060, %v2508_v2   ;;  %v2002_v2 = vmax.f32 %v4453_v0, 0.0  ;;  %v2092_v48 = vmul.f32 %v3119_v21, %v2015_v40 }
 0x3de   :  { %1793 = vadd.xlane.f32.xlu1 %v1792_v14  ;;  %2224 = vperm.xlu0 %3060, %v2163_v28   ;;  %v2141_v28 = vsub.f32 1.0, %v2083_v18  ;;  %v2018_v14 = vadd.f32 0.0001, %v2002_v2  ;;  %v3121_v26 = vpop.eup %3120  ;;  %v4741_v2 = vld [vmem:[#allocation44_spill] sm:$0xff] }
 0x3df   :  { %v2099_v8 = vmul.f32 %v3121_v26, %v2016_v50  ;;  %v2683_v18 = vmul.f32 %v4741_v2, %v4741_v2 }
 0x3e0   :  { %v2157_v45 = vmax.f32 %v2141_v28, 0.0  ;;  %3122 = vrsqrt.f32 %v2018_v14  ;;  %v2117_v23 = vand.u32 2147483648, %v2018_v14 }
 0x3e2   :  { %1262 = vadd.xlane.f32.xlu1 %v1261_v4  ;;  %2729 = vperm.xlu0 %3060, %v2686_v47   ;;  %v2094_v47 = vsel %vm2093_vm0, %v2015_v40, %v2092_v48  ;;  %v2693_v4 = vmul.f32 %v4348_v57, %v4348_v57  ;;  %v2101_v57 = vsel %vm2100_vm4, %v2016_v50, %v2099_v8  ;;  %v2020_v40 = vadd.f32 0.0001, %v2004_v62  ;;  %v4742_v48 = vld [vmem:[#allocation19_spill] sm:$0xff] }
 0x3e3   :  { %v2097_v5 = vsel %vm2095_vm5, %v2096_v59, %v2094_v47  ;;  %v2104_v56 = vsel %vm2102_vm2, %v2103_v9, %v2101_v57  ;;  %vm2114_vm0 = vcmp.eq.f32.partialorder %v2018_v14, inf  ;;  %vm2116_vm5 = vcmp.eq.f32.partialorder %v2018_v14, 0.0 }
 0x3e4   :  { %v2143_v1 = vsub.f32 1.0, %v2097_v5  ;;  %v2144_v41 = vsub.f32 1.0, %v2104_v56  ;;  %3124 = vrsqrt.f32 %v2020_v40  ;;  %vm2128_vm4 = vcmp.eq.f32.partialorder %v2020_v40, inf }
 0x3e5   :  { %v2131_v34 = vand.u32 2147483648, %v2020_v40  ;;  %vm2130_vm2 = vcmp.eq.f32.partialorder %v2020_v40, 0.0  ;;  %v2690_v5 = vmul.f32 %v4424_v24, %v4424_v24  ;;  %v2692_v8 = vmul.f32 %v4439_v37, %v4439_v37  ;;  %v4747_v24 = vld [vmem:[#allocation18_spill] sm:$0xff] }
 0x3e6   :  { %2571 = vperm.xlu0 %3060, %v2510_v11   ;;  %v2695_v11 = vmul.f32 %v4382_v17, %v4382_v17  ;;  %v2159_v35 = vmax.f32 %v2143_v1, 0.0  ;;  %v2160_v21 = vmax.f32 %v2144_v41, 0.0 }
 0x3ea   :  { %2574 = vperm.xlu0 %3060, %v2511_v63   ;;  %v3123_v36 = vpop.eup %3122  ;;  %v4740_v63 = vld [vmem:[#allocation43_spill] sm:$0xff] }
 0x3eb   :  { %v2681_v44 = vmul.f32 %v4740_v63, %v4740_v63  ;;  %v2113_v17 = vmul.f32 %v3123_v36, %v2018_v14  ;;  %v4749_v36 = vld [vmem:[#allocation36_spill] sm:$0xff] }
 0x3ec   :  { %v1307_v63 = vrot.slane %v4749_v36, 4 }
 0x3ee   :  { %2738 = vperm.xlu0 %3060, %v2689_v61   ;;  %v2115_v61 = vsel %vm2114_vm0, %v2018_v14, %v2113_v17  ;;  %v3125_v22 = vpop.eup %3124  ;;  %v4744_v14 = vld [vmem:[#allocation49_spill] sm:$0xff]  ;;  %v1308_v17 = vadd.f32 %v1307_v63, %v4749_v36  ;;  %vm4751_vm0 = vcmask 786112  }
 0x3ef   :  { %v2118_v50 = vsel %vm2116_vm5, %v2117_v23, %v2115_v61  ;;  %v2127_v32 = vmul.f32 %v3125_v22, %v2020_v40  ;;  %v2509_v47 = vmul.f32 %v4443_v53, %v4744_v14  ;;  %v2694_v53 = vmul.f32 %v4453_v0, %v4453_v0  ;;  %vm4752_vm5 = vmmov %vm4751_vm0 }
 0x3f0   :  { %v2146_v49 = vsub.f32 1.0, %v2118_v50  ;;  %v1309_v22 = vrot.slane %v1308_v17, 2 }
 0x3f1   :  { %v2129_v28 = vsel %vm2128_vm4, %v2020_v40, %v2127_v32  ;;  %vm4753_vm4 = vcmask 851712  }
 0x3f2   :  { %2744 = vperm.xlu0 %3060, %v2691_v31   ;;  %v2507_v31 = vmul.f32 %v4430_v51, %v4742_v48  ;;  %v2132_v30 = vsel %vm2130_vm2, %v2131_v34, %v2129_v28  ;;  %v1310_v34 = vadd.f32 %v1309_v22, %v1308_v17  ;;  %vm4754_vm2 = vmmov %vm4753_vm4 }
 0x3f3   :  { %2544 = vperm.xlu1 %3061, %v2501_v12   ;;  %v2162_v12 = vmax.f32 %v2146_v49, 0.0  ;;  %v2148_v26 = vsub.f32 1.0, %v2132_v30 }
 0x3f5   :  { %v2164_v51 = vmax.f32 %v2148_v26, 0.0  ;;  %v1311_v26 = vrot.slane %v1310_v34, 1 }
 0x3f6   :  { %2750 = vperm.xlu0 %3060, %v2693_v4   ;;  %v4745_v4 = vld [vmem:[#allocation47_spill] sm:$0xff] }
 0x3f7   :  { %2206 = vperm.xlu1 %3061, %v2157_v45   ;;  %v2687_v59 = vmul.f32 %v4745_v4, %v4745_v4  ;;  %v4746_v45 = vld [vmem:[#allocation23_spill] sm:$0xff] }
 0x3f8   :  { %v2688_v15 = vmul.f32 %v4746_v45, %v4746_v45 }
 0x3fa   :  { %2756 = vperm.xlu0 %3060, %v2695_v11   ;;  %v2696_v11 = vmul.f32 %v1988_v60, %v1988_v60 }
 0x3fb   :  { %2209 = vperm.xlu1 %3061, %v2158_v55  }
 0x3ff   :  { %2212 = vperm.xlu1 %3061, %v2159_v35   ;;  %v4748_v35 = vld [vmem:[#allocation20_spill] sm:$0xff] }
 0x400   :  { %v2666_v37 = vsel %vm1260_vm1, %v4748_v35, 0.0 }
 0x403   :  { %2714 = vperm.xlu1 %3061, %v2681_v44   ;;  %v2530_v55 = vpop.permute.xlu0 %2529 }
 0x407   :  { %2215 = vperm.xlu1 %3061, %v2160_v21  }
 0x40b   :  { %2720 = vperm.xlu1 %3061, %v2683_v18  }
 0x40f   :  { %2562 = vperm.xlu1 %3061, %v2507_v31  }
 0x413   :  { %2221 = vperm.xlu1 %3061, %v2162_v12  }
 0x417   :  { %2726 = vperm.xlu1 %3061, %v2685_v38  }
 0x41b   :  { %2568 = vperm.xlu1 %3061, %v2509_v47  }
 0x41f   :  { %2227 = vperm.xlu1 %3061, %v2164_v51  }
 0x423   :  { %2732 = vperm.xlu1 %3061, %v2687_v59  }
 0x427   :  { %2735 = vperm.xlu1 %3061, %v2688_v15  }
 0x42b   :  { %2741 = vperm.xlu1 %3061, %v2690_v5  }
 0x42d   :  { %v2533_v40 = vpop.permute.xlu1 %2532 }
 0x42e   :  { %v2583_v63 = vrot.slane %v2533_v40, %v4175_v46 }
 0x42f   :  { %2747 = vperm.xlu1 %3061, %v2692_v8   ;;  %v1312_v8 = vadd.f32 %v1311_v26, %v1310_v34 }
 0x431   :  { %v2536_v1 = vpop.permute.xlu0 %2535 }
 0x433   :  { %2753 = vperm.xlu1 %3061, %v2694_v53  }
 0x435   :  { %v4484_v62 = vpop.permute.xlu0 %2541  ;;  %v2539_v0 = vpop.permute.xlu1 %2538 }
 0x436   :  { %v2593_v17 = vrot.slane %v2539_v0, %v4192_v7 }
 0x437   :  { %2759 = vperm.xlu1 %3061, %v2696_v11   ;;  %v4750_v11 = vld [vmem:[#allocation25_spill] sm:$0xff] }
 0x439   :  { %v4486_v57 = vpop.permute.xlu0 %2547 }
 0x43d   :  { %v4488_v9 = vpop.permute.xlu0 %2550 }
 0x43e   :  { %v2613_v34 = vrot.slane %v4488_v9, %v4222_v13 }
 0x441   :  { %v4493_v56 = vpop.permute.xlu0 %2553 }
 0x445   :  { %v4495_v60 = vpop.permute.xlu0 %2556 }
 0x449   :  { %v4499_v61 = vpop.permute.xlu0 %2717 }
 0x44d   :  { %v4501_v49 = vpop.permute.xlu0 %2559 }
 0x451   :  { %v4503_v51 = vpop.permute.xlu0 %2218 }
 0x455   :  { %v4507_v35 = vpop.permute.xlu0 %2723 }
 0x45b   :  { %2354 = vadd.xlane.f32.xlu1 %v4747_v24  ;;  %v1622_v24 = vmul.f32 %v4750_v11, %v4750_v11 }
 0x45f   :  { %2667 = vadd.xlane.f32.xlu1 %v2666_v37 }
 0x467   :  { %v1609_v44 = vpop.xlane.xlu1 %1608 }
 0x468   :  { %v1610_v41 = vrot.slane %v1609_v44, 4 }
 0x46a   :  { %v1611_v23 = vadd.f32 %v1610_v41, %v1609_v44  ;;  %v2588_v44 = vrot.slane %v2536_v1, %v4184_v29  ;;  %v2579_v41 = vrot.slane %v2530_v55, %v4180_v10 }
 0x46b   :  { %v1794_v21 = vpop.xlane.xlu1 %1793 }
 0x46c   :  { %v1795_v2 = vrot.slane %v1794_v21, 4  ;;  %v1612_v48 = vrot.slane %v1611_v23, 2 }
 0x46e   :  { %v1796_v18 = vadd.f32 %v1795_v2, %v1794_v21  ;;  %v1613_v38 = vadd.f32 %v1612_v48, %v1611_v23  ;;  %v2566_v23 = vpop.permute.xlu0 %2565  ;;  %v2584_v2 = vsel %vm1158_vm6, %v2583_v63, %v2579_v41 }
 0x46f   :  { %v1263_v50 = vpop.xlane.xlu1 %1262 }
 0x470   :  { %v1264_v31 = vrot.slane %v1263_v50, 4  ;;  %v1797_v32 = vrot.slane %v1796_v18, 2  ;;  %v1614_v59 = vrot.slane %v1613_v38, 1 }
 0x472   :  { %v1265_v12 = vadd.f32 %v1264_v31, %v1263_v50  ;;  %v1798_v14 = vadd.f32 %v1797_v32, %v1796_v18  ;;  %v1615_v53 = vadd.f32 %v1614_v59, %v1613_v38  ;;  %v2589_v18 = vsel %vm1165_vm7, %v2588_v44, %v2584_v2  ;;  %v2225_v31 = vpop.permute.xlu0 %2224 }
 0x473   :  { %v2545_v28 = vpop.permute.xlu1 %2544  ;;  %v2598_v50 = vrot.slane %v4484_v62, %v4198_v39  ;;  %v2594_v22 = vsel %vm1172_vm8, %v2593_v17, %v2589_v18  ;;  %v2608_v32 = vrot.slane %v4486_v57, %v4214_v54  ;;  %v2623_v57 = vrot.slane %v4495_v60, %v4238_v6 }
 0x474   :  { %v1266_v16 = vrot.slane %v1265_v12, 2  ;;  %v1799_v15 = vrot.slane %v1798_v14, 1  ;;  %v2603_v48 = vrot.slane %v2545_v28, %v4207_v42  ;;  %v2618_v28 = vrot.slane %v4493_v56, %v4228_v3 }
 0x475   :  { %v2599_v1 = vsel %vm1179_vm9, %v2598_v50, %v2594_v22  ;;  %v2638_v44 = vrot.slane %v2566_v23, %v4261_v19  ;;  %v2768_v50 = vrot.slane %v4499_v61, %v4175_v46  ;;  %v2778_v61 = vrot.slane %v4507_v35, %v4192_v7 }
 0x476   :  { %v1267_v30 = vadd.f32 %v1266_v16, %v1265_v12  ;;  %v1800_v37 = vadd.f32 %v1799_v15, %v1798_v14  ;;  %v2604_v55 = vsel %vm1186_vm10, %v2603_v48, %v2599_v1  ;;  %v2730_v16 = vpop.permute.xlu0 %2729  ;;  %v2301_v48 = vrot.slane %v2225_v31, %v4273_v52 }
 0x477   :  { %v2207_v47 = vpop.permute.xlu1 %2206  ;;  %v2609_v12 = vsel %vm1193_vm11, %v2608_v32, %v2604_v55  ;;  %v2788_v35 = vrot.slane %v2730_v16, %v4207_v42 }
 0x478   :  { %v1268_v4 = vrot.slane %v1267_v30, 1  ;;  %v2614_v38 = vsel %vm1200_vm12, %v2613_v34, %v2609_v12 }
 0x47a   :  { %v1269_v45 = vadd.f32 %v1268_v4, %v1267_v30  ;;  %v2271_v30 = vrot.slane %v2207_v47, %v4228_v3  ;;  %v2619_v4 = vsel %vm1207_vm13, %v2618_v28, %v2614_v38  ;;  %v2572_v9 = vpop.permute.xlu0 %2571 }
 0x47b   :  { %v2210_v5 = vpop.permute.xlu1 %2209  ;;  %v2624_v56 = vsel %vm1214_vm14, %v2623_v57, %v2619_v4 }
 0x47c   :  { %3033 = vpush %v1269_v45  ;;  %v2276_v26 = vrot.slane %v2210_v5, %v4238_v6  ;;  %v2272_v15 = vsel %vm1207_vm13, %v2271_v30, %v4351_v43  ;;  %v2628_v5 = vrot.slane %v4501_v49, %v4243_v33  ;;  %v2291_v43 = vrot.slane %v4503_v51, %v4261_v19 }
 0x47d   :  { %3035 = vpush %v1312_v8 }
 0x47e   :  { %3037 = vpush %v1615_v53  ;;  %v2277_v53 = vsel %vm1214_vm14, %v2276_v26, %v2272_v15  ;;  %v2575_v41 = vpop.permute.xlu0 %2574 }
 0x47f   :  { %3039 = vpush %v1622_v24  ;;  %v2213_v36 = vpop.permute.xlu1 %2212  ;;  %v2629_v24 = vsel %vm1221_vm15, %v2628_v5, %v2624_v56  ;;  %v2653_v12 = vrot.slane %v2575_v41, %v4279_v25 }
 0x480   :  { %3041 = vpush %v1800_v37  ;;  %v2281_v59 = vrot.slane %v2213_v36, %v4243_v33 }
 0x482   :  { %v2282_v60 = vsel %vm1221_vm15, %v2281_v59, %v2277_v53 }
 0x483   :  { %v2715_v21 = vpop.permute.xlu1 %2714 }
 0x484   :  { %v2764_v49 = vrot.slane %v2715_v21, %v4180_v10  ;;  %v2648_v10 = vrot.slane %v2572_v9, %v4273_v52 }
 0x486   :  { %v2769_v21 = vsel %vm1158_vm6, %v2768_v50, %v2764_v49  ;;  %vm4758_vm6 = vcmp.lt.s32.totalorder %v4731_v58, 32 }
 0x487   :  { %v2216_v40 = vpop.permute.xlu1 %2215 }
 0x488   :  { %v2286_v45 = vrot.slane %v2216_v40, %v4250_v20 }
 0x48a   :  { %v2287_v11 = vsel %vm4751_vm0, %v2286_v45, %v2282_v60  ;;  %vm4755_vm0 = vcmask 982912  }
 0x48b   :  { %v2721_v0 = vpop.permute.xlu1 %2720  ;;  %v2292_v18 = vsel %vm4753_vm4, %v2291_v43, %v2287_v11  ;;  %vm4757_vm4 = vmmov %vm4755_vm0 }
 0x48c   :  { %v2773_v2 = vrot.slane %v2721_v0, %v4184_v29  ;;  %v2739_v0 = vpop.permute.xlu0 %2738 }
 0x48e   :  { %v2774_v1 = vsel %vm1165_vm7, %v2773_v2, %v2769_v21 }
 0x48f   :  { %v2563_v62 = vpop.permute.xlu1 %2562  ;;  %v2779_v38 = vsel %vm1172_vm8, %v2778_v61, %v2774_v1  ;;  %vm4760_vm8 = vcmask 786112  }
 0x490   :  { %v2633_v47 = vrot.slane %v2563_v62, %v4250_v20  ;;  %v2745_v26 = vpop.permute.xlu0 %2744 }
 0x492   :  { %v2634_v36 = vsel %vm4752_vm5, %v2633_v47, %v2629_v24  ;;  %vm4756_vm5 = vcmask 1048512   ;;  %v2813_v47 = vrot.slane %v2745_v26, %v4243_v33 }
 0x493   :  { %v2222_v14 = vpop.permute.xlu1 %2221  ;;  %v2639_v51 = vsel %vm4754_vm2, %v2638_v44, %v2634_v36  ;;  %vm4759_vm7 = vmmov %vm4756_vm5  ;;  %v2855_v44 = vld [vmem:[#allocation4] sm:$0x1] }
 0x494   :  { %v2296_v37 = vrot.slane %v2222_v14, %v4267_v27  ;;  %v2751_v16 = vpop.permute.xlu0 %2750  ;;  %v2856_v41 = vsel %vm1260_vm1, %v2855_v44, 0.0 }
 0x495   :  { %v2823_v60 = vrot.slane %v2751_v16, %v4261_v19 }
 0x496   :  { %v2297_v22 = vsel %vm1242_vm3, %v2296_v37, %v2292_v18 }
 0x497   :  { %v2727_v8 = vpop.permute.xlu1 %2726  ;;  %v2302_v46 = vsel %vm4755_vm0, %v2301_v48, %v2297_v22 }
 0x498   :  { %v2783_v55 = vrot.slane %v2727_v8, %v4198_v39  ;;  %v2757_v11 = vpop.permute.xlu0 %2756 }
 0x499   :  { %v2833_v43 = vrot.slane %v2757_v11, %v4273_v52 }
 0x49a   :  { %v2784_v28 = vsel %vm1179_vm9, %v2783_v55, %v2779_v38  ;;  %vm4761_vm9 = vmmov %vm4754_vm2 }
 0x49b   :  { %v2569_v63 = vpop.permute.xlu1 %2568  ;;  %v2789_v4 = vsel %vm1186_vm10, %v2788_v35, %v2784_v28  ;;  %vm4762_vm10 = vmmov %vm4755_vm0 }
 0x49c   :  { %v2643_v17 = vrot.slane %v2569_v63, %v4267_v27 }
 0x49e   :  { %v2644_v23 = vsel %vm1242_vm3, %v2643_v17, %v2639_v51 }
 0x49f   :  { %v2228_v40 = vpop.permute.xlu1 %2227  ;;  %v2649_v32 = vsel %vm4757_vm4, %v2648_v10, %v2644_v23 }
 0x4a0   :  { %v2306_v29 = vrot.slane %v2228_v40, %v4279_v25  ;;  %v2654_v7 = vsel %vm4759_vm7, %v2653_v12, %v2649_v32 }
 0x4a1   :  { %v2656_v57 = vsel %vm1260_vm1, %v2654_v7, 0.0 }
 0x4a2   :  { %v2307_v31 = vsel %vm4756_vm5, %v2306_v29, %v2302_v46 }
 0x4a3   :  { %v2733_v34 = vpop.permute.xlu1 %2732  ;;  %v2309_v62 = vsel %vm4758_vm6, %v2307_v31, 0.0 }
 0x4a4   :  { %v2310_v39 = vsel %vm1260_vm1, %v2309_v62, 0.0  ;;  %v2793_v30 = vrot.slane %v2733_v34, %v4214_v54  ;;  %v2803_v54 = vrot.slane %v2739_v0, %v4228_v3 }
 0x4a5   :  { %2311 = vadd.xlane.f32.xlu0 %v2310_v39 }
 0x4a6   :  { %v2794_v59 = vsel %vm1193_vm11, %v2793_v30, %v2789_v4  ;;  %vm4763_vm11 = vmmov %vm4756_vm5 }
 0x4a7   :  { %v2736_v14 = vpop.permute.xlu1 %2735 }
 0x4a8   :  { %v2798_v58 = vrot.slane %v2736_v14, %v4222_v13 }
 0x4a9   :  { %2657 = vadd.xlane.f32.xlu0 %v2656_v57 }
 0x4aa   :  { %v2799_v9 = vsel %vm1200_vm12, %v2798_v58, %v2794_v59 }
 0x4ab   :  { %v2742_v45 = vpop.permute.xlu1 %2741  ;;  %v2804_v42 = vsel %vm1207_vm13, %v2803_v54, %v2799_v9 }
 0x4ac   :  { %v2808_v15 = vrot.slane %v2742_v45, %v4238_v6 }
 0x4ad   :  { %s3034_s1 = spop %3033 }
 0x4ae   :  { %v2809_v56 = vsel %vm1214_vm14, %v2808_v15, %v2804_v42  ;;  %s3036_s4 = spop %3035  ;;  %s1273_s8 = smul.f32 0.03125, %s3034_s1 }
 0x4af   :  { %v2748_v13 = vpop.permute.xlu1 %2747  ;;  %v2814_v5 = vsel %vm1221_vm15, %v2813_v47, %v2809_v56  ;;  %s3038_s5 = spop %3037 }
 0x4b0   :  { %v2818_v8 = vrot.slane %v2748_v13, %v4250_v20  ;;  %s3040_s6 = spop %3039  ;;  %s1620_s12 = smul.f32 0.25, %s3038_s5 }
 0x4b1   :  { %s3042_s7 = spop %3041  ;;  %s1627_s18 = smul.f32 0.015625, %s3040_s6 }
 0x4b2   :  { %v2819_v53 = vsel %vm4760_vm8, %v2818_v8, %v2814_v5  ;;  %s1621_s16 = ssub.f32 %s3036_s4, %s1620_s12 }
 0x4b3   :  { %v2754_v3 = vpop.permute.xlu1 %2753  ;;  %v2824_v24 = vsel %vm4761_vm9, %v2823_v60, %v2819_v53 }
 0x4b4   :  { %v2828_v6 = vrot.slane %v2754_v3, %v4267_v27  ;;  %s1628_s20 = sadd.f32 %s1627_s18, %s1621_s16 }
 0x4b6   :  { %v2829_v37 = vsel %vm1242_vm3, %v2828_v6, %v2824_v24  ;;  %s1631_s23 = smul.f32 0.020408163, %s1628_s20 }
 0x4b7   :  { %v2760_v33 = vpop.permute.xlu1 %2759  ;;  %v2834_v20 = vsel %vm4762_vm10, %v2833_v43, %v2829_v37 }
 0x4b8   :  { %v2838_v36 = vrot.slane %v2760_v33, %v4279_v25  ;;  %s1802_s25 = ssub.f32 %s1631_s23, %s3042_s7 }
 0x4ba   :  { %v2839_v63 = vsel %vm4763_vm11, %v2838_v36, %v2834_v20  ;;  %s1805_s29 = smul.f32 0.03125, %s1802_s25 }
 0x4bb   :  { %v2841_v19 = vsel %vm1260_vm1, %v2839_v63, 0.0 }
 0x4bc   :  { %2842 = vadd.xlane.f32.xlu0 %v2841_v19 }
 0x4c0   :  { %2857 = vadd.xlane.f32.xlu0 %v2856_v41 }
 0x4e8   :  { %v2355_v27 = vpop.xlane.xlu1 %2354 }
 0x4e9   :  { %v2356_v49 = vrot.slane %v2355_v27, 4 }
 0x4eb   :  { %v2357_v17 = vadd.f32 %v2356_v49, %v2355_v27 }
 0x4ec   :  { %v2668_v55 = vpop.xlane.xlu1 %2667 }
 0x4ed   :  { %v2358_v2 = vrot.slane %v2357_v17, 2  ;;  %v2671_v31 = vmul.f32 %v2668_v55, %v2668_v55 }
 0x4ef   :  { %v2359_v25 = vadd.f32 %v2358_v2, %v2357_v17 }
 0x4f1   :  { %v2360_v10 = vrot.slane %v2359_v25, 1 }
 0x4f3   :  { %v2361_v61 = vadd.f32 %v2360_v10, %v2359_v25 }
 0x532   :  { %v2312_v18 = vpop.xlane.xlu0 %2311 }
 0x533   :  { %v2313_v52 = vrot.slane %v2312_v18, 4 }
 0x535   :  { %v2314_v50 = vadd.f32 %v2313_v52, %v2312_v18 }
 0x536   :  { %v2658_v22 = vpop.xlane.xlu0 %2657 }
 0x537   :  { %v2315_v51 = vrot.slane %v2314_v50, 2  ;;  %v2659_v48 = vrot.slane %v2658_v22, 4 }
 0x539   :  { %v2660_v23 = vadd.f32 %v2659_v48, %v2658_v22  ;;  %v2316_v40 = vadd.f32 %v2315_v51, %v2314_v50 }
 0x53b   :  { %v2661_v21 = vrot.slane %v2660_v23, 2  ;;  %v2317_v29 = vrot.slane %v2316_v40, 1 }
 0x53d   :  { %v2318_v1 = vadd.f32 %v2317_v29, %v2316_v40  ;;  %v2662_v46 = vadd.f32 %v2661_v21, %v2660_v23 }
 0x53f   :  { %3043 = vpush %v2318_v1  ;;  %v2663_v0 = vrot.slane %v2662_v46, 1 }
 0x540   :  { %3045 = vpush %v2361_v61 }
 0x541   :  { %v2664_v32 = vadd.f32 %v2663_v0, %v2662_v46 }
 0x543   :  { %3047 = vpush %v2664_v32 }
 0x544   :  { %3049 = vpush %v2671_v31 }
 0x549   :  { %v2843_v12 = vpop.xlane.xlu0 %2842 }
 0x54a   :  { %v2844_v34 = vrot.slane %v2843_v12, 4 }
 0x54c   :  { %v2845_v62 = vadd.f32 %v2844_v34, %v2843_v12 }
 0x54d   :  { %v2858_v38 = vpop.xlane.xlu0 %2857 }
 0x54e   :  { %v2846_v39 = vrot.slane %v2845_v62, 2  ;;  %v2859_v28 = vrot.slane %v2858_v38, 4 }
 0x550   :  { %v2860_v30 = vadd.f32 %v2859_v28, %v2858_v38  ;;  %v2847_v7 = vadd.f32 %v2846_v39, %v2845_v62 }
 0x552   :  { %v2861_v35 = vrot.slane %v2860_v30, 2  ;;  %v2848_v14 = vrot.slane %v2847_v7, 1 }
 0x554   :  { %v2862_v26 = vadd.f32 %v2861_v35, %v2860_v30  ;;  %v2849_v4 = vadd.f32 %v2848_v14, %v2847_v7 }
 0x556   :  { %3051 = vpush %v2849_v4  ;;  %v2863_v58 = vrot.slane %v2862_v26, 1 }
 0x558   :  { %v2864_v57 = vadd.f32 %v2863_v58, %v2862_v26 }
 0x55a   :  { %3053 = vpush %v2864_v57 }
 0x570   :  { %s3044_s9 = spop %3043 }
 0x571   :  { %s2322_s10 = smul.f32 0.03125, %s3044_s9  ;;  %s3046_s14 = spop %3045 }
 0x573   :  { %s2869_s11 = sadd.f32 %s2322_s10, %s1273_s8 }
 0x574   :  { %s3048_s15 = spop %3047 }
 0x575   :  { %s2870_s13 = smul.f32 0.5, %s2869_s11  ;;  %s3050_s19 = spop %3049 }
 0x576   :  { %s2669_s17 = smul.f32 0.25, %s3048_s15  ;;  %s3170_s11 = scalar_lea.hbm %s4617_s2, 16 }
 0x577   :  { %2881 = sst [smem:[#allocation12 + $0x2]] %s2870_s13  ;;  %s2676_s22 = smul.f32 0.015625, %s3050_s19 }
 0x578   :  { %s2670_s21 = ssub.f32 %s3046_s14, %s2669_s17  ;;  %s2873_s5 = smul.f32 25.0, %s2870_s13 }
 0x579   :  { %p3171_p2 = scmp.ne.s32.totalorder %s4617_s2, %s3170_s11  ;;  %p3174_p3 = scmp.lt.u32.totalorder %s3170_s11, %s4617_s2 }
 0x57a   :  { %s2677_s24 = sadd.f32 %s2676_s22, %s2670_s21 }
 0x57b   :  { %p3176_p4 = pnand %p3174_p3, %p3171_p2 }
 0x57c   :  { %s2680_s26 = smul.f32 0.020408163, %s2677_s24 }
 0x587   :  { %s3052_s27 = spop %3051 }
 0x588   :  { %s2851_s28 = ssub.f32 %s2680_s26, %s3052_s27 }
 0x58a   :  { %s2854_s30 = smul.f32 0.03125, %s2851_s28 }
 0x58b   :  { %s3054_s0 = spop %3053 }
 0x58c   :  { %s2871_s3 = sadd.f32 %s2854_s30, %s1805_s29  ;;  %s2868_s1 = smul.f32 0.00390625, %s3054_s0 }
 0x58e   :  { %2883 = sst [smem:[#allocation12 + $0x3]] %s2871_s3  ;;  %s2872_s4 = smul.f32 25.0, %s2868_s1 }
 0x58f   :  { %2879 = sst [smem:[#allocation12 + $0x1]] %s2868_s1 }
 0x590   :  { %s2874_s6 = sadd.f32 %s2873_s5, %s2872_s4 }
 0x592   :  { %s2875_s8 = sadd.f32 %s2874_s6, %s2871_s3 }
 0x594   :  { %2877 = sst [smem:[#allocation12]] %s2875_s8 }
 0x595   :  { %3179 = shalt.err (!%p3176_p4)
}
 0x596   :  { %s3190_s13 = smov [#allocation12]  }
 0x597   :  { %2891 = dma.smem_to_hbm %s3190_s13, 16, %s4617_s2, [#allocation9]  }
 0x598   :  { %3184 = dma.done.wait [#allocation9], 16  }
 0x599   :  { %3185 = vsyncadd [#allocation9], 4294967280 }
 0x59a   :  { %2895 = sfence }
 0x59b   :  { %2896 = vsyncpa [#allocation8], 1 }
 0x59c   :  { %2897 = vsyncpa [#allocation11], 1 }
 0x59d   :  { %2898 = vsyncpa [#allocation9], 1 }

</bundles_post_ra>
